<compile_context>
chip_gen: v7x
topology: tpu7x:2x2x1
jax: 0.10.0
libtpu: 0.0.40
codegen_flags: <defaults>
</compile_context>

<pallas_src>
import jax
import jax.numpy as jnp
from jax.experimental import pallas as pl
from jax.experimental.pallas import tpu as pltpu


def _transition_up_conv_kernel(tiles_ref, w_ref, b_ref, out_ref):
    # tiles_ref : (1, 1, TH+2, Wc+2, C_in)  row-tile of the padded/cropped upsampled
    #                                       input, including its 2-row halo
    # w_ref     : (3, 3, C_in, C_out)       HWIO conv weights (VMEM resident)
    # b_ref     : (1, C_out)
    # out_ref   : (1, TH, Wc, C_out)
    _, th, wc, c_out = out_ref.shape
    c_in = w_ref.shape[2]

    x = tiles_ref[0, 0]                                     # (TH+2, Wc+2, C_in)
    acc = jnp.zeros((th * wc, c_out), dtype=jnp.float32)

    # 3x3 conv == 9 shifted matmuls on the MXU, f32 accumulate.
    for dy in range(3):
        for dx in range(3):
            win = x[dy:dy + th, dx:dx + wc, :]              # (TH, Wc, C_in)
            acc = acc + jnp.dot(win.reshape(th * wc, c_in),
                                w_ref[dy, dx],
                                preferred_element_type=jnp.float32)

    acc = acc + b_ref[...].astype(jnp.float32)              # broadcast (1, C_out)
    out_ref[0] = acc.reshape(th, wc, c_out).astype(out_ref.dtype)


def transition_up(x, skip, weight, bias, *, row_tile=8, compute_dtype=jnp.float32):
    """Pallas implementation of TransitionUp.forward.

    x      : (B, C_in, H, W)        float32
    skip   : (B, C_skip, Hs, Ws)    float32
    weight : (C_out, C_in, 3, 3)    float32  (PyTorch OIHW layout)
    bias   : (C_out,)               float32
    returns: (B, C_out + C_skip, Hs, Ws) float32
    """
    B, C_in, H, W = x.shape
    C_out = weight.shape[0]
    Hs, Ws = skip.shape[2], skip.shape[3]
    Hu, Wu = 2 * H, 2 * W

    # ---- glue (plain JAX): nearest 2x upsample, conv zero-pad, fused center-crop ----
    up = jnp.repeat(jnp.repeat(x, 2, axis=2), 2, axis=3)          # (B, C_in, Hu, Wu)
    up_p = jnp.pad(up, ((0, 0), (0, 0), (1, 1), (1, 1)))          # conv padding=1
    y0 = (Hu - Hs) // 2
    x0 = (Wu - Ws) // 2
    # cropped output pixel (y, x) needs padded-upsampled rows [y0+y, y0+y+2], cols likewise
    slab = up_p[:, :, y0:y0 + Hs + 2, x0:x0 + Ws + 2]             # (B, C_in, Hs+2, Ws+2)
    slab = jnp.transpose(slab, (0, 2, 3, 1))                      # NHWC (C in lanes)

    # ---- row tiling with a 2-row halo baked into each tile (blocked indexing only) ----
    th = max(1, min(row_tile, Hs))
    n_tiles = -(-Hs // th)
    hpad = n_tiles * th
    if hpad > Hs:
        slab = jnp.pad(slab, ((0, 0), (0, hpad - Hs), (0, 0), (0, 0)))
    tiles = jnp.stack([slab[:, r * th: r * th + th + 2] for r in range(n_tiles)],
                      axis=1)                                     # (B, n_tiles, th+2, Ws+2, C_in)

    w_hwio = jnp.transpose(weight, (2, 3, 1, 0)).astype(compute_dtype)  # (3,3,C_in,C_out)
    b2d = bias.reshape(1, C_out).astype(jnp.float32)
    tiles = tiles.astype(compute_dtype)

    conv = pl.pallas_call(
        _transition_up_conv_kernel,
        out_shape=jax.ShapeDtypeStruct((B, hpad, Ws, C_out), jnp.float32),
        grid_spec=pltpu.PrefetchScalarGridSpec(
            num_scalar_prefetch=0,
            grid=(B, n_tiles),
            in_specs=[
                pl.BlockSpec((1, 1, th + 2, Ws + 2, C_in),
                             lambda b, r: (b, r, 0, 0, 0)),
                pl.BlockSpec((3, 3, C_in, C_out), lambda b, r: (0, 0, 0, 0)),
                pl.BlockSpec((1, C_out), lambda b, r: (0, 0)),
            ],
            out_specs=pl.BlockSpec((1, th, Ws, C_out), lambda b, r: (b, r, 0, 0)),
        ),
        compiler_params=pltpu.CompilerParams(
            dimension_semantics=("parallel", "parallel"),
            vmem_limit_bytes=48 * 1024 * 1024),
    )(tiles, w_hwio, b2d)

    conv = conv[:, :Hs]                                           # drop row padding
    conv = jnp.transpose(conv, (0, 3, 1, 2))                      # back to NCHW
    return jnp.concatenate([conv, skip], axis=1)


def _reference_jax(x, skip, weight, bias):
    # Pure-JAX reference mirroring the PyTorch forward, for validation.
    up = jnp.repeat(jnp.repeat(x, 2, axis=2), 2, axis=3)
    out = jax.lax.conv_general_dilated(
        up, weight, window_strides=(1, 1), padding=((1, 1), (1, 1)),
        dimension_numbers=("NCHW", "OIHW", "NCHW"))
    out = out + bias.reshape(1, -1, 1, 1)
    _, _, h, w = out.shape
    Hs, Ws = skip.shape[2], skip.shape[3]
    x1 = (w - Ws) // 2
    y1 = (h - Hs) // 2
    out = out[:, :, y1:y1 + Hs, x1:x1 + Ws]
    return jnp.concatenate([out, skip], axis=1)


if __name__ == "__main__":
    key = jax.random.PRNGKey(0)
    k1, k2, k3, k4 = jax.random.split(key, 4)

    B, C_in, C_out, H, W = 2, 4, 8, 16, 16
    skip_C, Hs, Ws = 6, 30, 30        # smaller than 2H x 2W -> exercises center_crop_

    x = jax.random.normal(k1, (B, C_in, H, W), dtype=jnp.float32)
    skip = jax.random.normal(k2, (B, skip_C, Hs, Ws), dtype=jnp.float32)
    weight = 0.1 * jax.random.normal(k3, (C_out, C_in, 3, 3), dtype=jnp.float32)
    bias = 0.1 * jax.random.normal(k4, (C_out,), dtype=jnp.float32)

    out = transition_up(x, skip, weight, bias)
    out = jax.block_until_ready(out)

    ref = _reference_jax(x, skip, weight, bias)
    assert out.shape == (B, C_out + skip_C, Hs, Ws)
    assert jnp.allclose(out, ref, atol=1e-4, rtol=1e-4), float(jnp.max(jnp.abs(out - ref)))

    print("KERNEL_OK")
</pallas_src>

<mosaic_0001>
module attributes {stable_mosaic.version = 11 : i64} {
  func.func @_transition_up_conv_kernel(%arg0: i32, %arg1: i32, %arg2: memref<1x1x10x32x4xf32, #tpu.memory_space<vmem>>, %arg3: memref<3x3x4x8xf32, #tpu.memory_space<vmem>>, %arg4: memref<1x8xf32, #tpu.memory_space<vmem>>, %arg5: memref<1x8x30x8xf32, #tpu.memory_space<vmem>>) attributes {dimension_semantics = [#tpu.dimension_semantics<parallel>, #tpu.dimension_semantics<parallel>], iteration_bounds = array<i64: 2, 4>, scalar_prefetch = 0 : i64, scratch_operands = 0 : i64, tpu.core_type = #tpu.core_type<tc>, window_params = [{transform_indices = @transform_0, window_bounds = array<i64: 1, 1, 10, 32, 4>}, {pipeline_mode = #tpu.pipeline_mode<synchronous>, transform_indices = @transform_1, window_bounds = array<i64: 3, 3, 4, 8>}, {pipeline_mode = #tpu.pipeline_mode<synchronous>, transform_indices = @transform_2, window_bounds = array<i64: 1, 8>}, {transform_indices = @transform_3, window_bounds = array<i64: 1, 8, 30, 8>}]} {
    %c0 = arith.constant 0 : index
    %c0_0 = arith.constant 0 : index
    %c0_1 = arith.constant 0 : index
    %c0_2 = arith.constant 0 : index
    %c0_3 = arith.constant 0 : index
    %0 = vector.load %arg2[%c0, %c0_0, %c0_1, %c0_2, %c0_3] : memref<1x1x10x32x4xf32, #tpu.memory_space<vmem>>, vector<1x1x10x32x4xf32>
    %1 = vector.shape_cast %0 : vector<1x1x10x32x4xf32> to vector<10x32x4xf32>
    %cst = arith.constant 0.000000e+00 : f32
    %2 = vector.broadcast %cst : f32 to vector<240x8xf32>
    %3 = vector.extract_strided_slice %1 {offsets = [0, 0, 0], sizes = [8, 30, 4], strides = [1, 1, 1]} : vector<10x32x4xf32> to vector<8x30x4xf32>
    %4 = vector.shape_cast %3 : vector<8x30x4xf32> to vector<240x4xf32>
    %c0_4 = arith.constant 0 : index
    %c0_5 = arith.constant 0 : index
    %c0_6 = arith.constant 0 : index
    %c0_7 = arith.constant 0 : index
    %5 = vector.load %arg3[%c0_4, %c0_5, %c0_6, %c0_7] : memref<3x3x4x8xf32, #tpu.memory_space<vmem>>, vector<1x1x4x8xf32>
    %6 = vector.shape_cast %5 : vector<1x1x4x8xf32> to vector<4x8xf32>
    %cst_8 = arith.constant dense<0.000000e+00> : vector<240x8xf32>
    %7 = tpu.matmul %4, %6, %cst_8 {dimension_numbers = #tpu.dot_dimension_numbers<[1], [0], [0], [1], [0, 0, 1, 1], [], []>} : vector<240x4xf32>, vector<4x8xf32>, vector<240x8xf32> -> vector<240x8xf32>
    %8 = arith.addf %2, %7 : vector<240x8xf32>
    %9 = vector.extract_strided_slice %1 {offsets = [0, 1, 0], sizes = [8, 30, 4], strides = [1, 1, 1]} : vector<10x32x4xf32> to vector<8x30x4xf32>
    %10 = vector.shape_cast %9 : vector<8x30x4xf32> to vector<240x4xf32>
    %c0_9 = arith.constant 0 : index
    %c1 = arith.constant 1 : index
    %c0_10 = arith.constant 0 : index
    %c0_11 = arith.constant 0 : index
    %11 = vector.load %arg3[%c0_9, %c1, %c0_10, %c0_11] : memref<3x3x4x8xf32, #tpu.memory_space<vmem>>, vector<1x1x4x8xf32>
    %12 = vector.shape_cast %11 : vector<1x1x4x8xf32> to vector<4x8xf32>
    %cst_12 = arith.constant dense<0.000000e+00> : vector<240x8xf32>
    %13 = tpu.matmul %10, %12, %cst_12 {dimension_numbers = #tpu.dot_dimension_numbers<[1], [0], [0], [1], [0, 0, 1, 1], [], []>} : vector<240x4xf32>, vector<4x8xf32>, vector<240x8xf32> -> vector<240x8xf32>
    %14 = arith.addf %8, %13 : vector<240x8xf32>
    %15 = vector.extract_strided_slice %1 {offsets = [0, 2, 0], sizes = [8, 30, 4], strides = [1, 1, 1]} : vector<10x32x4xf32> to vector<8x30x4xf32>
    %16 = vector.shape_cast %15 : vector<8x30x4xf32> to vector<240x4xf32>
    %c0_13 = arith.constant 0 : index
    %c2 = arith.constant 2 : index
    %c0_14 = arith.constant 0 : index
    %c0_15 = arith.constant 0 : index
    %17 = vector.load %arg3[%c0_13, %c2, %c0_14, %c0_15] : memref<3x3x4x8xf32, #tpu.memory_space<vmem>>, vector<1x1x4x8xf32>
    %18 = vector.shape_cast %17 : vector<1x1x4x8xf32> to vector<4x8xf32>
    %cst_16 = arith.constant dense<0.000000e+00> : vector<240x8xf32>
    %19 = tpu.matmul %16, %18, %cst_16 {dimension_numbers = #tpu.dot_dimension_numbers<[1], [0], [0], [1], [0, 0, 1, 1], [], []>} : vector<240x4xf32>, vector<4x8xf32>, vector<240x8xf32> -> vector<240x8xf32>
    %20 = arith.addf %14, %19 : vector<240x8xf32>
    %21 = vector.extract_strided_slice %1 {offsets = [1, 0, 0], sizes = [8, 30, 4], strides = [1, 1, 1]} : vector<10x32x4xf32> to vector<8x30x4xf32>
    %22 = vector.shape_cast %21 : vector<8x30x4xf32> to vector<240x4xf32>
    %c1_17 = arith.constant 1 : index
    %c0_18 = arith.constant 0 : index
    %c0_19 = arith.constant 0 : index
    %c0_20 = arith.constant 0 : index
    %23 = vector.load %arg3[%c1_17, %c0_18, %c0_19, %c0_20] : memref<3x3x4x8xf32, #tpu.memory_space<vmem>>, vector<1x1x4x8xf32>
    %24 = vector.shape_cast %23 : vector<1x1x4x8xf32> to vector<4x8xf32>
    %cst_21 = arith.constant dense<0.000000e+00> : vector<240x8xf32>
    %25 = tpu.matmul %22, %24, %cst_21 {dimension_numbers = #tpu.dot_dimension_numbers<[1], [0], [0], [1], [0, 0, 1, 1], [], []>} : vector<240x4xf32>, vector<4x8xf32>, vector<240x8xf32> -> vector<240x8xf32>
    %26 = arith.addf %20, %25 : vector<240x8xf32>
    %27 = vector.extract_strided_slice %1 {offsets = [1, 1, 0], sizes = [8, 30, 4], strides = [1, 1, 1]} : vector<10x32x4xf32> to vector<8x30x4xf32>
    %28 = vector.shape_cast %27 : vector<8x30x4xf32> to vector<240x4xf32>
    %c1_22 = arith.constant 1 : index
    %c1_23 = arith.constant 1 : index
    %c0_24 = arith.constant 0 : index
    %c0_25 = arith.constant 0 : index
    %29 = vector.load %arg3[%c1_22, %c1_23, %c0_24, %c0_25] : memref<3x3x4x8xf32, #tpu.memory_space<vmem>>, vector<1x1x4x8xf32>
    %30 = vector.shape_cast %29 : vector<1x1x4x8xf32> to vector<4x8xf32>
    %cst_26 = arith.constant dense<0.000000e+00> : vector<240x8xf32>
    %31 = tpu.matmul %28, %30, %cst_26 {dimension_numbers = #tpu.dot_dimension_numbers<[1], [0], [0], [1], [0, 0, 1, 1], [], []>} : vector<240x4xf32>, vector<4x8xf32>, vector<240x8xf32> -> vector<240x8xf32>
    %32 = arith.addf %26, %31 : vector<240x8xf32>
    %33 = vector.extract_strided_slice %1 {offsets = [1, 2, 0], sizes = [8, 30, 4], strides = [1, 1, 1]} : vector<10x32x4xf32> to vector<8x30x4xf32>
    %34 = vector.shape_cast %33 : vector<8x30x4xf32> to vector<240x4xf32>
    %c1_27 = arith.constant 1 : index
    %c2_28 = arith.constant 2 : index
    %c0_29 = arith.constant 0 : index
    %c0_30 = arith.constant 0 : index
    %35 = vector.load %arg3[%c1_27, %c2_28, %c0_29, %c0_30] : memref<3x3x4x8xf32, #tpu.memory_space<vmem>>, vector<1x1x4x8xf32>
    %36 = vector.shape_cast %35 : vector<1x1x4x8xf32> to vector<4x8xf32>
    %cst_31 = arith.constant dense<0.000000e+00> : vector<240x8xf32>
    %37 = tpu.matmul %34, %36, %cst_31 {dimension_numbers = #tpu.dot_dimension_numbers<[1], [0], [0], [1], [0, 0, 1, 1], [], []>} : vector<240x4xf32>, vector<4x8xf32>, vector<240x8xf32> -> vector<240x8xf32>
    %38 = arith.addf %32, %37 : vector<240x8xf32>
    %39 = vector.extract_strided_slice %1 {offsets = [2, 0, 0], sizes = [8, 30, 4], strides = [1, 1, 1]} : vector<10x32x4xf32> to vector<8x30x4xf32>
    %40 = vector.shape_cast %39 : vector<8x30x4xf32> to vector<240x4xf32>
    %c2_32 = arith.constant 2 : index
    %c0_33 = arith.constant 0 : index
    %c0_34 = arith.constant 0 : index
    %c0_35 = arith.constant 0 : index
    %41 = vector.load %arg3[%c2_32, %c0_33, %c0_34, %c0_35] : memref<3x3x4x8xf32, #tpu.memory_space<vmem>>, vector<1x1x4x8xf32>
    %42 = vector.shape_cast %41 : vector<1x1x4x8xf32> to vector<4x8xf32>
    %cst_36 = arith.constant dense<0.000000e+00> : vector<240x8xf32>
    %43 = tpu.matmul %40, %42, %cst_36 {dimension_numbers = #tpu.dot_dimension_numbers<[1], [0], [0], [1], [0, 0, 1, 1], [], []>} : vector<240x4xf32>, vector<4x8xf32>, vector<240x8xf32> -> vector<240x8xf32>
    %44 = arith.addf %38, %43 : vector<240x8xf32>
    %45 = vector.extract_strided_slice %1 {offsets = [2, 1, 0], sizes = [8, 30, 4], strides = [1, 1, 1]} : vector<10x32x4xf32> to vector<8x30x4xf32>
    %46 = vector.shape_cast %45 : vector<8x30x4xf32> to vector<240x4xf32>
    %c2_37 = arith.constant 2 : index
    %c1_38 = arith.constant 1 : index
    %c0_39 = arith.constant 0 : index
    %c0_40 = arith.constant 0 : index
    %47 = vector.load %arg3[%c2_37, %c1_38, %c0_39, %c0_40] : memref<3x3x4x8xf32, #tpu.memory_space<vmem>>, vector<1x1x4x8xf32>
    %48 = vector.shape_cast %47 : vector<1x1x4x8xf32> to vector<4x8xf32>
    %cst_41 = arith.constant dense<0.000000e+00> : vector<240x8xf32>
    %49 = tpu.matmul %46, %48, %cst_41 {dimension_numbers = #tpu.dot_dimension_numbers<[1], [0], [0], [1], [0, 0, 1, 1], [], []>} : vector<240x4xf32>, vector<4x8xf32>, vector<240x8xf32> -> vector<240x8xf32>
    %50 = arith.addf %44, %49 : vector<240x8xf32>
    %51 = vector.extract_strided_slice %1 {offsets = [2, 2, 0], sizes = [8, 30, 4], strides = [1, 1, 1]} : vector<10x32x4xf32> to vector<8x30x4xf32>
    %52 = vector.shape_cast %51 : vector<8x30x4xf32> to vector<240x4xf32>
    %c2_42 = arith.constant 2 : index
    %c2_43 = arith.constant 2 : index
    %c0_44 = arith.constant 0 : index
    %c0_45 = arith.constant 0 : index
    %53 = vector.load %arg3[%c2_42, %c2_43, %c0_44, %c0_45] : memref<3x3x4x8xf32, #tpu.memory_space<vmem>>, vector<1x1x4x8xf32>
    %54 = vector.shape_cast %53 : vector<1x1x4x8xf32> to vector<4x8xf32>
    %cst_46 = arith.constant dense<0.000000e+00> : vector<240x8xf32>
    %55 = tpu.matmul %52, %54, %cst_46 {dimension_numbers = #tpu.dot_dimension_numbers<[1], [0], [0], [1], [0, 0, 1, 1], [], []>} : vector<240x4xf32>, vector<4x8xf32>, vector<240x8xf32> -> vector<240x8xf32>
    %56 = arith.addf %50, %55 : vector<240x8xf32>
    %c0_47 = arith.constant 0 : index
    %c0_48 = arith.constant 0 : index
    %57 = vector.load %arg4[%c0_47, %c0_48] : memref<1x8xf32, #tpu.memory_space<vmem>>, vector<1x8xf32>
    %58 = vector.broadcast %57 : vector<1x8xf32> to vector<240x8xf32>
    %59 = arith.addf %56, %58 : vector<240x8xf32>
    %60 = vector.shape_cast %59 : vector<240x8xf32> to vector<8x30x8xf32>
    %c0_49 = arith.constant 0 : index
    %c0_50 = arith.constant 0 : index
    %c0_51 = arith.constant 0 : index
    %c0_52 = arith.constant 0 : index
    %61 = vector.load %arg5[%c0_49, %c0_50, %c0_51, %c0_52] : memref<1x8x30x8xf32, #tpu.memory_space<vmem>>, vector<1x8x30x8xf32>
    %62 = vector.shape_cast %61 : vector<1x8x30x8xf32> to vector<8x30x8xf32>
    %63 = vector.shape_cast %60 : vector<8x30x8xf32> to vector<1x8x30x8xf32>
    tpu.vector_store %arg5[%c0_49, %c0_50, %c0_51, %c0_52], %63 {strides = array<i32>} : memref<1x8x30x8xf32, #tpu.memory_space<vmem>>, vector<1x8x30x8xf32>,
    return
  }
  func.func @transform_0(%arg0: i32, %arg1: i32) -> (i32, i32, i32, i32, i32) {
    %c0_i32 = arith.constant 0 : i32
    %c0_i32_0 = arith.constant 0 : i32
    %c0_i32_1 = arith.constant 0 : i32
    %c0_i32_2 = arith.constant 0 : i32
    return %arg0, %arg1, %c0_i32, %c0_i32_0, %c0_i32_1 : i32, i32, i32, i32, i32
  }
  func.func @transform_1(%arg0: i32, %arg1: i32) -> (i32, i32, i32, i32) {
    %c0_i32 = arith.constant 0 : i32
    %c0_i32_0 = arith.constant 0 : i32
    %c0_i32_1 = arith.constant 0 : i32
    %c0_i32_2 = arith.constant 0 : i32
    %c0_i32_3 = arith.constant 0 : i32
    return %c0_i32, %c0_i32_0, %c0_i32_1, %c0_i32_2 : i32, i32, i32, i32
  }
  func.func @transform_2(%arg0: i32, %arg1: i32) -> (i32, i32) {
    %c0_i32 = arith.constant 0 : i32
    %c0_i32_0 = arith.constant 0 : i32
    %c0_i32_1 = arith.constant 0 : i32
    return %c0_i32, %c0_i32_0 : i32, i32
  }
  func.func @transform_3(%arg0: i32, %arg1: i32) -> (i32, i32, i32, i32) {
    %c0_i32 = arith.constant 0 : i32
    %c0_i32_0 = arith.constant 0 : i32
    %c0_i32_1 = arith.constant 0 : i32
    return %arg0, %arg1, %c0_i32, %c0_i32_0 : i32, i32, i32, i32
  }
}

</mosaic_0001>

<bundles_post_ra>
// kernel: tpu_custom_call.1
= control target key start
LH: loop header
LB: loop body
LE: loop exit
PB: predicated region body
PF: predicated region fallthrough
CT: control target
= control target key end

     0   :  { %s9413_s12 = smov 0   ;;  %s9415_s13 = smov 0   ;;  %s13303_s0 = inlined_call_operand.vmem [shape: f32[2,4,10,32,4], index: 0, kind: input, shape index: {}]   ;;  %s13304_s1 = inlined_call_operand.vmem [shape: f32[3,3,4,8], index: 1, kind: input, shape index: {}]   ;;  %s13305_s2 = inlined_call_operand.vmem [shape: f32[1,8], index: 2, kind: input, shape index: {}]   ;;  %s13306_s3 = inlined_call_operand.vmem [shape: f32[2,32,30,8], index: 3, kind: output, shape index: {}]  }
   0x1   :  { %s9417_s14 = smov 0   ;;  %s9419_s15 = smov 0  }
   0x2   :  { %s9421_s16 = smov 0  }
   0x3 LB: > { %s22_s17 = sadd.s32 1, %s9382_s14  ;;  %s25_s18 = sadd.s32 1, %s9386_s15  ;;  %s9390_s16 = sphi %s9421_s16, %s13_s16   ;;  %s9386_s15 = sphi %s9419_s15, %s14550_s15   ;;  %s9382_s14 = sphi %s9417_s14, %s14549_s14   ;;  %s9378_s13 = sphi %s9415_s13, %s14548_s13   ;;  %s9374_s12 = sphi %s9413_s12, %s14547_s12  }
   0x4   : > { %p23_p0 = scmp.ge.s32.totalorder %s22_s17, 4  ;;  %p8008_p1 = scmp.ge.s32.totalorder %s9390_s16, 1 }
   0x5   : > { %p157_p2 = scmp.lt.s32.totalorder %s9390_s16, 9 }
   0x6   : > { %s14552_s17 = smov (%p23_p0, %s22_s17), 0  ;;  %s14554_s18 = smov (!%p23_p0, %s25_s18), %s9386_s15 }
   0x7   : > { %p158_p3 = pnand %p8008_p1, %p157_p2  ;;  %p27_p4 = scmp.ge.s32.totalorder %s14554_s18, 2 }
   0x9   : > { %s14556_s18 = smov (%p27_p4, %s14554_s18), 0  ;;  %161 = sbr.rel (%p158_p3) target bundleno = 733 (0x2dd), region = 32 }
  0x10   : > { %vm1775_vm0 = vcmask 1043456   ;;  %v8154_v0 = vld [vmem:[%s13304_s1 + $0x10] sm:$0xf]  ;;  %v8022_v1 = vld [vmem:[%s13304_s1 + $0x4] sm:$0xf]  ;;  %p190_p5 = scmp.lt.s32.totalorder %s9378_s13, 1  ;;  %v286_v2 = vlaneseq }
  0x11   : > { %8790 = vmatprep.subr.msk.mxu0 %vm1775_vm0, %v8154_v0  ;;  %8602 = vmatprep.subr.msk.mxu1 %vm1775_vm0, %v8022_v1  ;;  %p192_p6 = scmp.lt.s32.totalorder %s9374_s12, 3  ;;  %v9392_v3 = vmov 1983009808   ;;  %v9461_v5 = vld [vmem:[%s13304_s1 + $0x14] sm:$0xf]  ;;  %vm827_vm1 = vcmask 1040384  }
  0x12   : > { %8791 = vmatpush3.msk.msra.mxu0 %vm1775_vm0, %v8154_v0  ;;  %8603 = vmatpush3.msk.msra.mxu1 %vm1775_vm0, %v8022_v1  ;;  %s14558_s13 = smov (!%p190_p5, %s9378_s13), 1  ;;  %v284_v4 = vunpack.c.l.s4 %v9392_v3  ;;  %v287_v6 = vshrl.u32 %v286_v2, 7  ;;  %v9469_v7 = vld [vmem:[%s13304_s1] sm:$0xf]  ;;  %vm828_vm2 = vcmask 1042434   ;;  %vm830_vm4 = vcmask 1044484  }
  0x13   : > { %s193_s25 = scalar_select %p192_p6, %s9374_s12, 3  ;;  %8837 = vmatprep.subr.msk.mxu0 %vm1775_vm0, %v9461_v5  ;;  %8649 = vmatprep.subr.msk.mxu1 %vm1775_vm0, %v9469_v7  ;;  %vm829_vm3 = vmor %vm827_vm1, %vm828_vm2  ;;  %vm832_vm5 = vcmask 1046534   ;;  %v13776_v27 = vmov 0  ;;  %vm1714_vm8 = vcmask 31744   ;;  %vm7871_vm9 = vcmask 64512  }
  0x14   : > { %s9268_s28 = smul.u32 160, %s14558_s13  ;;  %v285_v8 = vunpack.c.0.s8 %v284_v4  ;;  %vm831_vm6 = vmor %vm829_vm3, %vm830_vm4  ;;  %vm7875_vm10 = vcmask 62464  }
  0x15   : > { %s9267_s29 = smul.u32 40, %s193_s25  ;;  %vm9511_vm7 = vmor %vm831_vm6, %vm832_vm5 }
  0x16   : > { %v9474_v9 = vsub.s32 %v285_v8, %v287_v6  ;;  %v13777_v27 = vsel %vm9511_vm7, 4294967295, %v13776_v27 }
  0x17   : > { %s196_s30 = sadd.s32 %s9268_s28, %s9267_s29  ;;  %13778 = vst [vmem:[#allocation8_spill] sm:$0xff] %v13777_v27  ;;  %s8010_s29 = sshll.u32 %s9374_s12, 3 }
  0x18   : > { %s8009_s4 = sshll.u32 %s196_s30, 3  ;;  %p202_p7 = scmp.lt.s32.totalorder %s8010_s29, 31 }
  0x19   : > { %s9479_s7 = scalar_lea.vmem %s13303_s0, %s8009_s4  ;;  %s8012_s12 = sshll.u32 %s14558_s13, 7 }
  0x1a   : > { %v210_v10 = vld [vmem:[%s9479_s7] sm:$0xff]  ;;  %v211_v11 = vld [vmem:[%s9479_s7 + $0x8] sm:$0xff]  ;;  %v9484_v12 = vld [vmem:[%s9479_s7 + $0x18] sm:$0xff]  ;;  %s14560_s29 = smov (!%p202_p7, %s8010_s29), 31 }
  0x1b   : > { %v282_v13 = vcombine.high %v210_v10, %v210_v10  ;;  %v9487_v14 = vrot.slane %v210_v10, %v9474_v9  ;;  %v299_v15 = vcombine.high %v211_v11, %v211_v11  ;;  %v9490_v16 = vrot.slane %v211_v11, %v9474_v9  ;;  %v214_v17 = vld [vmem:[%s9479_s7 + $0x20] sm:$0xff]  ;;  %v215_v18 = vld [vmem:[%s9479_s7 + $0x28] sm:$0xff]  ;;  %s8011_s5 = sshll.u32 %s14560_s29, 2 }
  0x1c   : > { %v333_v19 = vcombine.high %v9484_v12, %v9484_v12  ;;  %v349_v20 = vcombine.high %v214_v17, %v214_v17  ;;  %v9497_v21 = vrot.slane %v214_v17, %v9474_v9  ;;  %v366_v22 = vcombine.high %v215_v18, %v215_v18  ;;  %s12963_s6 = sadd.s32 %s8012_s12, %s8011_s5 }
  0x1d   : > { %13770 = vst [vmem:[#allocation2_spill] sm:$0xff] %v9487_v14  ;;  %13771 = vst [vmem:[#allocation3_spill] sm:$0xff] %v9490_v16  ;;  %v9500_v23 = vrot.slane %v282_v13, %v9474_v9  ;;  %v9504_v24 = vcombine.high %v9487_v14, %v9487_v14  ;;  %v9507_v25 = vrot.slane %v299_v15, %v9474_v9  ;;  %v8014_v26 = vrot.slane %v9487_v14, 9  ;;  %s8013_s13 = sshll.u32 %s12963_s6, 3 }
  0x1e   : > { %13772 = vst [vmem:[#allocation4_spill] sm:$0xff] %v9497_v21  ;;  %v845_v28 = vrot.slane %v9490_v16, 7  ;;  %v9517_v29 = vrot.slane %v333_v19, %v9474_v9  ;;  %v9520_v30 = vrot.slane %v349_v20, %v9474_v9  ;;  %v9524_v31 = vcombine.high %v9497_v21, %v9497_v21  ;;  %s12980_s9 = scalar_lea.vmem %s13306_s3, %s8013_s13 }
  0x1f   : > { %13773 = vst [vmem:[#allocation5_spill] sm:$0xff] %v9500_v23  ;;  %13774 = vst [vmem:[#allocation6_spill] sm:$0xff] %v9504_v24  ;;  %v9528_v32 = vcombine.high %v9500_v23, %v9500_v23  ;;  %v836_v33 = vrot.slane %v9504_v24, 7  ;;  %v839_v34 = vrot.slane %v9500_v23, 7  ;;  %v9533_v35 = vrot.slane %v215_v18, %v9474_v9 }
  0x20   : > { %13775 = vst [vmem:[#allocation7_spill] sm:$0xff] %v9507_v25  ;;  %13779 = vst [vmem:[#allocation9_spill] sm:$0xff] %v9517_v29  ;;  %v9535_v36 = vrot.slane %v845_v28, 2  ;;  %v9539_v37 = vcombine.high %v9520_v30, %v9520_v30  ;;  %v9542_v38 = vrot.slane %v366_v22, %v9474_v9  ;;  %v819_v39 = vcombine.high %v9517_v29, %v9517_v29 }
  0x21   : > { %13780 = vst [vmem:[#allocation10_spill] sm:$0xff] %v9520_v30  ;;  %13781 = vst [vmem:[#allocation11_spill] sm:$0xff] %v9524_v31  ;;  %v837_v40 = vsel %vm9511_vm7, %v8014_v26, %v836_v33  ;;  %v838_v41 = vrot.slane %v836_v33, 2  ;;  %v841_v42 = vrot.slane %v839_v34, 2  ;;  %v842_v43 = vrot.slane %v9528_v32, 7  ;;  %v212_v26 = vld [vmem:[%s9479_s7 + $0x10] sm:$0xff] }
  0x22   : > { %13782 = vst [vmem:[#allocation12_spill] sm:$0xff] %v9528_v32  ;;  %13783 = vst [vmem:[#allocation13_spill] sm:$0xff] %v9533_v35  ;;  %v9551_v44 = vcombine.high %v9533_v35, %v9533_v35  ;;  %v875_v45 = vrot.slane %v9517_v29, 7  ;;  %v878_v46 = vrot.slane %v819_v39, 7  ;;  %v8015_v47 = vrot.slane %v9497_v21, 9 }
  0x23   : > { %13784 = vst [vmem:[#allocation14_spill] sm:$0xff] %v9539_v37  ;;  %13785 = vst [vmem:[#allocation15_spill] sm:$0xff] %v9542_v38  ;;  %v840_v48 = vsel %vm9511_vm7, %v838_v41, %v839_v34  ;;  %v843_v49 = vsel %vm9511_vm7, %v841_v42, %v842_v43  ;;  %v844_v50 = vrot.slane %v842_v43, 2  ;;  %v882_v51 = vrot.slane %v9524_v31, 7 }
  0x24   : > { %13786 = vst [vmem:[#allocation16_spill] sm:$0xff] %v9551_v44  ;;  %v1204_v52 = vcombine.low %v837_v40, %v840_v48  ;;  %v877_v53 = vrot.slane %v875_v45, 2  ;;  %v885_v54 = vrot.slane %v9520_v30, 7  ;;  %v888_v55 = vrot.slane %v9539_v37, 7 }
  0x25   : > { %v846_v56 = vsel %vm9511_vm7, %v844_v50, %v845_v28  ;;  %v883_v57 = vsel %vm9511_vm7, %v8015_v47, %v882_v51  ;;  %v884_v58 = vrot.slane %v882_v51, 2  ;;  %v891_v59 = vrot.slane %v9533_v35, 7 }
  0x26   : > { %v1205_v60 = vcombine.low %v843_v49, %v846_v56  ;;  %v1212_v61 = vrot.slane %v1204_v52, %v9474_v9  ;;  %v879_v62 = vsel %vm9511_vm7, %v877_v53, %v878_v46  ;;  %v887_v63 = vrot.slane %v885_v54, 2  ;;  %v216_v49 = vld [vmem:[%s9479_s7 + $0x30] sm:$0xff] }
  0x27   : > { %v9574_v0 = vsel %vm9511_vm7, %v884_v58, %v885_v54  ;;  %v890_v1 = vrot.slane %v888_v55, 2  ;;  %v893_v2 = vrot.slane %v891_v59, 2  ;;  %v894_v3 = vrot.slane %v9551_v44, 7 }
  0x28   : > { %v1219_v4 = vrot.slane %v1205_v60, %v9474_v9  ;;  %v9580_v6 = vsel %vm9511_vm7, %v887_v63, %v888_v55  ;;  %v897_v8 = vrot.slane %v9542_v38, 7  ;;  %v9583_v10 = vcombine.low %v879_v62, %v883_v57 }
  0x29   : > { %v9587_v11 = vsel %vm9511_vm7, %v890_v1, %v891_v59  ;;  %v9591_v13 = vsel %vm9511_vm7, %v893_v2, %v894_v3  ;;  %v896_v15 = vrot.slane %v894_v3, 2  ;;  %v4182_v20 = vcombine.low %v883_v57, %v9574_v0 }
  0x2a   : > { %v1220_v18 = vcombine.low %v1212_v61, %v1219_v4  ;;  %v4183_v22 = vcombine.low %v9580_v6, %v9587_v11  ;;  %v9607_v33 = vcombine.high %v9490_v16, %v9490_v16  ;;  %v9611_v34 = vcombine.high %v9507_v25, %v9507_v25 }
  0x2b   : > { %v9603_v28 = vsel %vm9511_vm7, %v896_v15, %v897_v8  ;;  %v9614_v39 = vrot.slane %v212_v26, %v9474_v9  ;;  %v4190_v40 = vrot.slane %v4182_v20, %v9474_v9  ;;  %v851_v43 = vrot.slane %v9507_v25, 7 }
  0x2c   : > { %13787 = vst [vmem:[#allocation17_spill] sm:$0xff] %v9607_v33  ;;  %13788 = vst [vmem:[#allocation18_spill] sm:$0xff] %v9611_v34  ;;  %8604 = vmatprep.mubr.msk.f32.mxu1 %vm1714_vm8, %v1220_v18  ;;  %v4197_v41 = vrot.slane %v4183_v22, %v9474_v9  ;;  %v4199_v42 = vcombine.low %v9591_v13, %v9603_v28  ;;  %v848_v46 = vrot.slane %v9607_v33, 7  ;;  %v854_v47 = vrot.slane %v9611_v34, 7 }
  0x2d   : > { %13789 = vst [vmem:[#allocation19_spill] sm:$0xff] %v9614_v39  ;;  %v857_v48 = vrot.slane %v9614_v39, 7  ;;  %v9628_v50 = vcombine.high %v9542_v38, %v9542_v38  ;;  %v853_v52 = vrot.slane %v851_v43, 2  ;;  %v9631_v53 = vrot.slane %v216_v49, %v9474_v9 }
  0x2e   : > { %v4198_v51 = vcombine.low %v4190_v40, %v4197_v41  ;;  %v899_v54 = vrot.slane %v897_v8, 2  ;;  %v849_v55 = vsel %vm9511_vm7, %v9535_v36, %v848_v46  ;;  %v850_v56 = vrot.slane %v848_v46, 2 }
  0x2f   : > { %13790 = vst [vmem:[#allocation20_spill] sm:$0xff] %v9628_v50  ;;  %13791 = vst [vmem:[#allocation21_spill] sm:$0xff] %v9631_v53  ;;  %v856_v57 = vrot.slane %v854_v47, 2  ;;  %v900_v58 = vrot.slane %v9628_v50, 7  ;;  %v855_v59 = vsel %vm9511_vm7, %v853_v52, %v854_v47  ;;  %v903_v60 = vrot.slane %v9631_v53, 7 }
  0x30   : > { %8792 = vmatprep.mubr.msk.f32.mxu0 %vm1714_vm8, %v4198_v51  ;;  %v4207_v61 = vrot.slane %v4199_v42, %v9474_v9  ;;  %v316_v62 = vcombine.high %v212_v26, %v212_v26  ;;  %v852_v63 = vsel %vm9511_vm7, %v850_v56, %v851_v43  ;;  %v9655_v15 = vcombine.high %v9614_v39, %v9614_v39  ;;  %v217_v51 = vld [vmem:[%s9479_s7 + $0x38] sm:$0xff] }
  0x31   : > { %v858_v36 = vsel %vm9511_vm7, %v856_v57, %v857_v48  ;;  %v9648_v1 = vsel %vm9511_vm7, %v899_v54, %v900_v58  ;;  %v902_v2 = vrot.slane %v900_v58, 2  ;;  %v1221_v3 = vcombine.low %v849_v55, %v852_v63 }
  0x32   : > { %v1222_v4 = vcombine.low %v855_v59, %v858_v36  ;;  %v9651_v8 = vrot.slane %v316_v62, %v9474_v9  ;;  %13793 = vst [vmem:[#allocation23_spill] sm:$0xff] %v9655_v15  ;;  %v9663_v20 = vrot.slane %v9484_v12, %v9474_v9  ;;  %v859_v22 = vrot.slane %v857_v48, 2 }
  0x33   : > { %v9659_v18 = vsel %vm9511_vm7, %v902_v2, %v903_v60  ;;  %v383_v26 = vcombine.high %v216_v49, %v216_v49  ;;  %v1229_v40 = vrot.slane %v1221_v3, %v9474_v9  ;;  %v860_v46 = vrot.slane %v9655_v15, 7 }
  0x34   : > { %13792 = vst [vmem:[#allocation22_spill] sm:$0xff] %v9651_v8  ;;  %13794 = vst [vmem:[#allocation24_spill] sm:$0xff] %v9663_v20  ;;  %v1236_v41 = vrot.slane %v1222_v4, %v9474_v9  ;;  %v4200_v42 = vcombine.low %v9648_v1, %v9659_v18  ;;  %v9671_v43 = vcombine.high %v9651_v8, %v9651_v8  ;;  %v863_v47 = vrot.slane %v9651_v8, 7 }
  0x35   : > { %v869_v12 = vrot.slane %v9663_v20, 7  ;;  %v9678_v48 = vrot.slane %v383_v26, %v9474_v9  ;;  %v9684_v55 = vcombine.high %v9631_v53, %v9631_v53  ;;  %v861_v56 = vsel %vm9511_vm7, %v859_v22, %v860_v46 }
  0x36   : > { %13795 = vst [vmem:[#allocation25_spill] sm:$0xff] %v9671_v43  ;;  %v1237_v49 = vcombine.low %v1229_v40, %v1236_v41  ;;  %v4214_v52 = vrot.slane %v4200_v42, %v9474_v9  ;;  %v866_v54 = vrot.slane %v9671_v43, 7  ;;  %v862_v57 = vrot.slane %v860_v46, 2 }
  0x37   : > { %13796 = vst [vmem:[#allocation26_spill] sm:$0xff] %v9678_v48  ;;  %13797 = vst [vmem:[#allocation27_spill] sm:$0xff] %v9684_v55  ;;  %v865_v58 = vrot.slane %v863_v47, 2  ;;  %v9690_v59 = vcombine.high %v9678_v48, %v9678_v48  ;;  %v400_v36 = vcombine.high %v217_v51, %v217_v51  ;;  %v9694_v2 = vrot.slane %v217_v51, %v9474_v9 }
  0x38   : > { %8605 = vmatmul.mubr.msk.f32.vlgmr.msra.gmra.mrb[0].mxu1 %vm1714_vm8, %v1237_v49  ;;  %v4215_v62 = vcombine.low %v4207_v61, %v4214_v52  ;;  %v868_v63 = vrot.slane %v866_v54, 2  ;;  %v864_v3 = vsel %vm9511_vm7, %v862_v57, %v863_v47  ;;  %v905_v22 = vrot.slane %v903_v60, 2  ;;  %v9706_v61 = vld [vmem:[%s13304_s1 + $0x18] sm:$0xf]  ;;  %v218_v57 = vld [vmem:[%s9479_s7 + $0x40] sm:$0xff] }
  0x39   : > { %13798 = vst [vmem:[#allocation28_spill] sm:$0xff] %v9690_v59  ;;  %13799 = vst [vmem:[#allocation29_spill] sm:$0xff] %v9694_v2  ;;  %v867_v4 = vsel %vm9511_vm7, %v865_v58, %v866_v54  ;;  %v906_v26 = vrot.slane %v9684_v55, 7  ;;  %8650 = vmatpush3.msk.msra.mxu1 %vm1775_vm0, %v9469_v7  ;;  %v1238_v41 = vcombine.low %v861_v56, %v864_v3  ;;  %v909_v60 = vrot.slane %v9678_v48, 7 }
  0x3a   : > { %8793 = vmatmul.mubr.msk.f32.vlgmr.msra.gmra.mrb[0].mxu0 %vm1714_vm8, %v4215_v62  ;;  %v870_v40 = vsel %vm9511_vm7, %v868_v63, %v869_v12  ;;  %v9712_v42 = vrot.slane %v400_v36, %v9474_v9  ;;  %v912_v51 = vrot.slane %v9690_v59, 7  ;;  %v915_v54 = vrot.slane %v9694_v2, 7 }
  0x3b   : > { %8838 = vmatpush3.msk.msra.mxu0 %vm1775_vm0, %v9461_v5  ;;  %v1239_v7 = vcombine.low %v867_v4, %v870_v40  ;;  %v9719_v46 = vsel %vm9511_vm7, %v905_v22, %v906_v26  ;;  %v908_v47 = vrot.slane %v906_v26, 2  ;;  %v1246_v49 = vrot.slane %v1238_v41, %v9474_v9 }
  0x3c   : > { %13800 = vst [vmem:[#allocation30_spill] sm:$0xff] %v9712_v42  ;;  %v911_v52 = vrot.slane %v909_v60, 2  ;;  %v9726_v56 = vcombine.high %v9663_v20, %v9663_v20  ;;  %8884 = vmatprep.subr.msk.mxu0 %vm1775_vm0, %v9706_v61  ;;  %v914_v62 = vrot.slane %v912_v51, 2  ;;  %v871_v63 = vrot.slane %v869_v12, 2 }
  0x3d   : > { %v1253_v5 = vrot.slane %v1239_v7, %v9474_v9  ;;  %v9734_v58 = vsel %vm9511_vm7, %v908_v47, %v909_v60  ;;  %v1270_v22 = vrot.slane %v9583_v10, %v9474_v9  ;;  %v9751_v12 = vcombine.high %v9694_v2, %v9694_v2 }
  0x3e   : > { %13801 = vst [vmem:[#allocation31_spill] sm:$0xff] %v9726_v56  ;;  %v9738_v36 = vsel %vm9511_vm7, %v911_v52, %v912_v51  ;;  %v4216_v3 = vcombine.low %v9719_v46, %v9734_v58  ;;  %v872_v4 = vrot.slane %v9726_v56, 7  ;;  %v9747_v40 = vsel %vm9511_vm7, %v914_v62, %v915_v54 }
  0x3f   : > { %v1254_v26 = vcombine.low %v1246_v49, %v1253_v5  ;;  %13802 = vst [vmem:[#allocation32_spill] sm:$0xff] %v9751_v12  ;;  %v9754_v41 = vrot.slane %v218_v57, %v9474_v9  ;;  %v4217_v60 = vcombine.low %v9738_v36, %v9747_v40  ;;  %v9768_v49 = vcombine.high %v9712_v42, %v9712_v42 }
  0x40   : > { %v4224_v7 = vrot.slane %v4216_v3, %v9474_v9  ;;  %v873_v10 = vsel %vm9511_vm7, %v871_v63, %v872_v4  ;;  %v874_v47 = vrot.slane %v872_v4, 2  ;;  %v917_v52 = vrot.slane %v915_v54, 2 }
  0x41   : > { %13803 = vst [vmem:[#allocation33_spill] sm:$0xff] %v9754_v41  ;;  %8607 = vmatprep.mubr.msk.f32.mxu1 %vm1714_vm8, %v1254_v26  ;;  %v9764_v51 = vcombine.high %v9754_v41, %v9754_v41  ;;  %13805 = vst [vmem:[#allocation35_spill] sm:$0xff] %v9768_v49  ;;  %v918_v5 = vrot.slane %v9751_v12, 7  ;;  %v4231_v62 = vrot.slane %v4217_v60, %v9474_v9  ;;  %v921_v3 = vrot.slane %v9712_v42, 7 }
  0x42   : > { %v876_v63 = vsel %vm9511_vm7, %v874_v47, %v875_v45  ;;  %v8016_v4 = vrot.slane %v9754_v41, 9  ;;  %v924_v17 = vrot.slane %v9768_v49, 7  ;;  %v13806_v45 = vcombine.low %v9574_v0, %v9580_v6 }
  0x43   : > { %13804 = vst [vmem:[#allocation34_spill] sm:$0xff] %v9764_v51  ;;  %v1255_v26 = vcombine.low %v873_v10, %v876_v63  ;;  %v9780_v19 = vsel %vm9511_vm7, %v917_v52, %v918_v5  ;;  %v920_v54 = vrot.slane %v918_v5, 2  ;;  %v4232_v21 = vcombine.low %v4224_v7, %v4231_v62  ;;  %v219_v7 = vld [vmem:[%s9479_s7 + $0x48] sm:$0xff] }
  0x44   : > { %v923_v20 = vrot.slane %v921_v3, 2  ;;  %v928_v60 = vrot.slane %v9764_v51, 7  ;;  %v1280_v47 = vrot.slane %v13806_v45, %v9474_v9  ;;  %v13807_v52 = vcombine.low %v9587_v11, %v9591_v13 }
  0x45   : > { %v1263_v29 = vrot.slane %v1255_v26, %v9474_v9  ;;  %v9791_v10 = vsel %vm9511_vm7, %v920_v54, %v921_v3  ;;  %v416_v62 = vcombine.high %v218_v57, %v218_v57  ;;  %8795 = vmatprep.mubr.msk.f32.mxu0 %vm1714_vm8, %v4232_v21  ;;  %v9810_v3 = vrot.slane %v219_v7, %v9474_v9 }
  0x46   : > { %v1287_v5 = vrot.slane %v13807_v52, %v9474_v9  ;;  %v9801_v63 = vsel %vm9511_vm7, %v923_v20, %v924_v17  ;;  %v9805_v0 = vsel %vm9511_vm7, %v8016_v4, %v928_v60  ;;  %v4233_v6 = vcombine.low %v9780_v19, %v9791_v10 }
  0x47   : > { %13808 = vst [vmem:[#allocation36_spill] sm:$0xff] %v9810_v3  ;;  %v1271_v11 = vcombine.low %v1263_v29, %v1270_v22  ;;  %v4234_v13 = vcombine.low %v9801_v63, %v9805_v0  ;;  %v9815_v57 = vrot.slane %v416_v62, %v9474_v9  ;;  %v9820_v20 = vcombine.high %v9810_v3, %v9810_v3 }
  0x48   : > { %v1288_v21 = vcombine.low %v1280_v47, %v1287_v5  ;;  %v4241_v17 = vrot.slane %v4233_v6, %v9474_v9  ;;  %v930_v4 = vrot.slane %v928_v60, 2  ;;  %v937_v26 = vrot.slane %v9810_v3, 7  ;;  %v220_v5 = vld [vmem:[%s9479_s7 + $0x50] sm:$0xff] }
  0x49   : > { %13809 = vst [vmem:[#allocation37_spill] sm:$0xff] %v9815_v57  ;;  %13810 = vst [vmem:[#allocation38_spill] sm:$0xff] %v9820_v20  ;;  %8608 = vmatmul.mubr.msk.f32.gmra.mrb[2].mxu1 %vm1714_vm8, %v1271_v11  ;;  %v4248_v29 = vrot.slane %v4234_v13, %v9474_v9  ;;  %v9827_v22 = vcombine.high %v9815_v57, %v9815_v57  ;;  %v931_v54 = vrot.slane %v9815_v57, 7  ;;  %v940_v60 = vrot.slane %v9820_v20, 7 }
  0x4a   : > { %v1289_v45 = vcombine.low %v9603_v28, %v9648_v1  ;;  %8610 = vmatprep.mubr.msk.f32.mxu1 %vm1714_vm8, %v1288_v21  ;;  %v939_v47 = vrot.slane %v937_v26, 2  ;;  %v1290_v52 = vcombine.low %v9659_v18, %v9719_v46  ;;  %v433_v62 = vcombine.high %v219_v7, %v219_v7 }
  0x4b   : > { %13811 = vst [vmem:[#allocation39_spill] sm:$0xff] %v9827_v22  ;;  %v4249_v6 = vcombine.low %v4241_v17, %v4248_v29  ;;  %v9839_v11 = vsel %vm9511_vm7, %v930_v4, %v931_v54  ;;  %v933_v13 = vrot.slane %v931_v54, 2  ;;  %v934_v49 = vrot.slane %v9827_v22, 7 }
  0x4c   : > { %v9844_v28 = vsel %vm9511_vm7, %v939_v47, %v940_v60  ;;  %v1297_v1 = vrot.slane %v1289_v45, %v9474_v9  ;;  %v1304_v21 = vrot.slane %v1290_v52, %v9474_v9  ;;  %v9849_v18 = vrot.slane %v433_v62, %v9474_v9 }
  0x4d   : > { %8796 = vmatmul.mubr.msk.f32.gmra.mrb[2].mxu0 %vm1714_vm8, %v4249_v6  ;;  %v9854_v46 = vsel %vm9511_vm7, %v933_v13, %v934_v49  ;;  %v936_v7 = vrot.slane %v934_v49, 2  ;;  %v9857_v17 = vrot.slane %v220_v5, %v9474_v9  ;;  %v942_v4 = vrot.slane %v940_v60, 2  ;;  %v221_v6 = vld [vmem:[%s9479_s7 + $0x58] sm:$0xff] }
  0x4e   : > { %13812 = vst [vmem:[#allocation40_spill] sm:$0xff] %v9849_v18  ;;  %v4250_v29 = vcombine.low %v9839_v11, %v9854_v46  ;;  %v1305_v54 = vcombine.low %v1297_v1, %v1304_v21  ;;  %v9863_v45 = vcombine.high %v9849_v18, %v9849_v18  ;;  %v943_v47 = vrot.slane %v9849_v18, 7 }
  0x4f   : > { %13813 = vst [vmem:[#allocation41_spill] sm:$0xff] %v9857_v17  ;;  %v9868_v52 = vsel %vm9511_vm7, %v936_v7, %v937_v26  ;;  %v9872_v49 = vcombine.high %v9857_v17, %v9857_v17  ;;  %v949_v60 = vrot.slane %v9857_v17, 7  ;;  %v1306_v62 = vcombine.low %v9734_v58, %v9738_v36 }
  0x50   : > { %13814 = vst [vmem:[#allocation42_spill] sm:$0xff] %v9863_v45  ;;  %v4251_v13 = vcombine.low %v9868_v52, %v9844_v28  ;;  %v4258_v1 = vrot.slane %v4250_v29, %v9474_v9  ;;  %8611 = vmatmul.mubr.msk.f32.gmra.mrb[4].mxu1 %vm1714_vm8, %v1305_v54  ;;  %v9884_v26 = vsel %vm9511_vm7, %v942_v4, %v943_v47  ;;  %v945_v21 = vrot.slane %v943_v47, 2 }
  0x51   : > { %13815 = vst [vmem:[#allocation43_spill] sm:$0xff] %v9872_v49  ;;  %v946_v7 = vrot.slane %v9863_v45, 7  ;;  %v951_v51 = vrot.slane %v949_v60, 2  ;;  %v952_v56 = vrot.slane %v9872_v49, 7  ;;  %v1307_v58 = vcombine.low %v9747_v40, %v9780_v19 }
  0x52   : > { %v4265_v36 = vrot.slane %v4251_v13, %v9474_v9  ;;  %v1314_v29 = vrot.slane %v1306_v62, %v9474_v9  ;;  %v450_v8 = vcombine.high %v220_v5, %v220_v5  ;;  %v467_v54 = vcombine.high %v221_v6, %v221_v6 }
  0x53   : > { %v9894_v4 = vsel %vm9511_vm7, %v945_v21, %v946_v7  ;;  %v948_v47 = vrot.slane %v946_v7, 2  ;;  %v9898_v43 = vsel %vm9511_vm7, %v951_v51, %v952_v56  ;;  %v1321_v39 = vrot.slane %v1307_v58, %v9474_v9  ;;  %v222_v7 = vld [vmem:[%s9479_s7 + $0x60] sm:$0xff] }
  0x54   : > { %v4266_v15 = vcombine.low %v4258_v1, %v4265_v36  ;;  %v4267_v19 = vcombine.low %v9884_v26, %v9894_v4  ;;  %v9904_v40 = vrot.slane %v450_v8, %v9474_v9  ;;  %v9907_v5 = vrot.slane %v221_v6, %v9474_v9 }
  0x55   : > { %v9911_v62 = vsel %vm9511_vm7, %v948_v47, %v949_v60  ;;  %v1322_v13 = vcombine.low %v1314_v29, %v1321_v39  ;;  %v9914_v51 = vrot.slane %v467_v54, %v9474_v9  ;;  %v954_v21 = vrot.slane %v952_v56, 2 }
  0x56   : > { %13816 = vst [vmem:[#allocation44_spill] sm:$0xff] %v9904_v40  ;;  %13817 = vst [vmem:[#allocation45_spill] sm:$0xff] %v9907_v5  ;;  %8798 = vmatprep.mubr.msk.f32.mxu0 %vm1714_vm8, %v4266_v15  ;;  %v4268_v1 = vcombine.low %v9911_v62, %v9898_v43  ;;  %v4275_v8 = vrot.slane %v4267_v19, %v9474_v9  ;;  %v9923_v6 = vcombine.high %v9904_v40, %v9904_v40 }
  0x57   : > { %13818 = vst [vmem:[#allocation46_spill] sm:$0xff] %v9914_v51  ;;  %v9927_v60 = vcombine.high %v9907_v5, %v9907_v5  ;;  %8613 = vmatprep.mubr.msk.f32.mxu1 %vm1714_vm8, %v1322_v13  ;;  %v955_v39 = vrot.slane %v9904_v40, 7  ;;  %v961_v56 = vrot.slane %v9907_v5, 7  ;;  %v1323_v15 = vcombine.low %v9791_v10, %v9801_v63 }
  0x58   : > { %13819 = vst [vmem:[#allocation47_spill] sm:$0xff] %v9923_v6  ;;  %v1324_v58 = vcombine.low %v9805_v0, %v9839_v11  ;;  %v4282_v36 = vrot.slane %v4268_v1, %v9474_v9  ;;  %v958_v29 = vrot.slane %v9923_v6, 7  ;;  %v483_v47 = vcombine.high %v222_v7, %v222_v7 }
  0x59   : > { %13820 = vst [vmem:[#allocation48_spill] sm:$0xff] %v9927_v60  ;;  %v964_v54 = vrot.slane %v9927_v60, 7  ;;  %v9941_v19 = vsel %vm9511_vm7, %v954_v21, %v955_v39  ;;  %v957_v13 = vrot.slane %v955_v39, 2  ;;  %v963_v25 = vrot.slane %v961_v56, 2 }
  0x5a   : > { %v1331_v34 = vrot.slane %v1323_v15, %v9474_v9  ;;  %v4283_v16 = vcombine.low %v4275_v8, %v4282_v36  ;;  %v960_v10 = vrot.slane %v958_v29, 2  ;;  %v9945_v63 = vrot.slane %v1324_v58, %v9474_v9 }
  0x5b   : > { %v9948_v0 = vrot.slane %v222_v7, %v9474_v9  ;;  %v9952_v11 = vsel %vm9511_vm7, %v957_v13, %v958_v29  ;;  %v9956_v21 = vsel %vm9511_vm7, %v963_v25, %v964_v54  ;;  %v9959_v1 = vrot.slane %v483_v47, %v9474_v9 }
  0x5c   : > { %13821 = vst [vmem:[#allocation49_spill] sm:$0xff] %v9945_v63  ;;  %v9963_v8 = vcombine.high %v9914_v51, %v9914_v51  ;;  %8799 = vmatmul.mubr.msk.f32.gmra.mrb[4].mxu0 %vm1714_vm8, %v4283_v16  ;;  %v9968_v7 = vsel %vm9511_vm7, %v960_v10, %v961_v56  ;;  %v4284_v39 = vcombine.low %v9941_v19, %v9952_v11  ;;  %v966_v36 = vrot.slane %v964_v54, 2  ;;  %v223_v10 = vld [vmem:[%s9479_s7 + $0x68] sm:$0xff] }
  0x5d   : > { %13822 = vst [vmem:[#allocation50_spill] sm:$0xff] %v9948_v0  ;;  %13823 = vst [vmem:[#allocation51_spill] sm:$0xff] %v9959_v1  ;;  %v1339_v25 = vcombine.low %v1331_v34, %v9945_v63  ;;  %v9975_v15 = vcombine.high %v9948_v0, %v9948_v0  ;;  %v4285_v58 = vcombine.low %v9968_v7, %v9956_v21  ;;  %v967_v29 = vrot.slane %v9914_v51, 7 }
  0x5e   : > { %v970_v16 = vrot.slane %v9963_v8, 7  ;;  %v4292_v56 = vrot.slane %v4284_v39, %v9474_v9  ;;  %v8017_v47 = vrot.slane %v9948_v0, 9  ;;  %v977_v13 = vrot.slane %v9959_v1, 7 }
  0x5f   : > { %13824 = vst [vmem:[#allocation52_spill] sm:$0xff] %v9975_v15  ;;  %8614 = vmatmul.mubr.msk.f32.gmra.mrb[6].mxu1 %vm1714_vm8, %v1339_v25  ;;  %v974_v34 = vrot.slane %v9975_v15, 7  ;;  %v4299_v63 = vrot.slane %v4285_v58, %v9474_v9  ;;  %v9990_v54 = vsel %vm9511_vm7, %v966_v36, %v967_v29  ;;  %v969_v33 = vrot.slane %v967_v29, 2 }
  0x60   : > { %v1340_v23 = vcombine.low %v9854_v46, %v9868_v52  ;;  %v1341_v0 = vcombine.low %v9844_v28, %v9884_v26  ;;  %v10002_v32 = vcombine.high %v9959_v1, %v9959_v1  ;;  %v500_v52 = vcombine.high %v223_v10, %v223_v10 }
  0x61   : > { %v9996_v39 = vsel %vm9511_vm7, %v8017_v47, %v974_v34  ;;  %v976_v25 = vrot.slane %v974_v34, 2  ;;  %v4300_v58 = vcombine.low %v4292_v56, %v4299_v63  ;;  %v10006_v36 = vsel %vm9511_vm7, %v969_v33, %v970_v16 }
  0x62   : > { %13825 = vst [vmem:[#allocation53_spill] sm:$0xff] %v10002_v32  ;;  %v10009_v46 = vrot.slane %v1340_v23, %v9474_v9  ;;  %v4301_v28 = vcombine.low %v9990_v54, %v10006_v36  ;;  %v10018_v26 = vrot.slane %v1341_v0, %v9474_v9  ;;  %v10021_v63 = vrot.slane %v223_v10, %v9474_v9 }
  0x63   : > { %v10013_v29 = vsel %vm9511_vm7, %v976_v25, %v977_v13  ;;  %8801 = vmatprep.mubr.msk.f32.mxu0 %vm1714_vm8, %v4300_v58  ;;  %v10027_v33 = vrot.slane %v500_v52, %v9474_v9  ;;  %v979_v16 = vrot.slane %v977_v13, 2  ;;  %v980_v56 = vrot.slane %v10002_v32, 7  ;;  %v224_v25 = vld [vmem:[%s9479_s7 + $0x70] sm:$0xff] }
  0x64   : > { %13826 = vst [vmem:[#allocation54_spill] sm:$0xff] %v10009_v46  ;;  %13827 = vst [vmem:[#allocation55_spill] sm:$0xff] %v10018_v26  ;;  %v4302_v23 = vcombine.low %v9996_v39, %v10013_v29  ;;  %v4309_v47 = vrot.slane %v4301_v28, %v9474_v9  ;;  %v1356_v0 = vcombine.low %v10009_v46, %v10018_v26  ;;  %v983_v10 = vrot.slane %v10021_v63, 7 }
  0x65   : > { %13828 = vst [vmem:[#allocation56_spill] sm:$0xff] %v10021_v63  ;;  %13829 = vst [vmem:[#allocation57_spill] sm:$0xff] %v10027_v33  ;;  %v10035_v34 = vcombine.high %v10021_v63, %v10021_v63  ;;  %v10042_v52 = vsel %vm9511_vm7, %v979_v16, %v980_v56  ;;  %v982_v13 = vrot.slane %v980_v56, 2  ;;  %v989_v14 = vrot.slane %v10027_v33, 7 }
  0x66   : > { %v4316_v58 = vrot.slane %v4302_v23, %v9474_v9  ;;  %8616 = vmatprep.mubr.msk.f32.mxu1 %vm1714_vm8, %v1356_v0  ;;  %v985_v28 = vrot.slane %v983_v10, 2  ;;  %v1357_v24 = vcombine.low %v9894_v4, %v9911_v62  ;;  %v1358_v32 = vcombine.low %v9898_v43, %v9941_v19 }
  0x67   : > { %13830 = vst [vmem:[#allocation58_spill] sm:$0xff] %v10035_v34  ;;  %v986_v46 = vrot.slane %v10035_v34, 7  ;;  %v10053_v23 = vsel %vm9511_vm7, %v982_v13, %v983_v10  ;;  %v10057_v16 = vcombine.high %v10027_v33, %v10027_v33  ;;  %v517_v56 = vcombine.high %v224_v25, %v224_v25 }
  0x68   : > { %v4317_v63 = vcombine.low %v4309_v47, %v4316_v58  ;;  %v4318_v4 = vcombine.low %v10042_v52, %v10053_v23  ;;  %v10066_v43 = vrot.slane %v1357_v24, %v9474_v9  ;;  %v10070_v62 = vrot.slane %v1358_v32, %v9474_v9 }
  0x69   : > { %13831 = vst [vmem:[#allocation59_spill] sm:$0xff] %v10057_v16  ;;  %v10061_v0 = vsel %vm9511_vm7, %v985_v28, %v986_v46  ;;  %v988_v34 = vrot.slane %v986_v46, 2  ;;  %v10073_v19 = vrot.slane %v224_v25, %v9474_v9  ;;  %v10076_v47 = vrot.slane %v517_v56, %v9474_v9 }
  0x6a   : > { %13832 = vst [vmem:[#allocation60_spill] sm:$0xff] %v10066_v43  ;;  %8802 = vmatmul.mubr.msk.f32.gmra.mrb[6].mxu0 %vm1714_vm8, %v4317_v63  ;;  %13833 = vst [vmem:[#allocation61_spill] sm:$0xff] %v10070_v62  ;;  %v991_v10 = vrot.slane %v989_v14, 2  ;;  %v4326_v58 = vrot.slane %v4318_v4, %v9474_v9  ;;  %v992_v63 = vrot.slane %v10057_v16, 7  ;;  %v1373_v25 = vcombine.low %v10066_v43, %v10070_v62 }
  0x6b   : > { %13834 = vst [vmem:[#allocation62_spill] sm:$0xff] %v10073_v19  ;;  %13835 = vst [vmem:[#allocation63_spill] sm:$0xff] %v10076_v47  ;;  %v10080_v46 = vsel %vm9511_vm7, %v988_v34, %v989_v14  ;;  %v10092_v13 = vcombine.high %v10073_v19, %v10073_v19  ;;  %v995_v14 = vrot.slane %v10073_v19, 7  ;;  %v225_v34 = vld [vmem:[%s9479_s7 + $0x78] sm:$0xff]  ;;  %v1001_v4 = vrot.slane %v10076_v47, 7 }
  0x6c   : > { %v4319_v32 = vcombine.low %v10061_v0, %v10080_v46  ;;  %v10098_v28 = vsel %vm9511_vm7, %v991_v10, %v992_v63  ;;  %v994_v56 = vrot.slane %v992_v63, 2  ;;  %v1374_v24 = vcombine.low %v9952_v11, %v9968_v7  ;;  %8617 = vmatmul.mubr.msk.f32.gmra.mrb[8].mxu1 %vm1714_vm8, %v1373_v25 }
  0x6d   : > { %13836 = vst [vmem:[#allocation64_spill] sm:$0xff] %v10092_v13  ;;  %v997_v43 = vrot.slane %v995_v14, 2  ;;  %v998_v62 = vrot.slane %v10092_v13, 7  ;;  %v1375_v16 = vcombine.low %v9956_v21, %v9990_v54  ;;  %v10117_v11 = vcombine.high %v10076_v47, %v10076_v47 }
  0x6e   : > { %v4333_v26 = vrot.slane %v4319_v32, %v9474_v9  ;;  %v10110_v10 = vsel %vm9511_vm7, %v994_v56, %v995_v14  ;;  %v10113_v63 = vrot.slane %v1374_v24, %v9474_v9  ;;  %v534_v7 = vcombine.high %v225_v34, %v225_v34 }
  0x6f   : > { %13838 = vst [vmem:[#allocation66_spill] sm:$0xff] %v10117_v11  ;;  %v10121_v25 = vsel %vm9511_vm7, %v997_v43, %v998_v62  ;;  %v1000_v13 = vrot.slane %v998_v62, 2  ;;  %v4335_v21 = vcombine.low %v10098_v28, %v10110_v10  ;;  %v10126_v54 = vrot.slane %v1375_v16, %v9474_v9 }
  0x70   : > { %13837 = vst [vmem:[#allocation65_spill] sm:$0xff] %v10113_v63  ;;  %v4334_v32 = vcombine.low %v4326_v58, %v4333_v26  ;;  %v10129_v24 = vrot.slane %v225_v34, %v9474_v9  ;;  %v10132_v14 = vrot.slane %v534_v7, %v9474_v9  ;;  %v1003_v56 = vrot.slane %v1001_v4, 2 }
  0x71   : > { %13839 = vst [vmem:[#allocation67_spill] sm:$0xff] %v10126_v54  ;;  %v10137_v26 = vsel %vm9511_vm7, %v1000_v13, %v1001_v4  ;;  %v4343_v43 = vrot.slane %v4335_v21, %v9474_v9  ;;  %v1004_v62 = vrot.slane %v10117_v11, 7  ;;  %v1391_v16 = vcombine.low %v10006_v36, %v9996_v39  ;;  %v226_v4 = vld [vmem:[%s9479_s7 + $0x80] sm:$0xff] }
  0x72   : > { %13840 = vst [vmem:[#allocation68_spill] sm:$0xff] %v10129_v24  ;;  %13841 = vst [vmem:[#allocation69_spill] sm:$0xff] %v10132_v14  ;;  %8804 = vmatprep.mubr.msk.f32.mxu0 %vm1714_vm8, %v4334_v32  ;;  %v4336_v58 = vcombine.low %v10121_v25, %v10137_v26  ;;  %v1390_v34 = vcombine.low %v10113_v63, %v10126_v54  ;;  %v10149_v7 = vcombine.high %v10129_v24, %v10129_v24 }
  0x73   : > { %v1007_v13 = vrot.slane %v10129_v24, 7  ;;  %v10155_v32 = vsel %vm9511_vm7, %v1003_v56, %v1004_v62  ;;  %v1006_v21 = vrot.slane %v1004_v62, 2  ;;  %v1013_v39 = vrot.slane %v10132_v14, 7  ;;  %v8085_v56 = vld [vmem:[%s13304_s1 + $0x8] sm:$0xf] }
  0x74   : > { %13842 = vst [vmem:[#allocation70_spill] sm:$0xff] %v10149_v7  ;;  %v1392_v36 = vcombine.low %v10013_v29, %v10042_v52  ;;  %v4350_v11 = vrot.slane %v4336_v58, %v9474_v9  ;;  %8619 = vmatprep.mubr.msk.f32.mxu1 %vm1714_vm8, %v1390_v34  ;;  %v1010_v63 = vrot.slane %v10149_v7, 7  ;;  %v10164_v24 = vrot.slane %v1391_v16, %v9474_v9 }
  0x75   : > { %v1009_v54 = vrot.slane %v1007_v13, 2  ;;  %v10171_v62 = vsel %vm9511_vm7, %v1006_v21, %v1007_v13  ;;  %v550_v52 = vcombine.high %v226_v4, %v226_v4  ;;  %v10177_v58 = vrot.slane %v226_v4, %v9474_v9  ;;  %8696 = vmatprep.subr.msk.mxu1 %vm1775_vm0, %v8085_v56 }
  0x76   : > { %13843 = vst [vmem:[#allocation71_spill] sm:$0xff] %v10164_v24  ;;  %v10174_v29 = vrot.slane %v1392_v36, %v9474_v9  ;;  %v4351_v34 = vcombine.low %v4343_v43, %v4350_v11  ;;  %v1012_v7 = vrot.slane %v1010_v63, 2  ;;  %v4352_v47 = vcombine.low %v10155_v32, %v10171_v62 }
  0x77   : > { %13845 = vst [vmem:[#allocation73_spill] sm:$0xff] %v10177_v58  ;;  %v10182_v16 = vsel %vm9511_vm7, %v1009_v54, %v1010_v63  ;;  %v10189_v21 = vrot.slane %v550_v52, %v9474_v9  ;;  %v10193_v4 = vcombine.high %v10177_v58, %v10177_v58  ;;  %v10197_v11 = vcombine.high %v10132_v14, %v10132_v14  ;;  %v227_v54 = vld [vmem:[%s9479_s7 + $0x88] sm:$0xff] }
  0x78   : > { %13844 = vst [vmem:[#allocation72_spill] sm:$0xff] %v10174_v29  ;;  %v1407_v13 = vcombine.low %v10164_v24, %v10174_v29  ;;  %8805 = vmatmul.mubr.msk.f32.gmra.mrb[8].mxu0 %vm1714_vm8, %v4351_v34  ;;  %v10203_v63 = vsel %vm9511_vm7, %v1012_v7, %v1013_v39  ;;  %v4360_v43 = vrot.slane %v4352_v47, %v9474_v9  ;;  %v1015_v36 = vrot.slane %v1013_v39, 2 }
  0x79   : > { %13846 = vst [vmem:[#allocation74_spill] sm:$0xff] %v10189_v21  ;;  %13847 = vst [vmem:[#allocation75_spill] sm:$0xff] %v10193_v4  ;;  %v8018_v56 = vrot.slane %v10177_v58, 9  ;;  %v4353_v52 = vcombine.low %v10182_v16, %v10203_v63  ;;  %v10212_v29 = vcombine.high %v10189_v21, %v10189_v21  ;;  %v1016_v34 = vrot.slane %v10197_v11, 7 }
  0x7a   : > { %13848 = vst [vmem:[#allocation76_spill] sm:$0xff] %v10197_v11  ;;  %8620 = vmatmul.mubr.msk.f32.gmra.mrb[10].mxu1 %vm1714_vm8, %v1407_v13  ;;  %v1020_v24 = vrot.slane %v10193_v4, 7  ;;  %v1023_v7 = vrot.slane %v10189_v21, 7  ;;  %v1408_v47 = vcombine.low %v10053_v23, %v10061_v0  ;;  %v1409_v39 = vcombine.low %v10080_v46, %v10098_v28 }
  0x7b   : > { %13849 = vst [vmem:[#allocation77_spill] sm:$0xff] %v10212_v29  ;;  %v567_v58 = vcombine.high %v227_v54, %v227_v54  ;;  %v4367_v14 = vrot.slane %v4353_v52, %v9474_v9  ;;  %v10224_v13 = vsel %vm9511_vm7, %v1015_v36, %v1016_v34  ;;  %v1026_v21 = vrot.slane %v10212_v29, 7  ;;  %v10391_v29 = vld [vmem:[%s9479_s7 + $0xa8] sm:$0xff] }
  0x7c   : > { %v10228_v11 = vsel %vm9511_vm7, %v8018_v56, %v1020_v24  ;;  %v1022_v4 = vrot.slane %v1020_v24, 2  ;;  %v1025_v19 = vrot.slane %v1023_v7, 2  ;;  %v10234_v0 = vrot.slane %v1408_v47, %v9474_v9 }
  0x7d   : > { %v4369_v23 = vcombine.low %v10224_v13, %v10228_v11  ;;  %v4368_v46 = vcombine.low %v4360_v43, %v4367_v14  ;;  %v10241_v36 = vrot.slane %v1409_v39, %v9474_v9  ;;  %v10244_v24 = vrot.slane %v227_v54, %v9474_v9  ;;  %v228_v39 = vld [vmem:[%s9479_s7 + $0x90] sm:$0xff] }
  0x7e   : > { %13850 = vst [vmem:[#allocation78_spill] sm:$0xff] %v10234_v0  ;;  %v10238_v28 = vsel %vm9511_vm7, %v1022_v4, %v1023_v7  ;;  %v10248_v56 = vsel %vm9511_vm7, %v1025_v19, %v1026_v21  ;;  %v10252_v34 = vrot.slane %v567_v58, %v9474_v9  ;;  %v1028_v14 = vrot.slane %v1026_v21, 2 }
  0x7f   : > { %13851 = vst [vmem:[#allocation79_spill] sm:$0xff] %v10241_v36  ;;  %13852 = vst [vmem:[#allocation80_spill] sm:$0xff] %v10244_v24  ;;  %v4377_v52 = vrot.slane %v4369_v23, %v9474_v9  ;;  %8807 = vmatprep.mubr.msk.f32.mxu0 %vm1714_vm8, %v4368_v46  ;;  %v4370_v4 = vcombine.low %v10238_v28, %v10248_v56  ;;  %v1424_v43 = vcombine.low %v10234_v0, %v10241_v36 }
  0x80   : > { %13853 = vst [vmem:[#allocation81_spill] sm:$0xff] %v10252_v34  ;;  %v10261_v54 = vcombine.high %v10244_v24, %v10244_v24  ;;  %v1029_v19 = vrot.slane %v10244_v24, 7  ;;  %v10266_v7 = vcombine.high %v10252_v34, %v10252_v34  ;;  %v1035_v58 = vrot.slane %v10252_v34, 7 }
  0x81   : > { %v1425_v21 = vcombine.low %v10110_v10, %v10121_v25  ;;  %v1426_v47 = vcombine.low %v10137_v26, %v10155_v32  ;;  %v4384_v23 = vrot.slane %v4370_v4, %v9474_v9  ;;  %8622 = vmatprep.mubr.msk.f32.mxu1 %vm1714_vm8, %v1424_v43 }
  0x82   : > { %13854 = vst [vmem:[#allocation82_spill] sm:$0xff] %v10261_v54  ;;  %13855 = vst [vmem:[#allocation83_spill] sm:$0xff] %v10266_v7  ;;  %v10278_v46 = vsel %vm9511_vm7, %v1028_v14, %v1029_v19  ;;  %v1031_v36 = vrot.slane %v1029_v19, 2  ;;  %v1032_v0 = vrot.slane %v10261_v54, 7  ;;  %v1037_v24 = vrot.slane %v1035_v58, 2 }
  0x83   : > { %v1038_v34 = vrot.slane %v10266_v7, 7  ;;  %v10283_v10 = vrot.slane %v1425_v21, %v9474_v9  ;;  %v10286_v25 = vrot.slane %v1426_v47, %v9474_v9  ;;  %v4385_v26 = vcombine.low %v4377_v52, %v4384_v23 }
  0x84   : > { %v10290_v32 = vsel %vm9511_vm7, %v1031_v36, %v1032_v0  ;;  %v1034_v4 = vrot.slane %v1032_v0, 2  ;;  %v584_v14 = vcombine.high %v228_v39, %v228_v39  ;;  %v10301_v47 = vrot.slane %v228_v39, %v9474_v9 }
  0x85   : > { %13856 = vst [vmem:[#allocation84_spill] sm:$0xff] %v10283_v10  ;;  %13857 = vst [vmem:[#allocation85_spill] sm:$0xff] %v10286_v25  ;;  %v10294_v43 = vsel %vm9511_vm7, %v1037_v24, %v1038_v34  ;;  %v4386_v19 = vcombine.low %v10278_v46, %v10290_v32  ;;  %v1441_v21 = vcombine.low %v10283_v10, %v10286_v25  ;;  %8808 = vmatmul.mubr.msk.f32.gmra.mrb[10].mxu0 %vm1714_vm8, %v4385_v26  ;;  %v229_v26 = vld [vmem:[%s9479_s7 + $0x98] sm:$0xff] }
  0x86   : > { %13858 = vst [vmem:[#allocation86_spill] sm:$0xff] %v10301_v47  ;;  %v10306_v0 = vsel %vm9511_vm7, %v1034_v4, %v1035_v58  ;;  %v10309_v36 = vrot.slane %v584_v14, %v9474_v9  ;;  %v1040_v24 = vrot.slane %v1038_v34, 2  ;;  %v1442_v52 = vcombine.low %v10171_v62, %v10182_v16 }
  0x87   : > { %v4387_v23 = vcombine.low %v10306_v0, %v10294_v43  ;;  %v4394_v25 = vrot.slane %v4386_v19, %v9474_v9  ;;  %8623 = vmatmul.mubr.msk.f32.gmra.mrb[12].mxu1 %vm1714_vm8, %v1441_v21  ;;  %v10319_v39 = vcombine.high %v10301_v47, %v10301_v47  ;;  %v1041_v58 = vrot.slane %v10301_v47, 7 }
  0x88   : > { %13859 = vst [vmem:[#allocation87_spill] sm:$0xff] %v10309_v36  ;;  %v10325_v34 = vcombine.high %v10309_v36, %v10309_v36  ;;  %v1047_v62 = vrot.slane %v10309_v36, 7  ;;  %v1443_v16 = vcombine.low %v10203_v63, %v10224_v13  ;;  %v10331_v4 = vrot.slane %v1442_v52, %v9474_v9 }
  0x89   : > { %13860 = vst [vmem:[#allocation88_spill] sm:$0xff] %v10319_v39  ;;  %v4401_v14 = vrot.slane %v4387_v23, %v9474_v9  ;;  %v10336_v19 = vsel %vm9511_vm7, %v1040_v24, %v1041_v58  ;;  %v1043_v21 = vrot.slane %v1041_v58, 2  ;;  %v1044_v10 = vrot.slane %v10319_v39, 7 }
  0x8a   : > { %13861 = vst [vmem:[#allocation89_spill] sm:$0xff] %v10325_v34  ;;  %13862 = vst [vmem:[#allocation90_spill] sm:$0xff] %v10331_v4  ;;  %v1049_v47 = vrot.slane %v1047_v62, 2  ;;  %v1050_v7 = vrot.slane %v10325_v34, 7  ;;  %v10341_v36 = vrot.slane %v1443_v16, %v9474_v9  ;;  %v601_v54 = vcombine.high %v229_v26, %v229_v26 }
  0x8b   : > { %v4402_v63 = vcombine.low %v4394_v25, %v4401_v14  ;;  %v10345_v13 = vsel %vm9511_vm7, %v1043_v21, %v1044_v10  ;;  %v1046_v52 = vrot.slane %v1044_v10, 2  ;;  %v10348_v24 = vrot.slane %v229_v26, %v9474_v9 }
  0x8c   : > { %13863 = vst [vmem:[#allocation91_spill] sm:$0xff] %v10341_v36  ;;  %v10352_v23 = vsel %vm9511_vm7, %v1049_v47, %v1050_v7  ;;  %v4403_v58 = vcombine.low %v10336_v19, %v10345_v13  ;;  %v1458_v16 = vcombine.low %v10331_v4, %v10341_v36  ;;  %v10359_v25 = vrot.slane %v601_v54, %v9474_v9 }
  0x8d   : > { %13864 = vst [vmem:[#allocation92_spill] sm:$0xff] %v10348_v24  ;;  %8810 = vmatprep.mubr.msk.f32.mxu0 %vm1714_vm8, %v4402_v63  ;;  %v10364_v10 = vsel %vm9511_vm7, %v1046_v52, %v1047_v62  ;;  %v10368_v26 = vcombine.high %v10348_v24, %v10348_v24  ;;  %v1052_v47 = vrot.slane %v1050_v7, 2  ;;  %v1053_v14 = vrot.slane %v10348_v24, 7  ;;  %v230_v52 = vld [vmem:[%s9479_s7 + $0xa0] sm:$0xff] }
  0x8e   : > { %13865 = vst [vmem:[#allocation93_spill] sm:$0xff] %v10359_v25  ;;  %v4404_v21 = vcombine.low %v10364_v10, %v10352_v23  ;;  %v4411_v54 = vrot.slane %v4403_v58, %v9474_v9  ;;  %8625 = vmatprep.mubr.msk.f32.mxu1 %vm1714_vm8, %v1458_v16  ;;  %v10377_v63 = vcombine.high %v10359_v25, %v10359_v25  ;;  %v1059_v62 = vrot.slane %v10359_v25, 7 }
  0x8f   : > { %13866 = vst [vmem:[#allocation94_spill] sm:$0xff] %v10368_v26  ;;  %v1054_v7 = vsel %vm9511_vm7, %v1052_v47, %v1053_v14  ;;  %v1055_v36 = vrot.slane %v1053_v14, 2  ;;  %v1056_v4 = vrot.slane %v10368_v26, 7  ;;  %v1459_v24 = vcombine.low %v10228_v11, %v10238_v28 }
  0x90   : > { %v4418_v58 = vrot.slane %v4404_v21, %v9474_v9  ;;  %v1061_v34 = vrot.slane %v1059_v62, 2  ;;  %v1062_v16 = vrot.slane %v10377_v63, 7  ;;  %v1460_v39 = vcombine.low %v10248_v56, %v10278_v46 }
  0x91   : > { %v1057_v25 = vsel %vm9511_vm7, %v1055_v36, %v1056_v4  ;;  %v1058_v47 = vrot.slane %v1056_v4, 2  ;;  %v10396_v14 = vrot.slane %v1459_v24, %v9474_v9  ;;  %v617_v26 = vcombine.high %v230_v52, %v230_v52 }
  0x92   : > { %v4419_v33 = vcombine.low %v4411_v54, %v4418_v58  ;;  %v1063_v11 = vsel %vm9511_vm7, %v1061_v34, %v1062_v16  ;;  %v4420_v28 = vcombine.low %v1054_v7, %v1057_v25  ;;  %v10401_v21 = vrot.slane %v1460_v39, %v9474_v9 }
  0x93   : > { %13867 = vst [vmem:[#allocation95_spill] sm:$0xff] %v10396_v14  ;;  %v1060_v56 = vsel %vm9511_vm7, %v1058_v47, %v1059_v62  ;;  %v10406_v46 = vrot.slane %v230_v52, %v9474_v9  ;;  %v10409_v36 = vrot.slane %v617_v26, %v9474_v9  ;;  %v10413_v4 = vrot.slane %v10391_v29, %v9474_v9 }
  0x94   : > { %13868 = vst [vmem:[#allocation96_spill] sm:$0xff] %v10401_v21  ;;  %8811 = vmatmul.mubr.msk.f32.gmra.mrb[12].mxu0 %vm1714_vm8, %v4419_v33  ;;  %v4421_v34 = vcombine.low %v1060_v56, %v1063_v11  ;;  %v4428_v24 = vrot.slane %v4420_v28, %v9474_v9  ;;  %v1475_v39 = vcombine.low %v10396_v14, %v10401_v21 }
  0x95   : > { %13869 = vst [vmem:[#allocation97_spill] sm:$0xff] %v10406_v46  ;;  %13870 = vst [vmem:[#allocation98_spill] sm:$0xff] %v10409_v36  ;;  %v1476_v54 = vcombine.low %v10290_v32, %v10306_v0  ;;  %v10423_v62 = vcombine.high %v10406_v46, %v10406_v46  ;;  %v10427_v26 = vcombine.high %v10409_v36, %v10409_v36  ;;  %v8019_v52 = vrot.slane %v10406_v46, 9 }
  0x96   : > { %13871 = vst [vmem:[#allocation99_spill] sm:$0xff] %v10413_v4  ;;  %v1069_v33 = vrot.slane %v10409_v36, 7  ;;  %v4435_v58 = vrot.slane %v4421_v34, %v9474_v9  ;;  %8626 = vmatmul.mubr.msk.f32.gmra.mrb[14].mxu1 %vm1714_vm8, %v1475_v39  ;;  %v1075_v16 = vrot.slane %v10413_v4, 7  ;;  %v1477_v32 = vcombine.low %v10294_v43, %v10336_v19 }
  0x97   : > { %13872 = vst [vmem:[#allocation100_spill] sm:$0xff] %v10423_v62  ;;  %13873 = vst [vmem:[#allocation101_spill] sm:$0xff] %v10427_v26  ;;  %v10437_v0 = vrot.slane %v1476_v54, %v9474_v9  ;;  %v1066_v47 = vrot.slane %v10423_v62, 7  ;;  %v1072_v21 = vrot.slane %v10427_v26, 7  ;;  %v2062_v14 = vcombine.low %v9524_v31, %v9520_v30  ;;  %v13942_v30 = vld [vmem:[#allocation53_spill] sm:$0xff] }
  0x98   : > { %v1071_v28 = vrot.slane %v1069_v33, 2  ;;  %v4436_v46 = vcombine.low %v4428_v24, %v4435_v58  ;;  %v10444_v34 = vrot.slane %v1477_v32, %v9474_v9  ;;  %v2063_v39 = vcombine.low %v9539_v37, %v9533_v35 }
  0x99   : > { %13874 = vst [vmem:[#allocation102_spill] sm:$0xff] %v10437_v0  ;;  %v1493_v43 = vcombine.low %v10345_v13, %v10364_v10  ;;  %v1067_v19 = vsel %vm9511_vm7, %v8019_v52, %v1066_v47  ;;  %v1068_v54 = vrot.slane %v1066_v47, 2  ;;  %v1074_v62 = vrot.slane %v1072_v21, 2 }
  0x9a   : > { %13875 = vst [vmem:[#allocation103_spill] sm:$0xff] %v10444_v34  ;;  %v1073_v26 = vsel %vm9511_vm7, %v1071_v28, %v1072_v21  ;;  %8813 = vmatprep.mubr.msk.f32.mxu0 %vm1714_vm8, %v4436_v46  ;;  %v1492_v24 = vcombine.low %v10437_v0, %v10444_v34  ;;  %v2070_v58 = vrot.slane %v2062_v14, %v9474_v9 }
  0x9b   : > { %v2077_v32 = vrot.slane %v2063_v39, %v9474_v9  ;;  %v1494_v31 = vcombine.low %v10352_v23, %v1054_v7  ;;  %v1070_v13 = vsel %vm9511_vm7, %v1068_v54, %v1069_v33  ;;  %v1076_v10 = vsel %vm9511_vm7, %v1074_v62, %v1075_v16 }
  0x9c   : > { %v10465_v52 = vrot.slane %v1493_v43, %v9474_v9  ;;  %v2079_v21 = vcombine.low %v9551_v44, %v9542_v38  ;;  %v4437_v46 = vcombine.low %v1067_v19, %v1070_v13  ;;  %v4438_v47 = vcombine.low %v1073_v26, %v1076_v10  ;;  %8628 = vmatprep.mubr.msk.f32.mxu1 %vm1714_vm8, %v1492_v24 }
  0x9d   : > { %v10470_v14 = vcombine.low %v2070_v58, %v2077_v32  ;;  %v10473_v23 = vrot.slane %v1494_v31, %v9474_v9  ;;  %v2080_v7 = vcombine.low %v9628_v50, %v9631_v53  ;;  %v1510_v33 = vcombine.low %v1057_v25, %v1060_v56 }
  0x9e   : > { %13876 = vst [vmem:[#allocation104_spill] sm:$0xff] %v10465_v52  ;;  %v2087_v62 = vrot.slane %v2079_v21, %v9474_v9  ;;  %v1511_v28 = vcombine.low %v1063_v11, %v1067_v19  ;;  %v4445_v39 = vrot.slane %v4437_v46, %v9474_v9  ;;  %v4452_v43 = vrot.slane %v4438_v47, %v9474_v9 }
  0x9f   : > { %13877 = vst [vmem:[#allocation105_spill] sm:$0xff] %v10473_v23  ;;  %v1509_v54 = vcombine.low %v10465_v52, %v10473_v23  ;;  %v2096_v24 = vcombine.low %v9684_v55, %v9678_v48  ;;  %v2094_v31 = vrot.slane %v2080_v7, %v9474_v9  ;;  %v10486_v58 = vrot.slane %v1510_v33, %v9474_v9 }
  0xa0   : > { %v10489_v32 = vrot.slane %v1511_v28, %v9474_v9  ;;  %v2097_v25 = vcombine.low %v9690_v59, %v9694_v2  ;;  %v4453_v11 = vcombine.low %v4445_v39, %v4452_v43  ;;  %v10497_v19 = vcombine.high %v10413_v4, %v10413_v4  ;;  %v235_v2 = vld [vmem:[%s9479_s7 + $0xc8] sm:$0xff] }
  0xa1   : > { %13878 = vst [vmem:[#allocation106_spill] sm:$0xff] %v10486_v58  ;;  %8629 = vmatmul.mubr.msk.f32.gmra.mrb[16].mxu1 %vm1714_vm8, %v1509_v54  ;;  %v2104_v56 = vrot.slane %v2096_v24, %v9474_v9  ;;  %v1077_v21 = vrot.slane %v1075_v16, 2  ;;  %v10499_v46 = vcombine.low %v2087_v62, %v2094_v31  ;;  %v1527_v33 = vcombine.low %v1070_v13, %v1073_v26  ;;  %v232_v54 = vld [vmem:[%s9479_s7 + $0xb0] sm:$0xff] }
  0xa2   : > { %13879 = vst [vmem:[#allocation107_spill] sm:$0xff] %v10489_v32  ;;  %13880 = vst [vmem:[#allocation108_spill] sm:$0xff] %v10497_v19  ;;  %v1526_v47 = vcombine.low %v10486_v58, %v10489_v32  ;;  %v2111_v7 = vrot.slane %v2097_v25, %v9474_v9  ;;  %8814 = vmatmul.mubr.msk.f32.gmra.mrb[14].mxu0 %vm1714_vm8, %v4453_v11  ;;  %v1078_v28 = vrot.slane %v10497_v19, 7  ;;  %v233_v32 = vld [vmem:[%s9479_s7 + $0xb8] sm:$0xff] }
  0xa3   : > { %v2113_v39 = vcombine.low %v9751_v12, %v9712_v42  ;;  %v8187_v43 = vcombine.high %v9712_v42, %v9754_v41  ;;  %v634_v16 = vcombine.high %v10391_v29, %v10391_v29  ;;  %8839 = vmatprep.mubr.msk.f32.mxu0 %vm1714_vm8, %v10470_v14  ;;  %v10519_v13 = vrot.slane %v1527_v33, %v9474_v9 }
  0xa4   : > { %8631 = vmatprep.mubr.msk.f32.mxu1 %vm1714_vm8, %v1526_v47  ;;  %v10516_v26 = vcombine.low %v2104_v56, %v2111_v7  ;;  %v10522_v62 = vrot.slane %v232_v54, %v9474_v9  ;;  %v10526_v24 = vsel %vm9511_vm7, %v1077_v21, %v1078_v28  ;;  %v1080_v47 = vrot.slane %v1078_v28, 2  ;;  %v10544_v21 = vld [vmem:[%s13304_s1 + $0x1c] sm:$0xf] }
  0xa5   : > { %13882 = vst [vmem:[#allocation110_spill] sm:$0xff] %v10519_v13  ;;  %13884 = vst [vmem:[#allocation112_spill] sm:$0xff] %v10526_v24  ;;  %v10529_v31 = vrot.slane %v2113_v39, %v9474_v9  ;;  %v5009_v29 = vrot.slane %v8187_v43, %v9474_v9  ;;  %v10533_v25 = vrot.slane %v634_v16, %v9474_v9 }
  0xa6   : > { %13881 = vst [vmem:[#allocation109_spill] sm:$0xff] %v10516_v26  ;;  %13883 = vst [vmem:[#allocation111_spill] sm:$0xff] %v10522_v62  ;;  %v1528_v11 = vcombine.low %v1076_v10, %v10526_v24  ;;  %v10538_v56 = vcombine.high %v10522_v62, %v10522_v62  ;;  %v1087_v7 = vrot.slane %v10522_v62, 7  ;;  %8840 = vmatmul.mubr.msk.f32.vlgmr.msra.gmra.mrb[0].mxu0 %vm1714_vm8, %v10499_v46 }
  0xa7   : > { %13885 = vst [vmem:[#allocation113_spill] sm:$0xff] %v10533_v25  ;;  %13887 = vst [vmem:[#allocation115_spill] sm:$0xff] %v10544_v21  ;;  %v5010_v33 = vcombine.low %v10529_v31, %v5009_v29  ;;  %v10551_v10 = vcombine.high %v10533_v25, %v10533_v25  ;;  %v1081_v39 = vrot.slane %v10533_v25, 7  ;;  %v2130_v28 = vcombine.low %v9815_v57, %v9827_v22 }
  0xa8   : > { %13886 = vst [vmem:[#allocation114_spill] sm:$0xff] %v10538_v56  ;;  %8885 = vmatpush3.msk.msra.mxu0 %vm1775_vm0, %v9706_v61  ;;  %8842 = vmatprep.mubr.msk.f32.mxu0 %vm1714_vm8, %v10516_v26  ;;  %v10561_v43 = vrot.slane %v1528_v11, %v9474_v9  ;;  %v1089_v16 = vrot.slane %v1087_v7, 2  ;;  %v1090_v29 = vrot.slane %v10538_v56, 7  ;;  %v2131_v24 = vcombine.low %v9810_v3, %v9820_v20 }
  0xa9   : > { %13888 = vst [vmem:[#allocation116_spill] sm:$0xff] %v10551_v10  ;;  %v10569_v23 = vsel %vm9511_vm7, %v1080_v47, %v1081_v39  ;;  %v1083_v58 = vrot.slane %v1081_v39, 2  ;;  %v1084_v61 = vrot.slane %v10551_v10, 7  ;;  %v10573_v34 = vrot.slane %v2130_v28, %v9474_v9  ;;  %8931 = vmatprep.subr.msk.mxu0 %vm1775_vm0, %v10544_v21 }
  0xaa   : > { %13889 = vst [vmem:[#allocation117_spill] sm:$0xff] %v10561_v43  ;;  %13890 = vst [vmem:[#allocation118_spill] sm:$0xff] %v10569_v23  ;;  %v1543_v11 = vcombine.low %v10519_v13, %v10561_v43  ;;  %v10581_v52 = vsel %vm9511_vm7, %v1089_v16, %v1090_v29  ;;  %v10584_v0 = vrot.slane %v2131_v24, %v9474_v9  ;;  %8843 = vmatmul.mubr.msk.f32.gmra.mrb[2].mxu0 %vm1714_vm8, %v5010_v33 }
  0xab   : > { %13891 = vst [vmem:[#allocation119_spill] sm:$0xff] %v10573_v34  ;;  %13892 = vst [vmem:[#allocation120_spill] sm:$0xff] %v10581_v52  ;;  %v651_v47 = vcombine.high %v232_v54, %v232_v54  ;;  %v10589_v39 = vsel %vm9511_vm7, %v1083_v58, %v1084_v61  ;;  %v1086_v28 = vrot.slane %v1084_v61, 2  ;;  %v668_v20 = vcombine.high %v233_v32, %v233_v32 }
  0xac   : > { %13893 = vst [vmem:[#allocation121_spill] sm:$0xff] %v10584_v0  ;;  %13894 = vst [vmem:[#allocation122_spill] sm:$0xff] %v10589_v39  ;;  %v10592_v22 = vrot.slane %v233_v32, %v9474_v9  ;;  %8632 = vmatmul.mubr.msk.f32.gmra.mrb[18].mxu1 %vm1714_vm8, %v1543_v11  ;;  %v1544_v16 = vcombine.low %v10569_v23, %v10589_v39  ;;  %v10599_v24 = vcombine.low %v10573_v34, %v10584_v0  ;;  %v13974_v0 = vld [vmem:[#allocation68_spill] sm:$0xff] }
  0xad   : > { %v10602_v54 = vrot.slane %v651_v47, %v9474_v9  ;;  %v1092_v58 = vrot.slane %v1090_v29, 2  ;;  %v10606_v33 = vsel %vm9511_vm7, %v1086_v28, %v1087_v7  ;;  %v10609_v32 = vrot.slane %v668_v20, %v9474_v9 }
  0xae   : > { %13895 = vst [vmem:[#allocation123_spill] sm:$0xff] %v10592_v22  ;;  %13896 = vst [vmem:[#allocation124_spill] sm:$0xff] %v10599_v24  ;;  %v10613_v61 = vcombine.high %v10592_v22, %v10592_v22  ;;  %v1099_v11 = vrot.slane %v10592_v22, 7  ;;  %v1545_v39 = vcombine.low %v10606_v33, %v10581_v52  ;;  %v10619_v47 = vrot.slane %v1544_v16, %v9474_v9  ;;  %v234_v16 = vld [vmem:[%s9479_s7 + $0xc0] sm:$0xff] }
  0xaf   : > { %13897 = vst [vmem:[#allocation125_spill] sm:$0xff] %v10602_v54  ;;  %13898 = vst [vmem:[#allocation126_spill] sm:$0xff] %v10606_v33  ;;  %8845 = vmatprep.mubr.msk.f32.mxu0 %vm1714_vm8, %v10599_v24  ;;  %v10625_v7 = vcombine.high %v10602_v54, %v10602_v54  ;;  %v1093_v20 = vrot.slane %v10602_v54, 7  ;;  %v2147_v23 = vcombine.low %v9849_v18, %v9863_v45 }
  0xb0   : > { %13899 = vst [vmem:[#allocation127_spill] sm:$0xff] %v10609_v32  ;;  %13900 = vst [vmem:[#allocation128_spill] sm:$0xff] %v10613_v61  ;;  %v1101_v29 = vrot.slane %v1099_v11, 2  ;;  %v1102_v28 = vrot.slane %v10613_v61, 7  ;;  %v2148_v33 = vcombine.low %v9857_v17, %v9872_v49  ;;  %v10635_v43 = vrot.slane %v1545_v39, %v9474_v9 }
  0xb1   : > { %13901 = vst [vmem:[#allocation129_spill] sm:$0xff] %v10619_v47  ;;  %13902 = vst [vmem:[#allocation130_spill] sm:$0xff] %v10625_v7  ;;  %v10639_v13 = vsel %vm9511_vm7, %v1092_v58, %v1093_v20  ;;  %v1095_v3 = vrot.slane %v1093_v20, 2  ;;  %v1096_v57 = vrot.slane %v10625_v7, 7  ;;  %v10649_v49 = vrot.slane %v2147_v23, %v9474_v9 }
  0xb2   : > { %13903 = vst [vmem:[#allocation131_spill] sm:$0xff] %v10635_v43  ;;  %13904 = vst [vmem:[#allocation132_spill] sm:$0xff] %v10639_v13  ;;  %v10644_v42 = vsel %vm9511_vm7, %v1101_v29, %v1102_v28  ;;  %v10652_v39 = vrot.slane %v2148_v33, %v9474_v9  ;;  %v1560_v58 = vcombine.low %v10619_v47, %v10635_v43 }
  0xb3   : > { %13905 = vst [vmem:[#allocation133_spill] sm:$0xff] %v10644_v42  ;;  %13906 = vst [vmem:[#allocation134_spill] sm:$0xff] %v10649_v49  ;;  %v10658_v20 = vsel %vm9511_vm7, %v1095_v3, %v1096_v57  ;;  %v1098_v17 = vrot.slane %v1096_v57, 2  ;;  %v684_v18 = vcombine.high %v234_v16, %v234_v16  ;;  %v10674_v3 = vrot.slane %v234_v16, %v9474_v9 }
  0xb4   : > { %13907 = vst [vmem:[#allocation135_spill] sm:$0xff] %v10652_v39  ;;  %13908 = vst [vmem:[#allocation136_spill] sm:$0xff] %v10658_v20  ;;  %v1561_v29 = vcombine.low %v10639_v13, %v10658_v20  ;;  %v10664_v45 = vcombine.low %v10649_v49, %v10652_v39  ;;  %8634 = vmatprep.mubr.msk.f32.mxu1 %vm1714_vm8, %v1560_v58  ;;  %v10681_v43 = vcombine.high %v10609_v32, %v10609_v32  ;;  %v237_v13 = vld [vmem:[%s9479_s7 + $0xd8] sm:$0xff]  ;;  %v13975_v39 = vld [vmem:[#allocation66_spill] sm:$0xff] }
  0xb5   : > { %v10671_v33 = vsel %vm9511_vm7, %v1098_v17, %v1099_v11  ;;  %13911 = vst [vmem:[#allocation139_spill] sm:$0xff] %v10674_v3  ;;  %v10677_v57 = vrot.slane %v684_v18, %v9474_v9  ;;  %v1104_v11 = vrot.slane %v1102_v28, 2  ;;  %v10694_v18 = vcombine.high %v10674_v3, %v10674_v3 }
  0xb6   : > { %13909 = vst [vmem:[#allocation137_spill] sm:$0xff] %v10664_v45  ;;  %13910 = vst [vmem:[#allocation138_spill] sm:$0xff] %v10671_v33  ;;  %v1562_v47 = vcombine.low %v10671_v33, %v10644_v42  ;;  %v10686_v23 = vrot.slane %v1561_v29, %v9474_v9  ;;  %8846 = vmatmul.mubr.msk.f32.gmra.mrb[4].mxu0 %vm1714_vm8, %v10664_v45  ;;  %v1105_v16 = vrot.slane %v10609_v32, 7  ;;  %v1108_v58 = vrot.slane %v10681_v43, 7 }
  0xb7   : > { %13912 = vst [vmem:[#allocation140_spill] sm:$0xff] %v10677_v57  ;;  %13913 = vst [vmem:[#allocation141_spill] sm:$0xff] %v10681_v43  ;;  %v8020_v42 = vrot.slane %v10674_v3, 9  ;;  %v1115_v17 = vrot.slane %v10677_v57, 7  ;;  %v2164_v12 = vcombine.low %v9904_v40, %v9923_v6  ;;  %v1112_v59 = vrot.slane %v10694_v18, 7 }
  0xb8   : > { %13914 = vst [vmem:[#allocation142_spill] sm:$0xff] %v10686_v23  ;;  %13915 = vst [vmem:[#allocation143_spill] sm:$0xff] %v10694_v18  ;;  %v10701_v29 = vrot.slane %v1562_v47, %v9474_v9  ;;  %v10708_v28 = vsel %vm9511_vm7, %v1104_v11, %v1105_v16  ;;  %v1107_v48 = vrot.slane %v1105_v16, 2  ;;  %v2165_v43 = vcombine.low %v9907_v5, %v9927_v60  ;;  %v13977_v18 = vld [vmem:[#allocation70_spill] sm:$0xff] }
  0xb9   : > { %13917 = vst [vmem:[#allocation145_spill] sm:$0xff] %v10708_v28  ;;  %v10716_v47 = vrot.slane %v2164_v12, %v9474_v9  ;;  %v10720_v55 = vcombine.high %v10677_v57, %v10677_v57  ;;  %v701_v6 = vcombine.high %v235_v2, %v235_v2  ;;  %v10728_v16 = vsel %vm9511_vm7, %v8020_v42, %v1112_v59 }
  0xba   : > { %13916 = vst [vmem:[#allocation144_spill] sm:$0xff] %v10701_v29  ;;  %v1577_v53 = vcombine.low %v10686_v23, %v10701_v29  ;;  %v10724_v11 = vsel %vm9511_vm7, %v1107_v48, %v1108_v58  ;;  %13921 = vst [vmem:[#allocation149_spill] sm:$0xff] %v10728_v16  ;;  %v1114_v60 = vrot.slane %v1112_v59, 2  ;;  %v10731_v29 = vrot.slane %v2165_v43, %v9474_v9 }
  0xbb   : > { %13918 = vst [vmem:[#allocation146_spill] sm:$0xff] %v10716_v47  ;;  %13919 = vst [vmem:[#allocation147_spill] sm:$0xff] %v10720_v55  ;;  %v1578_v12 = vcombine.low %v10708_v28, %v10724_v11  ;;  %v10737_v23 = vrot.slane %v235_v2, %v9474_v9  ;;  %v10740_v48 = vrot.slane %v701_v6, %v9474_v9  ;;  %v1117_v58 = vrot.slane %v1115_v17, 2 }
  0xbc   : > { %13920 = vst [vmem:[#allocation148_spill] sm:$0xff] %v10724_v11  ;;  %13922 = vst [vmem:[#allocation150_spill] sm:$0xff] %v10731_v29  ;;  %8635 = vmatmul.mubr.msk.f32.gmra.mrb[20].mxu1 %vm1714_vm8, %v1577_v53  ;;  %v10744_v42 = vsel %vm9511_vm7, %v1114_v60, %v1115_v17  ;;  %v10748_v59 = vcombine.low %v10716_v47, %v10731_v29  ;;  %v1118_v53 = vrot.slane %v10720_v55, 7  ;;  %v236_v17 = vld [vmem:[%s9479_s7 + $0xd0] sm:$0xff] }
  0xbd   : > { %13923 = vst [vmem:[#allocation151_spill] sm:$0xff] %v10737_v23  ;;  %13924 = vst [vmem:[#allocation152_spill] sm:$0xff] %v10740_v48  ;;  %v2182_v43 = vcombine.low %v9975_v15, %v9959_v1  ;;  %v1579_v2 = vcombine.low %v10728_v16, %v10744_v42  ;;  %v10756_v6 = vrot.slane %v1578_v12, %v9474_v9  ;;  %v1121_v60 = vrot.slane %v10737_v23, 7 }
  0xbe   : > { %13925 = vst [vmem:[#allocation153_spill] sm:$0xff] %v10744_v42  ;;  %13926 = vst [vmem:[#allocation154_spill] sm:$0xff] %v10748_v59  ;;  %v10760_v11 = vcombine.high %v10737_v23, %v10737_v23  ;;  %8848 = vmatprep.mubr.msk.f32.mxu0 %vm1714_vm8, %v10748_v59  ;;  %v10768_v28 = vsel %vm9511_vm7, %v1117_v58, %v1118_v53  ;;  %v1120_v15 = vrot.slane %v1118_v53, 2  ;;  %v1127_v42 = vrot.slane %v10740_v48, 7 }
  0xbf   : > { %13927 = vst [vmem:[#allocation155_spill] sm:$0xff] %v10756_v6  ;;  %13929 = vst [vmem:[#allocation157_spill] sm:$0xff] %v10768_v28  ;;  %v10772_v12 = vrot.slane %v2182_v43, %v9474_v9  ;;  %v10775_v16 = vrot.slane %v1579_v2, %v9474_v9  ;;  %v1123_v1 = vrot.slane %v1121_v60, 2  ;;  %v5011_v40 = vcombine.low %v9914_v51, %v9963_v8 }
  0xc0   : > { %13928 = vst [vmem:[#allocation156_spill] sm:$0xff] %v10760_v11  ;;  %v1124_v5 = vrot.slane %v10760_v11, 7  ;;  %v10782_v38 = vsel %vm9511_vm7, %v1120_v15, %v1121_v60  ;;  %v10786_v58 = vcombine.high %v10740_v48, %v10740_v48  ;;  %v718_v53 = vcombine.high %v236_v17, %v236_v17 }
  0xc1   : > { %13930 = vst [vmem:[#allocation158_spill] sm:$0xff] %v10772_v12  ;;  %13931 = vst [vmem:[#allocation159_spill] sm:$0xff] %v10775_v16  ;;  %v10789_v43 = vrot.slane %v236_v17, %v9474_v9  ;;  %v1594_v2 = vcombine.low %v10756_v6, %v10775_v16  ;;  %v1595_v15 = vcombine.low %v10768_v28, %v10782_v38  ;;  %v1129_v44 = vrot.slane %v1127_v42, 2  ;;  %v13941_v6 = vld [vmem:[#allocation56_spill] sm:$0xff] }
  0xc2   : > { %13932 = vst [vmem:[#allocation160_spill] sm:$0xff] %v10782_v38  ;;  %13933 = vst [vmem:[#allocation161_spill] sm:$0xff] %v10786_v58  ;;  %v10795_v50 = vsel %vm9511_vm7, %v1123_v1, %v1124_v5  ;;  %v1126_v8 = vrot.slane %v1124_v5, 2  ;;  %v5018_v60 = vrot.slane %v5011_v40, %v9474_v9  ;;  %v10801_v35 = vrot.slane %v718_v53, %v9474_v9 }
  0xc3   : > { %13934 = vst [vmem:[#allocation162_spill] sm:$0xff] %v10789_v43  ;;  %13935 = vst [vmem:[#allocation163_spill] sm:$0xff] %v10795_v50  ;;  %v10805_v17 = vcombine.high %v10789_v43, %v10789_v43  ;;  %8637 = vmatprep.mubr.msk.f32.mxu1 %vm1714_vm8, %v1594_v2  ;;  %v10813_v5 = vrot.slane %v1595_v15, %v9474_v9  ;;  %v1130_v40 = vrot.slane %v10786_v58, 7  ;;  %v1133_v53 = vrot.slane %v10789_v43, 7 }
  0xc4   : > { %13936 = vst [vmem:[#allocation164_spill] sm:$0xff] %v10801_v35  ;;  %v10810_v1 = vsel %vm9511_vm7, %v1126_v8, %v1127_v42  ;;  %v5019_v28 = vcombine.low %v5018_v60, %v10772_v12  ;;  %v1139_v2 = vrot.slane %v10801_v35, 7  ;;  %v2198_v37 = vcombine.low %v13942_v30, %v13941_v6  ;;  %v13944_v60 = vld [vmem:[#allocation57_spill] sm:$0xff] }
  0xc5   : > { %13937 = vst [vmem:[#allocation165_spill] sm:$0xff] %v10805_v17  ;;  %13938 = vst [vmem:[#allocation166_spill] sm:$0xff] %v10810_v1  ;;  %v1596_v38 = vcombine.low %v10795_v50, %v10810_v1  ;;  %v1136_v16 = vrot.slane %v10805_v17, 7  ;;  %v10824_v42 = vsel %vm9511_vm7, %v1129_v44, %v1130_v40  ;;  %v1132_v8 = vrot.slane %v1130_v40, 2  ;;  %v13945_v50 = vld [vmem:[#allocation58_spill] sm:$0xff] }
  0xc6   : > { %13939 = vst [vmem:[#allocation167_spill] sm:$0xff] %v10813_v5  ;;  %13940 = vst [vmem:[#allocation168_spill] sm:$0xff] %v10824_v42  ;;  %v1135_v15 = vrot.slane %v1133_v53, 2  ;;  %8849 = vmatmul.mubr.msk.f32.gmra.mrb[6].mxu0 %vm1714_vm8, %v5019_v28  ;;  %v2199_v20 = vcombine.low %v13945_v50, %v13944_v60  ;;  %v10837_v52 = vcombine.high %v10801_v35, %v10801_v35  ;;  %v13961_v50 = vld [vmem:[#allocation64_spill] sm:$0xff] }
  0xc7   : > { %v10829_v33 = vrot.slane %v1596_v38, %v9474_v9  ;;  %v1138_v1 = vrot.slane %v1136_v16, 2  ;;  %v10841_v44 = vsel %vm9511_vm7, %v1132_v8, %v1133_v53  ;;  %v10848_v38 = vrot.slane %v2198_v37, %v9474_v9 }
  0xc8   : > { %13946 = vst [vmem:[#allocation170_spill] sm:$0xff] %v10837_v52  ;;  %13947 = vst [vmem:[#allocation171_spill] sm:$0xff] %v10841_v44  ;;  %v10845_v40 = vsel %vm9511_vm7, %v1135_v15, %v1136_v16  ;;  %v735_v28 = vcombine.high %v237_v13, %v237_v13  ;;  %v1612_v53 = vcombine.low %v10824_v42, %v10841_v44  ;;  %v13955_v42 = vld [vmem:[#allocation62_spill] sm:$0xff] }
  0xc9   : > { %13943 = vst [vmem:[#allocation169_spill] sm:$0xff] %v10829_v33  ;;  %13948 = vst [vmem:[#allocation172_spill] sm:$0xff] %v10845_v40  ;;  %v1611_v60 = vcombine.low %v10813_v5, %v10829_v33  ;;  %v10854_v6 = vsel %vm9511_vm7, %v1138_v1, %v1139_v2  ;;  %v10859_v8 = vrot.slane %v2199_v20, %v9474_v9  ;;  %v1141_v33 = vrot.slane %v1139_v2, 2 }
  0xca   : > { %13949 = vst [vmem:[#allocation173_spill] sm:$0xff] %v10848_v38  ;;  %13950 = vst [vmem:[#allocation174_spill] sm:$0xff] %v10854_v6  ;;  %v1613_v16 = vcombine.low %v10845_v40, %v10854_v6  ;;  %v10864_v37 = vrot.slane %v237_v13, %v9474_v9  ;;  %v10867_v15 = vrot.slane %v735_v28, %v9474_v9  ;;  %v1142_v20 = vrot.slane %v10837_v52, 7  ;;  %v13956_v6 = vld [vmem:[#allocation59_spill] sm:$0xff]  ;;  %v238_v13 = vld [vmem:[%s9479_s7 + $0xe0] sm:$0xff] }
  0xcb   : > { %13951 = vst [vmem:[#allocation175_spill] sm:$0xff] %v10859_v8  ;;  %8638 = vmatmul.mubr.msk.f32.gmra.mrb[22].mxu1 %vm1714_vm8, %v1611_v60  ;;  %v10871_v1 = vrot.slane %v1612_v53, %v9474_v9  ;;  %v10875_v44 = vcombine.low %v10848_v38, %v10859_v8  ;;  %v2215_v40 = vcombine.low %v13956_v6, %v13955_v42  ;;  %v13960_v6 = vld [vmem:[#allocation63_spill] sm:$0xff] }
  0xcc   : > { %13952 = vst [vmem:[#allocation176_spill] sm:$0xff] %v10864_v37  ;;  %v10882_v5 = vrot.slane %v1613_v16, %v9474_v9  ;;  %v10886_v2 = vcombine.high %v10864_v37, %v10864_v37  ;;  %v1145_v60 = vrot.slane %v10864_v37, 7  ;;  %v1151_v28 = vrot.slane %v10867_v15, 7 }
  0xcd   : > { %13953 = vst [vmem:[#allocation177_spill] sm:$0xff] %v10871_v1  ;;  %13954 = vst [vmem:[#allocation178_spill] sm:$0xff] %v10875_v44  ;;  %8851 = vmatprep.mubr.msk.f32.mxu0 %vm1714_vm8, %v10875_v44  ;;  %v10894_v53 = vsel %vm9511_vm7, %v1141_v33, %v1142_v20  ;;  %v1144_v42 = vrot.slane %v1142_v20, 2  ;;  %v2216_v16 = vcombine.low %v13961_v50, %v13960_v6 }
  0xce   : > { %13957 = vst [vmem:[#allocation179_spill] sm:$0xff] %v10882_v5  ;;  %13958 = vst [vmem:[#allocation180_spill] sm:$0xff] %v10886_v2  ;;  %v10899_v30 = vrot.slane %v2215_v40, %v9474_v9  ;;  %v1628_v8 = vcombine.low %v10871_v1, %v10882_v5  ;;  %v1147_v38 = vrot.slane %v1145_v60, 2  ;;  %v1148_v21 = vrot.slane %v10886_v2, 7 }
  0xcf   : > { %13959 = vst [vmem:[#allocation181_spill] sm:$0xff] %v10894_v53  ;;  %v751_v29 = vcombine.high %v238_v13, %v238_v13  ;;  %v10906_v49 = vsel %vm9511_vm7, %v1144_v42, %v1145_v60  ;;  %v10909_v33 = vrot.slane %v2216_v16, %v9474_v9  ;;  %v10912_v20 = vrot.slane %v238_v13, %v9474_v9 }
  0xd0   : > { %13962 = vst [vmem:[#allocation182_spill] sm:$0xff] %v10899_v30  ;;  %13963 = vst [vmem:[#allocation183_spill] sm:$0xff] %v10906_v49  ;;  %v10916_v40 = vcombine.high %v10867_v15, %v10867_v15  ;;  %8640 = vmatprep.mubr.msk.f32.mxu1 %vm1714_vm8, %v1628_v8  ;;  %v10921_v5 = vsel %vm9511_vm7, %v1147_v38, %v1148_v21  ;;  %v1150_v1 = vrot.slane %v1148_v21, 2  ;;  %v1153_v8 = vrot.slane %v1151_v28, 2  ;;  %v239_v38 = vld [vmem:[%s9479_s7 + $0xe8] sm:$0xff] }
  0xd1   : > { %13964 = vst [vmem:[#allocation184_spill] sm:$0xff] %v10909_v33  ;;  %13965 = vst [vmem:[#allocation185_spill] sm:$0xff] %v10912_v20  ;;  %v1629_v42 = vcombine.low %v10894_v53, %v10906_v49  ;;  %v10926_v60 = vrot.slane %v751_v29, %v9474_v9  ;;  %v10930_v13 = vcombine.low %v10899_v30, %v10909_v33  ;;  %v8021_v53 = vrot.slane %v10912_v20, 9 }
  0xd2   : > { %13966 = vst [vmem:[#allocation186_spill] sm:$0xff] %v10921_v5  ;;  %v10934_v16 = vcombine.high %v10912_v20, %v10912_v20  ;;  %v1154_v6 = vrot.slane %v10916_v40, 7  ;;  %v10940_v21 = vsel %vm9511_vm7, %v1150_v1, %v1151_v28  ;;  %v2232_v47 = vcombine.low %v13975_v39, %v13974_v0  ;;  %v13976_v20 = vld [vmem:[#allocation69_spill] sm:$0xff] }
  0xd3   : > { %13967 = vst [vmem:[#allocation187_spill] sm:$0xff] %v10926_v60  ;;  %13968 = vst [vmem:[#allocation188_spill] sm:$0xff] %v10930_v13  ;;  %v10943_v49 = vrot.slane %v1629_v42, %v9474_v9  ;;  %v10947_v29 = vcombine.high %v10926_v60, %v10926_v60  ;;  %v1630_v50 = vcombine.low %v10921_v5, %v10940_v21  ;;  %8852 = vmatmul.mubr.msk.f32.gmra.mrb[8].mxu0 %vm1714_vm8, %v10930_v13 }
  0xd4   : > { %13969 = vst [vmem:[#allocation189_spill] sm:$0xff] %v10934_v16  ;;  %13970 = vst [vmem:[#allocation190_spill] sm:$0xff] %v10940_v21  ;;  %v10956_v30 = vsel %vm9511_vm7, %v1153_v8, %v1154_v6  ;;  %v1158_v1 = vrot.slane %v10934_v16, 7  ;;  %v1161_v28 = vrot.slane %v10926_v60, 7  ;;  %v2233_v34 = vcombine.low %v13977_v18, %v13976_v20 }
  0xd5   : > { %13971 = vst [vmem:[#allocation191_spill] sm:$0xff] %v10943_v49  ;;  %13972 = vst [vmem:[#allocation192_spill] sm:$0xff] %v10947_v29  ;;  %v1164_v42 = vrot.slane %v10947_v29, 7  ;;  %v768_v21 = vcombine.high %v239_v38, %v239_v38  ;;  %v10966_v5 = vrot.slane %v1630_v50, %v9474_v9  ;;  %v10975_v44 = vrot.slane %v2232_v47, %v9474_v9 }
  0xd6   : > { %13973 = vst [vmem:[#allocation193_spill] sm:$0xff] %v10956_v30  ;;  %v10970_v6 = vsel %vm9511_vm7, %v8021_v53, %v1158_v1  ;;  %v1160_v8 = vrot.slane %v1158_v1, 2  ;;  %v1163_v33 = vrot.slane %v1161_v28, 2  ;;  %v10978_v0 = vrot.slane %v2233_v34, %v9474_v9 }
  0xd7   : > { %13978 = vst [vmem:[#allocation194_spill] sm:$0xff] %v10966_v5  ;;  %13979 = vst [vmem:[#allocation195_spill] sm:$0xff] %v10970_v6  ;;  %v1646_v13 = vcombine.low %v10956_v30, %v10970_v6  ;;  %v10981_v18 = vrot.slane %v239_v38, %v9474_v9  ;;  %v1645_v50 = vcombine.low %v10943_v49, %v10966_v5  ;;  %v13991_v30 = vld [vmem:[#allocation77_spill] sm:$0xff]  ;;  %v13992_v5 = vld [vmem:[#allocation74_spill] sm:$0xff] }
  0xd8   : > { %13980 = vst [vmem:[#allocation196_spill] sm:$0xff] %v10975_v44  ;;  %13981 = vst [vmem:[#allocation197_spill] sm:$0xff] %v10978_v0  ;;  %v10987_v53 = vsel %vm9511_vm7, %v1160_v8, %v1161_v28  ;;  %v10991_v1 = vsel %vm9511_vm7, %v1163_v33, %v1164_v42  ;;  %v10994_v47 = vrot.slane %v768_v21, %v9474_v9  ;;  %v1166_v21 = vrot.slane %v1164_v42, 2  ;;  %v13993_v49 = vld [vmem:[#allocation73_spill] sm:$0xff]  ;;  %v240_v42 = vld [vmem:[%s9479_s7 + $0xf0] sm:$0xff] }
  0xd9   : > { %13982 = vst [vmem:[#allocation198_spill] sm:$0xff] %v10981_v18  ;;  %13983 = vst [vmem:[#allocation199_spill] sm:$0xff] %v10987_v53  ;;  %v1647_v34 = vcombine.low %v10987_v53, %v10991_v1  ;;  %v10999_v38 = vrot.slane %v1646_v13, %v9474_v9  ;;  %v11003_v6 = vcombine.low %v10975_v44, %v10978_v0  ;;  %8641 = vmatmul.mubr.msk.f32.gmra.mrb[24].mxu1 %vm1714_vm8, %v1645_v50 }
  0xda   : > { %13984 = vst [vmem:[#allocation200_spill] sm:$0xff] %v10991_v1  ;;  %13985 = vst [vmem:[#allocation201_spill] sm:$0xff] %v10994_v47  ;;  %v11007_v28 = vcombine.high %v10981_v18, %v10981_v18  ;;  %v11012_v33 = vcombine.high %v10994_v47, %v10994_v47  ;;  %v1167_v8 = vrot.slane %v10981_v18, 7  ;;  %v1173_v13 = vrot.slane %v10994_v47, 7 }
  0xdb   : > { %13986 = vst [vmem:[#allocation202_spill] sm:$0xff] %v10999_v38  ;;  %13987 = vst [vmem:[#allocation203_spill] sm:$0xff] %v11003_v6  ;;  %v11017_v1 = vrot.slane %v1647_v34, %v9474_v9  ;;  %8854 = vmatprep.mubr.msk.f32.mxu0 %vm1714_vm8, %v11003_v6  ;;  %v2250_v50 = vcombine.low %v13992_v5, %v13991_v30  ;;  %v8188_v39 = vcombine.high %v13976_v20, %v13993_v49  ;;  %v241_v49 = vld [vmem:[%s9479_s7 + $0xf8] sm:$0xff] }
  0xdc   : > { %13988 = vst [vmem:[#allocation204_spill] sm:$0xff] %v11007_v28  ;;  %13989 = vst [vmem:[#allocation205_spill] sm:$0xff] %v11012_v33  ;;  %v1170_v53 = vrot.slane %v11007_v28, 7  ;;  %v11029_v0 = vsel %vm9511_vm7, %v1166_v21, %v1167_v8  ;;  %v1169_v44 = vrot.slane %v1167_v8, 2  ;;  %v1175_v34 = vrot.slane %v1173_v13, 2 }
  0xdd   : > { %13990 = vst [vmem:[#allocation206_spill] sm:$0xff] %v11017_v1  ;;  %13994 = vst [vmem:[#allocation207_spill] sm:$0xff] %v11029_v0  ;;  %v1176_v59 = vrot.slane %v11012_v33, 7  ;;  %v1662_v6 = vcombine.low %v10999_v38, %v11017_v1  ;;  %v11035_v12 = vrot.slane %v2250_v50, %v9474_v9  ;;  %v5027_v30 = vrot.slane %v8188_v39, %v9474_v9 }
  0xde   : > { %v1172_v45 = vrot.slane %v1170_v53, 2  ;;  %v11040_v5 = vsel %vm9511_vm7, %v1169_v44, %v1170_v53  ;;  %v785_v8 = vcombine.high %v240_v42, %v240_v42  ;;  %v11047_v20 = vrot.slane %v240_v42, %v9474_v9 }
  0xdf   : > { %13995 = vst [vmem:[#allocation208_spill] sm:$0xff] %v11035_v12  ;;  %13996 = vst [vmem:[#allocation209_spill] sm:$0xff] %v11040_v5  ;;  %v11044_v21 = vsel %vm9511_vm7, %v1175_v34, %v1176_v59  ;;  %8643 = vmatprep.mubr.msk.f32.mxu1 %vm1714_vm8, %v1662_v6  ;;  %v1663_v39 = vcombine.low %v11029_v0, %v11040_v5  ;;  %v5028_v44 = vcombine.low %v5027_v30, %v11035_v12  ;;  %v14004_v30 = vld [vmem:[#allocation80_spill] sm:$0xff]  ;;  %v14005_v5 = vld [vmem:[#allocation83_spill] sm:$0xff] }
  0xe0   : > { %13997 = vst [vmem:[#allocation210_spill] sm:$0xff] %v11044_v21  ;;  %13998 = vst [vmem:[#allocation211_spill] sm:$0xff] %v11047_v20  ;;  %v11053_v50 = vsel %vm9511_vm7, %v1172_v45, %v1173_v13  ;;  %v1178_v53 = vrot.slane %v1176_v59, 2  ;;  %v11061_v1 = vrot.slane %v785_v8, %v9474_v9  ;;  %v11065_v42 = vcombine.high %v11047_v20, %v11047_v20  ;;  %v14003_v13 = vld [vmem:[#allocation82_spill] sm:$0xff]  ;;  %v14006_v0 = vld [vmem:[#allocation81_spill] sm:$0xff] }
  0xe1   : > { %13999 = vst [vmem:[#allocation212_spill] sm:$0xff] %v11053_v50  ;;  %v1664_v34 = vcombine.low %v11053_v50, %v11044_v21  ;;  %v1179_v6 = vrot.slane %v11047_v20, 7  ;;  %v11069_v45 = vrot.slane %v1663_v39, %v9474_v9  ;;  %8855 = vmatmul.mubr.msk.f32.gmra.mrb[10].mxu0 %vm1714_vm8, %v5028_v44  ;;  %v2266_v59 = vcombine.low %v14004_v30, %v14003_v13 }
  0xe2   : > { %14000 = vst [vmem:[#allocation213_spill] sm:$0xff] %v11061_v1  ;;  %14001 = vst [vmem:[#allocation214_spill] sm:$0xff] %v11065_v42  ;;  %v2267_v21 = vcombine.low %v14006_v0, %v14005_v5  ;;  %v802_v50 = vcombine.high %v241_v49, %v241_v49  ;;  %v11081_v38 = vcombine.high %v11061_v1, %v11061_v1  ;;  %v1182_v44 = vrot.slane %v11065_v42, 7 }
  0xe3   : > { %14002 = vst [vmem:[#allocation215_spill] sm:$0xff] %v11069_v45  ;;  %v11077_v8 = vrot.slane %v1664_v34, %v9474_v9  ;;  %v11085_v39 = vsel %vm9511_vm7, %v1178_v53, %v1179_v6  ;;  %v1181_v12 = vrot.slane %v1179_v6, 2  ;;  %v1185_v13 = vrot.slane %v11061_v1, 7  ;;  %v14027_v1 = vld [vmem:[#allocation6_spill] sm:$0xff] }
  0xe4   : > { %14008 = vst [vmem:[#allocation217_spill] sm:$0xff] %v11081_v38  ;;  %14009 = vst [vmem:[#allocation218_spill] sm:$0xff] %v11085_v39  ;;  %v11090_v30 = vrot.slane %v2266_v59, %v9474_v9  ;;  %v11093_v5 = vrot.slane %v2267_v21, %v9474_v9  ;;  %v1188_v0 = vrot.slane %v11081_v38, 7  ;;  %v11099_v24 = vrot.slane %v241_v49, %v9474_v9  ;;  %v14023_v38 = vld [vmem:[#allocation86_spill] sm:$0xff] }
  0xe5   : > { %14007 = vst [vmem:[#allocation216_spill] sm:$0xff] %v11077_v8  ;;  %v1679_v34 = vcombine.low %v11069_v45, %v11077_v8  ;;  %v11102_v53 = vrot.slane %v802_v50, %v9474_v9  ;;  %v11106_v6 = vsel %vm9511_vm7, %v1181_v12, %v1182_v44  ;;  %v1184_v59 = vrot.slane %v1182_v44, 2 }
  0xe6   : > { %14010 = vst [vmem:[#allocation219_spill] sm:$0xff] %v11090_v30  ;;  %14011 = vst [vmem:[#allocation220_spill] sm:$0xff] %v11093_v5  ;;  %v1187_v51 = vrot.slane %v1185_v13, 2  ;;  %v11110_v21 = vcombine.low %v11090_v30, %v11093_v5  ;;  %v1680_v8 = vcombine.low %v11085_v39, %v11106_v6  ;;  %v11117_v49 = vcombine.high %v11099_v24, %v11099_v24  ;;  %v14022_v30 = vld [vmem:[#allocation88_spill] sm:$0xff] }
  0xe7   : > { %14012 = vst [vmem:[#allocation221_spill] sm:$0xff] %v11099_v24  ;;  %14013 = vst [vmem:[#allocation222_spill] sm:$0xff] %v11102_v53  ;;  %8644 = vmatmul.mubr.msk.f32.gmra.mrb[26].mxu1 %vm1714_vm8, %v1679_v34  ;;  %v11121_v50 = vcombine.high %v11102_v53, %v11102_v53  ;;  %v1190_v12 = vrot.slane %v1188_v0, 2  ;;  %v11125_v44 = vsel %vm9511_vm7, %v1184_v59, %v1185_v13  ;;  %v1191_v34 = vrot.slane %v11099_v24, 7 }
  0xe8   : > { %14014 = vst [vmem:[#allocation223_spill] sm:$0xff] %v11106_v6  ;;  %14015 = vst [vmem:[#allocation224_spill] sm:$0xff] %v11110_v21  ;;  %v11129_v45 = vsel %vm9511_vm7, %v1187_v51, %v1188_v0  ;;  %8857 = vmatprep.mubr.msk.f32.mxu0 %vm1714_vm8, %v11110_v21  ;;  %v1197_v6 = vrot.slane %v11102_v53, 7  ;;  %v11138_v5 = vrot.slane %v1680_v8, %v9474_v9  ;;  %v1194_v13 = vrot.slane %v11117_v49, 7  ;;  %v14026_v8 = vld [vmem:[#allocation87_spill] sm:$0xff] }
  0xe9   : > { %14016 = vst [vmem:[#allocation225_spill] sm:$0xff] %v11117_v49  ;;  %14017 = vst [vmem:[#allocation226_spill] sm:$0xff] %v11121_v50  ;;  %v1681_v39 = vcombine.low %v11125_v44, %v11129_v45  ;;  %v1200_v59 = vrot.slane %v11121_v50, 7  ;;  %v11144_v51 = vsel %vm9511_vm7, %v1190_v12, %v1191_v34  ;;  %v1193_v0 = vrot.slane %v1191_v34, 2  ;;  %v14028_v49 = vld [vmem:[#allocation2_spill] sm:$0xff] }
  0xea   : > { %14018 = vst [vmem:[#allocation227_spill] sm:$0xff] %v11125_v44  ;;  %14019 = vst [vmem:[#allocation228_spill] sm:$0xff] %v11129_v45  ;;  %v1199_v21 = vrot.slane %v1197_v6, 2  ;;  %v2283_v24 = vcombine.low %v14023_v38, %v14022_v30  ;;  %v1196_v45 = vrot.slane %v1194_v13, 2  ;;  %v14025_v44 = vld [vmem:[#allocation89_spill] sm:$0xff]  ;;  %v1994_v26 = vcombine.low %v14028_v49, %v14027_v1 }
  0xeb   : > { %14020 = vst [vmem:[#allocation229_spill] sm:$0xff] %v11138_v5  ;;  %14021 = vst [vmem:[#allocation230_spill] sm:$0xff] %v11144_v51  ;;  %v11149_v53 = vrot.slane %v1681_v39, %v9474_v9  ;;  %v2284_v42 = vcombine.low %v14026_v8, %v14025_v44  ;;  %v11157_v50 = vsel %vm9511_vm7, %v1193_v0, %v1194_v13  ;;  %v14032_v39 = vld [vmem:[#allocation12_spill] sm:$0xff]  ;;  %v14033_v30 = vld [vmem:[#allocation5_spill] sm:$0xff] }
  0xec   : > { %14029 = vst [vmem:[#allocation2_spill] sm:$0xff] %v11157_v50  ;;  %v11161_v12 = vsel %vm9511_vm7, %v1199_v21, %v1200_v59  ;;  %v11164_v34 = vrot.slane %v2283_v24, %v9474_v9  ;;  %v1995_v38 = vcombine.low %v14033_v30, %v14032_v39  ;;  %v11172_v49 = vsel %vm9511_vm7, %v1196_v45, %v1197_v6  ;;  %v14036_v8 = vld [vmem:[#allocation94_spill] sm:$0xff]  ;;  %v14037_v39 = vld [vmem:[#allocation92_spill] sm:$0xff] }
  0xed   : > { %14024 = vst [vmem:[#allocation231_spill] sm:$0xff] %v11149_v53  ;;  %14030 = vst [vmem:[#allocation232_spill] sm:$0xff] %v11161_v12  ;;  %v1696_v44 = vcombine.low %v11138_v5, %v11149_v53  ;;  %v1697_v13 = vcombine.low %v11144_v51, %v11157_v50  ;;  %v11177_v0 = vrot.slane %v2284_v42, %v9474_v9  ;;  %v14039_v42 = vld [vmem:[#allocation93_spill] sm:$0xff] }
  0xee   : > { %14031 = vst [vmem:[#allocation233_spill] sm:$0xff] %v11164_v34  ;;  %14034 = vst [vmem:[#allocation5_spill] sm:$0xff] %v11172_v49  ;;  %v1698_v24 = vcombine.low %v11172_v49, %v11161_v12  ;;  %v2002_v21 = vrot.slane %v1994_v26, %v9474_v9  ;;  %v2009_v59 = vrot.slane %v1995_v38, %v9474_v9  ;;  %v14040_v12 = vld [vmem:[#allocation17_spill] sm:$0xff]  ;;  %v14041_v49 = vld [vmem:[#allocation3_spill] sm:$0xff] }
  0xef   : > { %14035 = vst [vmem:[#allocation234_spill] sm:$0xff] %v11177_v0  ;;  %v2300_v53 = vcombine.low %v14037_v39, %v14036_v8  ;;  %8646 = vmatprep.mubr.msk.f32.mxu1 %vm1714_vm8, %v1696_v44  ;;  %v11187_v45 = vrot.slane %v1697_v13, %v9474_v9  ;;  %v11191_v6 = vcombine.low %v11164_v34, %v11177_v0  ;;  %v14043_v44 = vld [vmem:[#allocation18_spill] sm:$0xff]  ;;  %v14044_v13 = vld [vmem:[#allocation7_spill] sm:$0xff]  ;;  %v14045_v39 = vld [vmem:[#allocation100_spill] sm:$0xff] }
  0xf0   : > { %v5029_v50 = vcombine.low %v14039_v42, %v10377_v63  ;;  %v2011_v26 = vcombine.low %v14041_v49, %v14040_v12  ;;  %v11198_v38 = vrot.slane %v1698_v24, %v9474_v9  ;;  %v2010_v51 = vcombine.low %v2002_v21, %v2009_v59  ;;  %v14046_v24 = vld [vmem:[#allocation101_spill] sm:$0xff]  ;;  %v14047_v59 = vld [vmem:[#allocation23_spill] sm:$0xff]  ;;  %v14050_v49 = vld [vmem:[#allocation22_spill] sm:$0xff] }
  0xf1   : > { %14038 = vst [vmem:[#allocation235_spill] sm:$0xff] %v11187_v45  ;;  %v11201_v5 = vrot.slane %v2300_v53, %v9474_v9  ;;  %v2012_v27 = vcombine.low %v14044_v13, %v14043_v44  ;;  %8858 = vmatmul.mubr.msk.f32.gmra.mrb[12].mxu0 %vm1714_vm8, %v11191_v6  ;;  %v2317_v0 = vcombine.low %v14045_v39, %v10409_v36  ;;  %v14048_v44 = vld [vmem:[#allocation19_spill] sm:$0xff]  ;;  %v14049_v13 = vld [vmem:[#allocation25_spill] sm:$0xff] }
  0xf2   : > { %14042 = vst [vmem:[#allocation236_spill] sm:$0xff] %v11198_v38  ;;  %v5036_v8 = vrot.slane %v5029_v50, %v9474_v9  ;;  %v2019_v63 = vrot.slane %v2011_v26, %v9474_v9  ;;  %v2318_v34 = vcombine.low %v14046_v24, %v10413_v4  ;;  %v1713_v53 = vcombine.low %v11187_v45, %v11198_v38 }
  0xf3   : > { %v2026_v21 = vrot.slane %v2012_v27, %v9474_v9  ;;  %v2028_v12 = vcombine.low %v14048_v44, %v14047_v59  ;;  %v2029_v1 = vcombine.low %v14050_v49, %v14049_v13  ;;  %v11222_v26 = vrot.slane %v2317_v0, %v9474_v9  ;;  %v14051_v0 = vld [vmem:[#allocation31_spill] sm:$0xff] }
  0xf4   : > { %v5037_v50 = vcombine.low %v11201_v5, %v5036_v8  ;;  %v11225_v39 = vrot.slane %v2318_v34, %v9474_v9  ;;  %v2334_v4 = vcombine.low %v10497_v19, %v10533_v25  ;;  %8647 = vmatmul.mubr.msk.f32.gmra.mrb[28].mxu1 %vm1714_vm8, %v1713_v53  ;;  %v2335_v36 = vcombine.low %v10551_v10, %v10522_v62  ;;  %v14054_v62 = vld [vmem:[#allocation9_spill] sm:$0xff]  ;;  %v14077_v10 = vld [vmem:[#allocation158_spill] sm:$0xff] }
  0xf5   : > { %v2027_v27 = vcombine.low %v2019_v63, %v2026_v21  ;;  %v2036_v38 = vrot.slane %v2028_v12, %v9474_v9  ;;  %v2043_v45 = vrot.slane %v2029_v1, %v9474_v9  ;;  %8651 = vmatprep.mubr.msk.f32.mxu1 %vm1714_vm8, %v2010_v51  ;;  %v14052_v63 = vld [vmem:[#allocation24_spill] sm:$0xff]  ;;  %v2351_v51 = vcombine.low %v10538_v56, %v10602_v54 }
  0xf6   : > { %8860 = vmatprep.mubr.msk.f32.mxu0 %vm1714_vm8, %v5037_v50  ;;  %v11238_v8 = vcombine.low %v11222_v26, %v11225_v39  ;;  %v11241_v34 = vrot.slane %v2334_v4, %v9474_v9  ;;  %v2045_v53 = vcombine.low %v14052_v63, %v14051_v0  ;;  %v11246_v1 = vrot.slane %v2335_v36, %v9474_v9  ;;  %v14053_v21 = vld [vmem:[#allocation4_spill] sm:$0xff] }
  0xf7   : > { %v2044_v12 = vcombine.low %v2036_v38, %v2043_v45  ;;  %v2046_v25 = vcombine.low %v14054_v62, %v14053_v21  ;;  %v2352_v4 = vcombine.low %v10625_v7, %v10592_v22  ;;  %v2368_v45 = vcombine.low %v10613_v61, %v10609_v32  ;;  %v11275_v22 = vld [vmem:[%s13304_s1 + $0xc] sm:$0xf]  ;;  %v14056_v61 = vld [vmem:[#allocation34_spill] sm:$0xff] }
  0xf8   : > { %8861 = vmatmul.mubr.msk.f32.gmra.mrb[14].mxu0 %vm1714_vm8, %v11238_v8  ;;  %v2053_v50 = vrot.slane %v2045_v53, %v9474_v9  ;;  %v8189_v36 = vcombine.high %v10609_v32, %v10674_v3  ;;  %8652 = vmatmul.mubr.msk.f32.vlgmr.msra.gmra.mrb[0].mxu1 %vm1714_vm8, %v2027_v27  ;;  %v11264_v38 = vcombine.low %v11241_v34, %v11246_v1  ;;  %v9350_v27 = vld [vmem:[%s13304_s1 + $0x8] sm:$0xf] }
  0xf9   : > { %v2060_v54 = vrot.slane %v2046_v25, %v9474_v9  ;;  %v11268_v56 = vrot.slane %v2351_v51, %v9474_v9  ;;  %v2385_v53 = vcombine.low %v10677_v57, %v10720_v55  ;;  %14055 = vst [vmem:[#allocation23_spill] sm:$0xff] %v11275_v22  ;;  %8654 = vmatprep.mubr.msk.f32.mxu1 %vm1714_vm8, %v2044_v12 }
  0xfa   : > { %8697 = vmatpush3.msk.msra.mxu1 %vm1775_vm0, %v9350_v27  ;;  %v11283_v25 = vrot.slane %v2352_v4, %v9474_v9  ;;  %v11286_v51 = vrot.slane %v2368_v45, %v9474_v9  ;;  %v5045_v55 = vrot.slane %v8189_v36, %v9474_v9  ;;  %8863 = vmatprep.mubr.msk.f32.mxu0 %vm1714_vm8, %v11264_v38 }
  0xfb   : > { %v2061_v57 = vcombine.low %v2053_v50, %v2060_v54  ;;  %v2386_v12 = vcombine.low %v10737_v23, %v10760_v11  ;;  %v11294_v32 = vrot.slane %v2385_v53, %v9474_v9  ;;  %v2402_v27 = vcombine.low %v10740_v48, %v10786_v58  ;;  %8743 = vmatprep.subr.msk.mxu1 %vm1775_vm0, %v11275_v22  ;;  %v14066_v58 = vld [vmem:[#allocation217_spill] sm:$0xff]  ;;  %v14068_v11 = vld [vmem:[#allocation222_spill] sm:$0xff] }
  0xfc   : > { %v11300_v4 = vcombine.low %v11268_v56, %v11283_v25  ;;  %v5046_v45 = vcombine.low %v11286_v51, %v5045_v55  ;;  %v2403_v36 = vcombine.low %v10789_v43, %v10805_v17  ;;  %v2114_v54 = vcombine.low %v9754_v41, %v14056_v61  ;;  %v14069_v48 = vld [vmem:[#allocation225_spill] sm:$0xff] }
  0xfd   : > { %8655 = vmatmul.mubr.msk.f32.gmra.mrb[2].mxu1 %vm1714_vm8, %v2061_v57  ;;  %v11311_v50 = vrot.slane %v2386_v12, %v9474_v9  ;;  %v11314_v53 = vrot.slane %v2402_v27, %v9474_v9  ;;  %v2419_v55 = vcombine.low %v10801_v35, %v10837_v52  ;;  %v2420_v17 = vcombine.low %v10864_v37, %v10886_v2  ;;  %v14060_v52 = vld [vmem:[#allocation214_spill] sm:$0xff]  ;;  %v14081_v22 = vld [vmem:[#allocation137_spill] sm:$0xff] }
  0xfe   : > { %8864 = vmatmul.mubr.msk.f32.gmra.mrb[16].mxu0 %vm1714_vm8, %v11300_v4  ;;  %8657 = vmatprep.mubr.msk.f32.mxu1 %vm1714_vm8, %v10470_v14  ;;  %v11325_v57 = vrot.slane %v2403_v36, %v9474_v9  ;;  %v11328_v12 = vrot.slane %v2114_v54, %v9474_v9  ;;  %v2437_v27 = vcombine.low %v10934_v16, %v10926_v60  ;;  %v14062_v35 = vld [vmem:[#allocation46_spill] sm:$0xff] }
  0xff   : > { %8866 = vmatprep.mubr.msk.f32.mxu0 %vm1714_vm8, %v5046_v45  ;;  %v11335_v41 = vcombine.low %v11294_v32, %v11311_v50  ;;  %v11338_v2 = vrot.slane %v2419_v55, %v9474_v9  ;;  %v11341_v14 = vrot.slane %v2420_v17, %v9474_v9  ;;  %v5047_v36 = vcombine.low %v10867_v15, %v10916_v40 }
 0x100   : > { %v11347_v54 = vcombine.low %v11314_v53, %v11325_v57  ;;  %v2129_v45 = vcombine.low %v10529_v31, %v11328_v12  ;;  %v11352_v16 = vrot.slane %v2437_v27, %v9474_v9  ;;  %v2453_v55 = vcombine.low %v10947_v29, %v10981_v18  ;;  %v242_v27 = vld [vmem:[%s9479_s7 + $0x100] sm:$0xff]  ;;  %v14057_v18 = vld [vmem:[#allocation109_spill] sm:$0xff] }
 0x101   : > { %8658 = vmatmul.mubr.msk.f32.gmra.mrb[4].mxu1 %vm1714_vm8, %v10499_v46  ;;  %v11360_v17 = vcombine.low %v11338_v2, %v11341_v14  ;;  %v5054_v40 = vrot.slane %v5047_v36, %v9474_v9  ;;  %v2454_v60 = vcombine.low %v11007_v28, %v10994_v47  ;;  %v2470_v31 = vcombine.low %v11012_v33, %v11047_v20  ;;  %v14059_v29 = vld [vmem:[#allocation213_spill] sm:$0xff]  ;;  %v14061_v36 = vld [vmem:[#allocation50_spill] sm:$0xff]  ;;  %v243_v28 = vld [vmem:[%s9479_s7 + $0x108] sm:$0xff] }
 0x102   : > { %8867 = vmatmul.mubr.msk.f32.gmra.mrb[18].mxu0 %vm1714_vm8, %v11335_v41  ;;  %8660 = vmatprep.mubr.msk.f32.mxu1 %vm1714_vm8, %v14057_v18  ;;  %v11373_v46 = vrot.slane %v2453_v55, %v9474_v9  ;;  %v2471_v37 = vcombine.low %v14060_v52, %v14059_v29  ;;  %v2181_v47 = vcombine.low %v14062_v35, %v14061_v36  ;;  %v14065_v55 = vld [vmem:[#allocation221_spill] sm:$0xff] }
 0x103   : > { %8869 = vmatprep.mubr.msk.f32.mxu0 %vm1714_vm8, %v11347_v54  ;;  %v5055_v20 = vcombine.low %v5054_v40, %v11352_v16  ;;  %v11384_v33 = vrot.slane %v2454_v60, %v9474_v9  ;;  %v11387_v18 = vrot.slane %v2470_v31, %v9474_v9  ;;  %v2487_v43 = vcombine.low %v14066_v58, %v14065_v55  ;;  %v244_v55 = vld [vmem:[%s9479_s7 + $0x110] sm:$0xff]  ;;  %v245_v36 = vld [vmem:[%s9479_s7 + $0x118] sm:$0xff] }
 0x104   : > { %14058 = vst [vmem:[#allocation19_spill] sm:$0xff] %v11373_v46  ;;  %v11392_v29 = vrot.slane %v2471_v37, %v9474_v9  ;;  %v11395_v52 = vrot.slane %v2181_v47, %v9474_v9  ;;  %v2488_v23 = vcombine.low %v14069_v48, %v14068_v11  ;;  %v3606_v7 = vcombine.high %v242_v27, %v242_v27  ;;  %v14072_v37 = vld [vmem:[#allocation124_spill] sm:$0xff] }
 0x105   : > { %14063 = vst [vmem:[#allocation25_spill] sm:$0xff] %v11384_v33  ;;  %14064 = vst [vmem:[#allocation22_spill] sm:$0xff] %v11387_v18  ;;  %8661 = vmatmul.mubr.msk.f32.gmra.mrb[6].mxu1 %vm1714_vm8, %v2129_v45  ;;  %v11401_v60 = vrot.slane %v2487_v43, %v9474_v9  ;;  %v11404_v40 = vrot.slane %v242_v27, %v9474_v9  ;;  %v3623_v31 = vcombine.high %v243_v28, %v243_v28 }
 0x106   : > { %14067 = vst [vmem:[#allocation31_spill] sm:$0xff] %v11392_v29  ;;  %8870 = vmatmul.mubr.msk.f32.gmra.mrb[20].mxu0 %vm1714_vm8, %v11360_v17  ;;  %8663 = vmatprep.mubr.msk.f32.mxu1 %vm1714_vm8, %v14072_v37  ;;  %v11413_v47 = vcombine.low %v11373_v46, %v11384_v33  ;;  %v11417_v43 = vcombine.low %v11387_v18, %v11392_v29  ;;  %v14080_v29 = vld [vmem:[#allocation73_spill] sm:$0xff] }
 0x107   : > { %14070 = vst [vmem:[#allocation24_spill] sm:$0xff] %v11401_v60  ;;  %14071 = vst [vmem:[#allocation4_spill] sm:$0xff] %v11404_v40  ;;  %v11420_v45 = vrot.slane %v2488_v23, %v9474_v9  ;;  %8872 = vmatprep.mubr.msk.f32.mxu0 %vm1714_vm8, %v5055_v20  ;;  %v11424_v27 = vrot.slane %v3606_v7, %v9474_v9  ;;  %v8190_v48 = vcombine.high %v14068_v11, %v11404_v40  ;;  %v14079_v20 = vld [vmem:[#allocation75_spill] sm:$0xff] }
 0x108   : > { %v11429_v37 = vrot.slane %v243_v28, %v9474_v9  ;;  %v11432_v58 = vrot.slane %v3623_v31, %v9474_v9  ;;  %v2197_v19 = vcombine.low %v11395_v52, %v14077_v10  ;;  %v3640_v24 = vcombine.high %v244_v55, %v244_v55 }
 0x109   : > { %14073 = vst [vmem:[#allocation9_spill] sm:$0xff] %v11420_v45  ;;  %14074 = vst [vmem:[#allocation34_spill] sm:$0xff] %v11424_v27  ;;  %v11437_v23 = vrot.slane %v244_v55, %v9474_v9  ;;  %v2249_v7 = vcombine.low %v14080_v29, %v14079_v20  ;;  %8664 = vmatmul.mubr.msk.f32.gmra.mrb[8].mxu1 %vm1714_vm8, %v14081_v22  ;;  %v11446_v28 = vcombine.low %v11401_v60, %v11420_v45  ;;  %v14084_v22 = vld [vmem:[#allocation154_spill] sm:$0xff] }
 0x10a   : > { %14075 = vst [vmem:[#allocation109_spill] sm:$0xff] %v11429_v37  ;;  %14076 = vst [vmem:[#allocation124_spill] sm:$0xff] %v11432_v58  ;;  %v11450_v31 = vcombine.high %v11424_v27, %v11424_v27  ;;  %v11454_v11 = vcombine.high %v11429_v37, %v11429_v37  ;;  %v11458_v55 = vcombine.high %v11432_v58, %v11432_v58  ;;  %8873 = vmatmul.mubr.msk.f32.gmra.mrb[22].mxu0 %vm1714_vm8, %v11413_v47 }
 0x10b   : > { %14078 = vst [vmem:[#allocation158_spill] sm:$0xff] %v11437_v23  ;;  %8666 = vmatprep.mubr.msk.f32.mxu1 %vm1714_vm8, %v14084_v22  ;;  %v5064_v29 = vrot.slane %v8190_v48, %v9474_v9  ;;  %v11466_v20 = vrot.slane %v3640_v24, %v9474_v9  ;;  %v11470_v45 = vcombine.high %v11437_v23, %v11437_v23 }
 0x10c   : > { %14082 = vst [vmem:[#allocation137_spill] sm:$0xff] %v11454_v11  ;;  %14083 = vst [vmem:[#allocation237_spill] sm:$0xff] %v11458_v55  ;;  %8875 = vmatprep.mubr.msk.f32.mxu0 %vm1714_vm8, %v11417_v43  ;;  %v5057_v60 = vcombine.low %v11424_v27, %v11450_v31  ;;  %v5073_v35 = vcombine.low %v11429_v37, %v11454_v11  ;;  %v5074_v22 = vcombine.low %v11432_v58, %v11458_v55 }
 0x10d   : > { %14085 = vst [vmem:[#allocation154_spill] sm:$0xff] %v11466_v20  ;;  %14086 = vst [vmem:[#allocation238_spill] sm:$0xff] %v11470_v45  ;;  %v3657_v48 = vcombine.high %v245_v36, %v245_v36  ;;  %v11482_v24 = vcombine.high %v11466_v20, %v11466_v20  ;;  %v5090_v33 = vcombine.low %v11437_v23, %v11470_v45  ;;  %8667 = vmatmul.mubr.msk.f32.gmra.mrb[10].mxu1 %vm1714_vm8, %v2197_v19  ;;  %v14098_v45 = vld [vmem:[#allocation188_spill] sm:$0xff] }
 0x10e   : > { %v11487_v18 = vrot.slane %v2249_v7, %v9474_v9  ;;  %v11490_v46 = vrot.slane %v245_v36, %v9474_v9  ;;  %v11494_v11 = vrot.slane %v5057_v60, %v9474_v9  ;;  %v11497_v55 = vrot.slane %v5073_v35, %v9474_v9  ;;  %8876 = vmatmul.mubr.msk.f32.gmra.mrb[24].mxu0 %vm1714_vm8, %v11446_v28  ;;  %v14093_v7 = vld [vmem:[#allocation178_spill] sm:$0xff] }
 0x10f   : > { %14087 = vst [vmem:[#allocation239_spill] sm:$0xff] %v11482_v24  ;;  %v11500_v58 = vrot.slane %v5074_v22, %v9474_v9  ;;  %v11503_v37 = vrot.slane %v3657_v48, %v9474_v9  ;;  %8669 = vmatprep.mubr.msk.f32.mxu1 %vm1714_vm8, %v14093_v7  ;;  %v5091_v19 = vcombine.low %v11466_v20, %v11482_v24  ;;  %v14097_v24 = vld [vmem:[#allocation97_spill] sm:$0xff] }
 0x110   : > { %14088 = vst [vmem:[#allocation240_spill] sm:$0xff] %v11490_v46  ;;  %14089 = vst [vmem:[#allocation241_spill] sm:$0xff] %v11494_v11  ;;  %v11512_v36 = vrot.slane %v5090_v33, %v9474_v9  ;;  %v11516_v35 = vcombine.high %v11490_v46, %v11490_v46  ;;  %v5072_v60 = vcombine.low %v5064_v29, %v11494_v11  ;;  %v14099_v29 = vld [vmem:[#allocation208_spill] sm:$0xff] }
 0x111   : > { %14090 = vst [vmem:[#allocation242_spill] sm:$0xff] %v11497_v55  ;;  %14091 = vst [vmem:[#allocation243_spill] sm:$0xff] %v11500_v58  ;;  %v5089_v22 = vcombine.low %v11497_v55, %v11500_v58  ;;  %v11523_v48 = vcombine.high %v11503_v37, %v11503_v37  ;;  %v11526_v7 = vrot.slane %v5091_v19, %v9474_v9  ;;  %8670 = vmatmul.mubr.msk.f32.gmra.mrb[12].mxu1 %vm1714_vm8, %v14098_v45  ;;  %v14100_v19 = vld [vmem:[#allocation203_spill] sm:$0xff] }
 0x112   : > { %14092 = vst [vmem:[#allocation244_spill] sm:$0xff] %v11503_v37  ;;  %14094 = vst [vmem:[#allocation178_spill] sm:$0xff] %v11516_v35  ;;  %v5107_v33 = vcombine.low %v11490_v46, %v11516_v35  ;;  %v2301_v20 = vcombine.low %v14039_v42, %v14097_v24  ;;  %8878 = vmatprep.mubr.msk.f32.mxu0 %vm1714_vm8, %v5072_v60  ;;  %v2265_v23 = vcombine.low %v11487_v18, %v14099_v29  ;;  %v14101_v24 = vld [vmem:[#allocation196_spill] sm:$0xff] }
 0x113   : > { %14095 = vst [vmem:[#allocation245_spill] sm:$0xff] %v11523_v48  ;;  %14096 = vst [vmem:[#allocation246_spill] sm:$0xff] %v11526_v7  ;;  %v5108_v58 = vcombine.low %v11503_v37, %v11523_v48  ;;  %8879 = vmatmul.mubr.msk.f32.gmra.mrb[26].mxu0 %vm1714_vm8, %v5089_v22  ;;  %8672 = vmatprep.mubr.msk.f32.mxu1 %vm1714_vm8, %v14100_v19  ;;  %v5106_v35 = vcombine.low %v11512_v36, %v11526_v7  ;;  %v14102_v42 = vld [vmem:[#allocation184_spill] sm:$0xff]  ;;  %v14103_v22 = vld [vmem:[#allocation119_spill] sm:$0xff] }
 0x114   : > { %v11545_v46 = vrot.slane %v5107_v33, %v9474_v9  ;;  %v11548_v60 = vrot.slane %v2301_v20, %v9474_v9  ;;  %v5471_v11 = vcombine.low %v14102_v42, %v14101_v24  ;;  %v5465_v37 = vcombine.low %v11328_v12, %v14103_v22  ;;  %v14104_v19 = vld [vmem:[#allocation219_spill] sm:$0xff]  ;;  %v14105_v7 = vld [vmem:[#allocation224_spill] sm:$0xff]  ;;  %v14107_v12 = vld [vmem:[#allocation146_spill] sm:$0xff] }
 0x115   : > { %v5122_v45 = vrot.slane %v5108_v58, %v9474_v9  ;;  %8881 = vmatprep.mubr.msk.f32.mxu0 %vm1714_vm8, %v5106_v35  ;;  %v5473_v55 = vcombine.low %v14099_v29, %v14104_v19  ;;  %8673 = vmatmul.mubr.msk.f32.gmra.mrb[14].mxu1 %vm1714_vm8, %v2265_v23  ;;  %v14106_v20 = vld [vmem:[#allocation143_spill] sm:$0xff]  ;;  %v14110_v29 = vld [vmem:[#allocation134_spill] sm:$0xff] }
 0x116   : > { %8675 = vmatprep.mubr.msk.f32.mxu1 %vm1714_vm8, %v14105_v7  ;;  %v2316_v58 = vcombine.low %v11201_v5, %v11548_v60  ;;  %v2369_v42 = vcombine.low %v10674_v3, %v14106_v20  ;;  %v14108_v24 = vld [vmem:[#allocation135_spill] sm:$0xff]  ;;  %v14109_v7 = vld [vmem:[#allocation121_spill] sm:$0xff]  ;;  %v14112_v22 = vld [vmem:[#allocation150_spill] sm:$0xff] }
 0x117   : > { %v5123_v33 = vcombine.low %v11545_v46, %v5122_v45  ;;  %v5467_v35 = vcombine.low %v14108_v24, %v14107_v12  ;;  %v14111_v45 = vcombine.low %v14109_v7, %v14110_v29  ;;  %v5468_v19 = vcombine.low %v14112_v22, %v11395_v52  ;;  %v14116_v12 = vld [vmem:[#allocation182_spill] sm:$0xff]  ;;  %v14117_v24 = vld [vmem:[#allocation175_spill] sm:$0xff]  ;;  %v14121_v22 = vld [vmem:[#allocation12_spill] sm:$0xff] }
 0x118   : > { %v11574_v23 = vrot.slane %v2369_v42, %v9474_v9  ;;  %v14115_v42 = vld [vmem:[#allocation185_spill] sm:$0xff]  ;;  %v14119_v7 = vld [vmem:[#allocation6_spill] sm:$0xff] }
 0x119   : > { %8882 = vmatmul.mubr.msk.f32.gmra.mrb[28].mxu0 %vm1714_vm8, %v5123_v33  ;;  %8676 = vmatmul.mubr.msk.f32.gmra.mrb[16].mxu1 %vm1714_vm8, %v11191_v6  ;;  %v14114_v33 = vld [vmem:[#allocation173_spill] sm:$0xff]  ;;  %v2436_v52 = vcombine.low %v10867_v15, %v14115_v42  ;;  %v2784_v29 = vcombine.low %v14119_v7, %v14033_v30  ;;  %v2818_v30 = vcombine.low %v14047_v59, %v14050_v49  ;;  %v14134_v59 = vld [vmem:[#allocation220_spill] sm:$0xff] }
 0x11a   : > { %8886 = vmatprep.mubr.msk.f32.mxu0 %vm1714_vm8, %v5465_v37  ;;  %8678 = vmatprep.mubr.msk.f32.mxu1 %vm1714_vm8, %v2316_v58  ;;  %v14113_v37 = vld [vmem:[#allocation115_spill] sm:$0xff]  ;;  %v5469_v6 = vcombine.low %v14077_v10, %v14114_v33  ;;  %v2384_v58 = vcombine.low %v11286_v51, %v11574_v23 }
 0x11b   : > { %v11603_v10 = vrot.slane %v2436_v52, %v9474_v9  ;;  %v14125_v52 = vld [vmem:[#allocation120_spill] sm:$0xff] }
 0x11d   : > { %8887 = vmatmul.mubr.msk.f32.vlgmr.msra.gmra.mrb[0].mxu0 %vm1714_vm8, %v14111_v45  ;;  %8679 = vmatmul.mubr.msk.f32.gmra.mrb[18].mxu1 %vm1714_vm8, %v11238_v8  ;;  %v14118_v8 = vld [vmem:[#allocation197_spill] sm:$0xff]  ;;  %v14120_v45 = vld [vmem:[#allocation3_spill] sm:$0xff] }
 0x11e   : > { %8932 = vmatpush3.msk.msra.mxu0 %vm1775_vm0, %v14113_v37  ;;  %8889 = vmatprep.mubr.msk.f32.mxu0 %vm1714_vm8, %v5467_v35  ;;  %v5470_v35 = vcombine.low %v14117_v24, %v14116_v12  ;;  %v14122_v37 = vld [vmem:[#allocation7_spill] sm:$0xff]  ;;  %v14126_v12 = vld [vmem:[#allocation132_spill] sm:$0xff] }
 0x11f   : > { %8681 = vmatprep.mubr.msk.f32.mxu1 %vm1714_vm8, %v11264_v38  ;;  %v5472_v38 = vcombine.low %v14118_v8, %v11487_v18  ;;  %v14127_v24 = vcombine.low %v14125_v52, %v14126_v12  ;;  %v14129_v18 = vld [vmem:[#allocation136_spill] sm:$0xff]  ;;  %v14130_v8 = vld [vmem:[#allocation138_spill] sm:$0xff] }
 0x120   : > { %v14131_v7 = vcombine.low %v14129_v18, %v14130_v8  ;;  %v5480_v18 = vcombine.low %v11574_v23, %v11294_v32  ;;  %v14141_v8 = vld [vmem:[#allocation15_spill] sm:$0xff]  ;;  %v11699_v32 = vld [vmem:[%s13304_s1 + $0x20] sm:$0xf] }
 0x121   : > { %8890 = vmatmul.mubr.msk.f32.gmra.mrb[2].mxu0 %vm1714_vm8, %v5468_v19  ;;  %8682 = vmatmul.mubr.msk.f32.gmra.mrb[20].mxu1 %vm1714_vm8, %v11300_v4  ;;  %v2785_v19 = vcombine.low %v14121_v22, %v14120_v45  ;;  %v14123_v4 = vld [vmem:[#allocation17_spill] sm:$0xff]  ;;  %v2452_v45 = vcombine.low %v11603_v10, %v11352_v16  ;;  %v13676_v22 = vrot.slane %v11424_v27, 7 }
 0x122   : > { %8892 = vmatprep.mubr.msk.f32.mxu0 %vm1714_vm8, %v5469_v6  ;;  %8684 = vmatprep.mubr.msk.f32.mxu1 %vm1714_vm8, %v2384_v58  ;;  %v2801_v33 = vcombine.low %v14123_v4, %v14122_v37  ;;  %v14124_v6 = vld [vmem:[#allocation18_spill] sm:$0xff]  ;;  %v2792_v37 = vrot.slane %v2784_v29, %v9474_v9  ;;  %v5476_v29 = vcombine.low %v11548_v60, %v11222_v26  ;;  %v14138_v60 = vld [vmem:[#allocation16_spill] sm:$0xff] }
 0x123   : > { %v2802_v58 = vcombine.low %v14124_v6, %v14048_v44  ;;  %v11633_v44 = vrot.slane %v14131_v7, %v9474_v9  ;;  %v2799_v4 = vrot.slane %v2785_v19, %v9474_v9  ;;  %v8086_v19 = vcombine.high %v14054_v62, %v14053_v21  ;;  %8978 = vmatprep.subr.msk.mxu0 %vm1775_vm0, %v11699_v32 }
 0x124   : > { %v11651_v52 = vrot.slane %v2801_v33, %v9474_v9  ;;  %v14136_v33 = vld [vmem:[#allocation14_spill] sm:$0xff] }
 0x125   : > { %8893 = vmatmul.mubr.msk.f32.gmra.mrb[4].mxu0 %vm1714_vm8, %v5470_v35  ;;  %v11621_v35 = vrot.slane %v14127_v24, %v9474_v9  ;;  %8685 = vmatmul.mubr.msk.f32.gmra.mrb[22].mxu1 %vm1714_vm8, %v11335_v41  ;;  %14132 = vst [vmem:[#allocation208_spill] sm:$0xff] %v11633_v44  ;;  %v11654_v12 = vrot.slane %v2802_v58, %v9474_v9  ;;  %v14137_v58 = vld [vmem:[#allocation10_spill] sm:$0xff]  ;;  %v14139_v24 = vld [vmem:[#allocation13_spill] sm:$0xff]  ;;  %v14172_v41 = vld [vmem:[#allocation48_spill] sm:$0xff] }
 0x126   : > { %8895 = vmatprep.mubr.msk.f32.mxu0 %vm1714_vm8, %v5471_v11  ;;  %v2819_v11 = vcombine.low %v14049_v13, %v14052_v63  ;;  %8687 = vmatprep.mubr.msk.f32.mxu1 %vm1714_vm8, %v11347_v54  ;;  %v14133_v13 = vld [vmem:[#allocation233_spill] sm:$0xff]  ;;  %v14135_v54 = vld [vmem:[#allocation234_spill] sm:$0xff]  ;;  %v2852_v26 = vcombine.low %v14137_v58, %v14136_v33  ;;  %v11706_v23 = vrot.slane %v8086_v19, %v9474_v9 }
 0x127   : > { %14128 = vst [vmem:[#allocation188_spill] sm:$0xff] %v11621_v35  ;;  %v5474_v63 = vcombine.low %v14134_v59, %v14133_v13  ;;  %v5475_v6 = vcombine.low %v14135_v54, %v11201_v5  ;;  %v14143_v13 = vld [vmem:[#allocation21_spill] sm:$0xff]  ;;  %v14146_v54 = vld [vmem:[#allocation26_spill] sm:$0xff]  ;;  %v11731_v58 = vcombine.high %v11404_v40, %v11404_v40  ;;  %v248_v35 = vld [vmem:[%s9479_s7 + $0x130] sm:$0xff] }
 0x128   : > { %v11666_v5 = vrot.slane %v2819_v11, %v9474_v9  ;;  %v2800_v11 = vcombine.low %v2792_v37, %v2799_v4  ;;  %v11715_v37 = vrot.slane %v2852_v26, %v9474_v9  ;;  %v14145_v4 = vld [vmem:[#allocation28_spill] sm:$0xff]  ;;  %v14151_v33 = vld [vmem:[#allocation37_spill] sm:$0xff]  ;;  %v246_v26 = vld [vmem:[%s9479_s7 + $0x120] sm:$0xff]  ;;  %v5430_v48 = vcombine.high %v248_v35, %v248_v35 }
 0x129   : > { %8896 = vmatmul.mubr.msk.f32.gmra.mrb[6].mxu0 %vm1714_vm8, %v5472_v38  ;;  %v2835_v38 = vcombine.low %v14051_v0, %v14054_v62  ;;  %8688 = vmatmul.mubr.msk.f32.gmra.mrb[24].mxu1 %vm1714_vm8, %v11360_v17  ;;  %v5477_v0 = vcombine.low %v11225_v39, %v11241_v34  ;;  %v5478_v17 = vcombine.low %v11246_v1, %v11268_v56  ;;  %v14140_v1 = vld [vmem:[#allocation20_spill] sm:$0xff] }
 0x12a   : > { %8898 = vmatprep.mubr.msk.f32.mxu0 %vm1714_vm8, %v5473_v55  ;;  %v11663_v55 = vrot.slane %v2818_v30, %v9474_v9  ;;  %8690 = vmatprep.mubr.msk.f32.mxu1 %vm1714_vm8, %v2452_v45  ;;  %v2853_v30 = vcombine.low %v14139_v24, %v14138_v60  ;;  %v5479_v62 = vcombine.low %v11283_v25, %v11286_v51  ;;  %v14142_v45 = vld [vmem:[#allocation27_spill] sm:$0xff]  ;;  %v11738_v60 = vrot.slane %v13676_v22, 2  ;;  %v14171_v22 = vld [vmem:[#allocation46_spill] sm:$0xff] }
 0x12b   : > { %v5481_v39 = vcombine.low %v11311_v50, %v11314_v53  ;;  %v2817_v56 = vcombine.low %v11651_v52, %v11654_v12  ;;  %v11690_v34 = vrot.slane %v2835_v38, %v9474_v9  ;;  %v2869_v7 = vcombine.low %v14141_v8, %v14140_v1  ;;  %v14147_v52 = vld [vmem:[#allocation32_spill] sm:$0xff]  ;;  %v14148_v12 = vld [vmem:[#allocation29_spill] sm:$0xff]  ;;  %14152 = vst [vmem:[#allocation196_spill] sm:$0xff] %v11731_v58 }
 0x12c   : > { %v2870_v25 = vcombine.low %v14143_v13, %v14142_v45  ;;  %v2834_v51 = vcombine.low %v11663_v55, %v11666_v5  ;;  %v2887_v38 = vcombine.low %v14148_v12, %v14147_v52  ;;  %v14149_v55 = vld [vmem:[#allocation35_spill] sm:$0xff]  ;;  %v14150_v5 = vld [vmem:[#allocation30_spill] sm:$0xff]  ;;  %14153 = vst [vmem:[#allocation184_spill] sm:$0xff] %v11738_v60  ;;  %v14157_v8 = vld [vmem:[#allocation40_spill] sm:$0xff] }
 0x12d   : > { %8899 = vmatmul.mubr.msk.f32.gmra.mrb[8].mxu0 %vm1714_vm8, %v5474_v63  ;;  %8691 = vmatmul.mubr.msk.f32.gmra.mrb[26].mxu1 %vm1714_vm8, %v11413_v47  ;;  %v11718_v47 = vrot.slane %v2853_v30, %v9474_v9  ;;  %v2903_v19 = vcombine.low %v14150_v5, %v14149_v55  ;;  %v14156_v30 = vld [vmem:[#allocation39_spill] sm:$0xff]  ;;  %v14158_v45 = vld [vmem:[#allocation38_spill] sm:$0xff] }
 0x12e   : > { %8901 = vmatprep.mubr.msk.f32.mxu0 %vm1714_vm8, %v5475_v6  ;;  %8693 = vmatprep.mubr.msk.f32.mxu1 %vm1714_vm8, %v11417_v43  ;;  %v2886_v6 = vcombine.low %v14146_v54, %v14145_v4  ;;  %v2904_v43 = vcombine.low %v14056_v61, %v14151_v33  ;;  %v11745_v24 = vrot.slane %v2870_v25, %v9474_v9  ;;  %v14155_v61 = vld [vmem:[#allocation36_spill] sm:$0xff]  ;;  %v14159_v54 = vld [vmem:[#allocation19_spill] sm:$0xff]  ;;  %v14161_v52 = vld [vmem:[#allocation42_spill] sm:$0xff] }
 0x12f   : > { %14144 = vst [vmem:[#allocation203_spill] sm:$0xff] %v11718_v47  ;;  %v2920_v1 = vcombine.low %v14156_v30, %v14155_v61  ;;  %v2921_v13 = vcombine.low %v14158_v45, %v14157_v8  ;;  %v2851_v4 = vcombine.low %v11690_v34, %v11706_v23  ;;  %v14162_v25 = vld [vmem:[#allocation44_spill] sm:$0xff]  ;;  %v14163_v55 = vld [vmem:[#allocation43_spill] sm:$0xff]  ;;  %v2868_v61 = vcombine.low %v11715_v37, %v11718_v47  ;;  %v14165_v8 = vld [vmem:[#allocation25_spill] sm:$0xff] }
 0x130   : > { %v2938_v33 = vcombine.low %v14163_v55, %v14162_v25  ;;  %v11765_v30 = vrot.slane %v2886_v6, %v9474_v9  ;;  %v5396_v23 = vcombine.high %v246_v26, %v246_v26  ;;  %v11771_v45 = vrot.slane %v2887_v38, %v9474_v9  ;;  %v14170_v55 = vld [vmem:[#allocation47_spill] sm:$0xff] }
 0x131   : > { %8902 = vmatmul.mubr.msk.f32.gmra.mrb[10].mxu0 %vm1714_vm8, %v5476_v29  ;;  %v11742_v29 = vrot.slane %v2869_v7, %v9474_v9  ;;  %8694 = vmatmul.mubr.msk.f32.gmra.mrb[28].mxu1 %vm1714_vm8, %v11446_v28  ;;  %v14160_v7 = vld [vmem:[#allocation41_spill] sm:$0xff]  ;;  %v14164_v28 = vld [vmem:[#allocation22_spill] sm:$0xff]  ;;  %v5487_v6 = vcombine.low %v11404_v40, %v11731_v58  ;;  %v11787_v38 = vrot.slane %v2920_v1, %v9474_v9  ;;  %v247_v34 = vld [vmem:[%s9479_s7 + $0x128] sm:$0xff] }
 0x132   : > { %8904 = vmatprep.mubr.msk.f32.mxu0 %vm1714_vm8, %v5477_v0  ;;  %v2937_v12 = vcombine.low %v14161_v52, %v14160_v7  ;;  %8698 = vmatprep.mubr.msk.f32.mxu1 %vm1714_vm8, %v2800_v11  ;;  %14166 = vst [vmem:[#allocation219_spill] sm:$0xff] %v11771_v45  ;;  %v11774_v7 = vrot.slane %v2903_v19, %v9474_v9  ;;  %v14173_v1 = vld [vmem:[#allocation23_spill] sm:$0xff] }
 0x133   : > { %14154 = vst [vmem:[#allocation119_spill] sm:$0xff] %v11742_v29  ;;  %v11777_v11 = vrot.slane %v2904_v43, %v9474_v9  ;;  %v2885_v52 = vcombine.low %v11742_v29, %v11745_v24  ;;  %v11790_v19 = vrot.slane %v2921_v13, %v9474_v9  ;;  %v11797_v25 = vrot.slane %v2938_v33, %v9474_v9  ;;  %v14182_v63 = vld [vmem:[#allocation51_spill] sm:$0xff] }
 0x134   : > { %v11794_v43 = vrot.slane %v2937_v12, %v9474_v9  ;;  %v11810_v12 = vrot.slane %v246_v26, %v9474_v9  ;;  %v11813_v33 = vrot.slane %v5396_v23, %v9474_v9  ;;  %v14179_v26 = vld [vmem:[#allocation242_spill] sm:$0xff]  ;;  %v14180_v23 = vld [vmem:[#allocation241_spill] sm:$0xff]  ;;  %v5413_v3 = vcombine.high %v247_v34, %v247_v34 }
 0x135   : > { %8905 = vmatmul.mubr.msk.f32.gmra.mrb[12].mxu0 %vm1714_vm8, %v5478_v17  ;;  %14167 = vst [vmem:[#allocation224_spill] sm:$0xff] %v11790_v19  ;;  %8699 = vmatmul.mubr.msk.f32.vlgmr.msra.gmra.mrb[0].mxu1 %vm1714_vm8, %v2817_v56  ;;  %14168 = vst [vmem:[#allocation143_spill] sm:$0xff] %v11797_v25  ;;  %v2955_v17 = vcombine.low %v14172_v41, %v14171_v22  ;;  %v14174_v56 = vld [vmem:[#allocation50_spill] sm:$0xff]  ;;  %v2902_v41 = vcombine.low %v11765_v30, %v11771_v45  ;;  %v14202_v45 = vld [vmem:[#allocation63_spill] sm:$0xff] }
 0x136   : > { %8907 = vmatprep.mubr.msk.f32.mxu0 %vm1714_vm8, %v5479_v62  ;;  %v14169_v62 = vld [vmem:[#allocation45_spill] sm:$0xff]  ;;  %8701 = vmatprep.mubr.msk.f32.mxu1 %vm1714_vm8, %v2834_v51  ;;  %v8087_v13 = vcombine.high %v14171_v22, %v14174_v56  ;;  %14175 = vst [vmem:[#allocation146_spill] sm:$0xff] %v11810_v12  ;;  %14176 = vst [vmem:[#allocation135_spill] sm:$0xff] %v11813_v33  ;;  %v2919_v51 = vcombine.low %v11774_v7, %v11777_v11  ;;  %v14203_v56 = vld [vmem:[#allocation70_spill] sm:$0xff] }
 0x137   : > { %v2954_v49 = vcombine.low %v14170_v55, %v14169_v62  ;;  %8744 = vmatpush3.msk.msra.mxu1 %vm1775_vm0, %v14173_v1  ;;  %v14177_v55 = vld [vmem:[#allocation24_spill] sm:$0xff]  ;;  %v14178_v1 = vld [vmem:[#allocation31_spill] sm:$0xff]  ;;  %v11824_v22 = vrot.slane %v5487_v6, %v9474_v9  ;;  %v14181_v62 = vld [vmem:[#allocation53_spill] sm:$0xff]  ;;  %v11835_v7 = vrot.slane %v247_v34, %v9474_v9  ;;  %v2936_v6 = vcombine.low %v11787_v38, %v11790_v19 }
 0x138   : > { %v5486_v0 = vcombine.low %v14178_v1, %v14177_v55  ;;  %v2972_v59 = vcombine.low %v14182_v63, %v14181_v62  ;;  %v2953_v50 = vcombine.low %v11794_v43, %v11797_v25  ;;  %v11850_v63 = vrot.slane %v2955_v17, %v9474_v9  ;;  %v14189_v1 = vld [vmem:[#allocation246_spill] sm:$0xff]  ;;  %v14204_v25 = vld [vmem:[#allocation68_spill] sm:$0xff]  ;;  %v14206_v19 = vld [vmem:[#allocation69_spill] sm:$0xff] }
 0x139   : > { %8908 = vmatmul.mubr.msk.f32.gmra.mrb[14].mxu0 %vm1714_vm8, %v5480_v18  ;;  %14183 = vst [vmem:[#allocation121_spill] sm:$0xff] %v11835_v7  ;;  %8702 = vmatmul.mubr.msk.f32.gmra.mrb[2].mxu1 %vm1714_vm8, %v2851_v4  ;;  %v11844_v53 = vrot.slane %v2954_v49, %v9474_v9  ;;  %v11853_v4 = vrot.slane %v8087_v13, %v9474_v9  ;;  %v14190_v55 = vld [vmem:[#allocation58_spill] sm:$0xff]  ;;  %v14191_v18 = vld [vmem:[#allocation56_spill] sm:$0xff] }
 0x13a   : > { %8910 = vmatprep.mubr.msk.f32.mxu0 %vm1714_vm8, %v5481_v39  ;;  %v14184_v39 = vld [vmem:[#allocation243_spill] sm:$0xff]  ;;  %8704 = vmatprep.mubr.msk.f32.mxu1 %vm1714_vm8, %v2868_v61  ;;  %v11857_v34 = vcombine.high %v11810_v12, %v11810_v12  ;;  %v11861_v49 = vcombine.high %v11813_v33, %v11813_v33  ;;  %v14187_v62 = vcombine.low %v11325_v57, %v11338_v2  ;;  %v14188_v61 = vld [vmem:[#allocation9_spill] sm:$0xff]  ;;  %v14201_v13 = vld [vmem:[#allocation66_spill] sm:$0xff] }
 0x13b   : > { %14185 = vst [vmem:[#allocation134_spill] sm:$0xff] %v11853_v4  ;;  %v5495_v17 = vcombine.low %v14188_v61, %v11824_v22  ;;  %v2988_v44 = vcombine.low %v14191_v18, %v14190_v55  ;;  %v14192_v29 = vcombine.low %v11341_v14, %v11603_v10  ;;  %v11878_v47 = vrot.slane %v2972_v59, %v9474_v9  ;;  %v249_v18 = vld [vmem:[%s9479_s7 + $0x138] sm:$0xff]  ;;  %v14196_v55 = vld [vmem:[#allocation59_spill] sm:$0xff]  ;;  %v14200_v61 = vld [vmem:[#allocation62_spill] sm:$0xff] }
 0x13c   : > { %14186 = vst [vmem:[#allocation150_spill] sm:$0xff] %v11861_v49  ;;  %v11881_v2 = vrot.slane %v5413_v3, %v9474_v9  ;;  %v11885_v57 = vcombine.high %v11835_v7, %v11835_v7  ;;  %v11888_v22 = vrot.slane %v248_v35, %v9474_v9  ;;  %v14197_v14 = vld [vmem:[#allocation57_spill] sm:$0xff]  ;;  %v3006_v60 = vcombine.low %v14202_v45, %v14201_v13 }
 0x13d   : > { %8911 = vmatmul.mubr.msk.f32.gmra.mrb[16].mxu0 %vm1714_vm8, %v14187_v62  ;;  %8705 = vmatmul.mubr.msk.f32.gmra.mrb[4].mxu1 %vm1714_vm8, %v2885_v52  ;;  %v2989_v10 = vcombine.low %v14197_v14, %v14196_v55  ;;  %v14199_v62 = vld [vmem:[#allocation64_spill] sm:$0xff]  ;;  %v5500_v35 = vcombine.low %v11857_v34, %v11813_v33  ;;  %v5516_v52 = vcombine.low %v11861_v49, %v11835_v7  ;;  %v14223_v7 = vld [vmem:[#allocation86_spill] sm:$0xff]  ;;  %v14224_v49 = vld [vmem:[#allocation83_spill] sm:$0xff] }
 0x13e   : > { %8913 = vmatprep.mubr.msk.f32.mxu0 %vm1714_vm8, %v14192_v29  ;;  %14193 = vst [vmem:[#allocation115_spill] sm:$0xff] %v11881_v2  ;;  %14194 = vst [vmem:[#allocation173_spill] sm:$0xff] %v11885_v57  ;;  %v14198_v29 = vld [vmem:[#allocation244_spill] sm:$0xff]  ;;  %v3005_v3 = vcombine.low %v14200_v61, %v14199_v62  ;;  %8707 = vmatprep.mubr.msk.f32.mxu1 %vm1714_vm8, %v2902_v41  ;;  %v3022_v55 = vcombine.low %v14204_v25, %v14203_v56 }
 0x13f   : > { %14195 = vst [vmem:[#allocation182_spill] sm:$0xff] %v11888_v22  ;;  %v5499_v59 = vcombine.low %v14198_v29, %v11810_v12  ;;  %v14205_v14 = vld [vmem:[#allocation76_spill] sm:$0xff]  ;;  %v14207_v62 = vcombine.low %v11352_v16, %v14159_v54  ;;  %v2970_v45 = vcombine.low %v11844_v53, %v11850_v63  ;;  %v11916_v41 = vrot.slane %v5430_v48, %v9474_v9 }
 0x140   : > { %v3023_v12 = vcombine.low %v14206_v19, %v14205_v14  ;;  %v5447_v13 = vcombine.high %v249_v18, %v249_v18  ;;  %v11919_v61 = vrot.slane %v249_v18, %v9474_v9  ;;  %v14210_v25 = vcombine.low %v14165_v8, %v14164_v28 }
 0x141   : > { %8914 = vmatmul.mubr.msk.f32.gmra.mrb[18].mxu0 %vm1714_vm8, %v14207_v62  ;;  %14208 = vst [vmem:[#allocation175_spill] sm:$0xff] %v11916_v41  ;;  %v11926_v56 = vrot.slane %v2988_v44, %v9474_v9  ;;  %v5517_v16 = vcombine.low %v11885_v57, %v11881_v2  ;;  %v11932_v54 = vcombine.high %v11881_v2, %v11881_v2  ;;  %v14222_v57 = vld [vmem:[#allocation82_spill] sm:$0xff] }
 0x142   : > { %14209 = vst [vmem:[#allocation197_spill] sm:$0xff] %v11919_v61  ;;  %8916 = vmatprep.mubr.msk.f32.mxu0 %vm1714_vm8, %v14210_v25  ;;  %v11936_v48 = vcombine.high %v11888_v22, %v11888_v22  ;;  %8708 = vmatmul.mubr.msk.f32.gmra.mrb[6].mxu1 %vm1714_vm8, %v2919_v51  ;;  %v11940_v28 = vrot.slane %v2989_v10, %v9474_v9 }
 0x143   : > { %14211 = vst [vmem:[#allocation6_spill] sm:$0xff] %v11932_v54  ;;  %v5507_v8 = vrot.slane %v5499_v59, %v9474_v9  ;;  %v11944_v44 = vrot.slane %v3005_v3, %v9474_v9  ;;  %v11947_v18 = vrot.slane %v3006_v60, %v9474_v9  ;;  %8710 = vmatprep.mubr.msk.f32.mxu1 %vm1714_vm8, %v2936_v6  ;;  %v14214_v59 = vld [vmem:[#allocation74_spill] sm:$0xff]  ;;  %v14215_v3 = vld [vmem:[#allocation75_spill] sm:$0xff] }
 0x144   : > { %14212 = vst [vmem:[#allocation3_spill] sm:$0xff] %v11936_v48  ;;  %v5514_v14 = vrot.slane %v5500_v35, %v9474_v9  ;;  %v11952_v62 = vrot.slane %v5516_v52, %v9474_v9  ;;  %v11955_v51 = vrot.slane %v3022_v55, %v9474_v9  ;;  %v11958_v10 = vrot.slane %v3023_v12, %v9474_v9  ;;  %v14219_v55 = vld [vmem:[#allocation80_spill] sm:$0xff] }
 0x145   : > { %8917 = vmatmul.mubr.msk.f32.gmra.mrb[20].mxu0 %vm1714_vm8, %v5486_v0  ;;  %v3039_v25 = vcombine.low %v14215_v3, %v14214_v59  ;;  %v11965_v60 = vcombine.high %v11916_v41, %v11916_v41  ;;  %v11968_v6 = vrot.slane %v5447_v13, %v9474_v9  ;;  %v11972_v35 = vcombine.high %v11919_v61, %v11919_v61  ;;  %v14220_v59 = vld [vmem:[#allocation77_spill] sm:$0xff] }
 0x146   : > { %14213 = vst [vmem:[#allocation12_spill] sm:$0xff] %v11958_v10  ;;  %8919 = vmatprep.mubr.msk.f32.mxu0 %vm1714_vm8, %v5495_v17  ;;  %v5531_v12 = vrot.slane %v5517_v16, %v9474_v9  ;;  %v5533_v0 = vcombine.low %v11932_v54, %v11888_v22  ;;  %v5534_v52 = vcombine.low %v11936_v48, %v11916_v41  ;;  %v14221_v17 = vld [vmem:[#allocation81_spill] sm:$0xff]  ;;  %v14227_v54 = vld [vmem:[#allocation92_spill] sm:$0xff] }
 0x147   : > { %14216 = vst [vmem:[#allocation7_spill] sm:$0xff] %v11965_v60  ;;  %14217 = vst [vmem:[#allocation17_spill] sm:$0xff] %v11968_v6  ;;  %v3040_v3 = vcombine.low %v14220_v59, %v14219_v55  ;;  %8711 = vmatmul.mubr.msk.f32.gmra.mrb[8].mxu1 %vm1714_vm8, %v2953_v50  ;;  %v2987_v13 = vcombine.low %v11853_v4, %v11878_v47  ;;  %v3004_v2 = vcombine.low %v11926_v56, %v11940_v28  ;;  %v14225_v59 = vld [vmem:[#allocation87_spill] sm:$0xff]  ;;  %v14226_v50 = vld [vmem:[#allocation88_spill] sm:$0xff] }
 0x148   : > { %14218 = vst [vmem:[#allocation18_spill] sm:$0xff] %v11972_v35  ;;  %v3056_v16 = vcombine.low %v14222_v57, %v14221_v17  ;;  %v3057_v22 = vcombine.low %v14224_v49, %v14223_v7  ;;  %8713 = vmatprep.mubr.msk.f32.mxu1 %vm1714_vm8, %v2970_v45  ;;  %v5515_v41 = vcombine.low %v5507_v8, %v5514_v14  ;;  %v14228_v4 = vld [vmem:[#allocation89_spill] sm:$0xff] }
 0x149   : > { %v3021_v55 = vcombine.low %v11944_v44, %v11947_v18  ;;  %v3073_v48 = vcombine.low %v14226_v50, %v14225_v59  ;;  %v3074_v33 = vcombine.low %v14228_v4, %v14227_v54  ;;  %v14229_v19 = vcombine.low %v14180_v23, %v14179_v26  ;;  %v14237_v17 = vld [vmem:[#allocation97_spill] sm:$0xff] }
 0x14a   : > { %v3038_v7 = vcombine.low %v11955_v51, %v11958_v10  ;;  %v12005_v49 = vrot.slane %v3039_v25, %v9474_v9  ;;  %v5550_v57 = vcombine.low %v11965_v60, %v11919_v61  ;;  %v5551_v45 = vcombine.low %v11972_v35, %v11968_v6  ;;  %v14248_v10 = vld [vmem:[#allocation111_spill] sm:$0xff]  ;;  %v14251_v35 = vld [vmem:[#allocation130_spill] sm:$0xff] }
 0x14b   : > { %8920 = vmatmul.mubr.msk.f32.gmra.mrb[22].mxu0 %vm1714_vm8, %v14229_v19  ;;  %v14231_v4 = vcombine.low %v14184_v39, %v11512_v36  ;;  %v5532_v26 = vcombine.low %v11952_v62, %v5531_v12  ;;  %v5541_v19 = vrot.slane %v5533_v0, %v9474_v9  ;;  %v5548_v23 = vrot.slane %v5534_v52, %v9474_v9  ;;  %v14235_v36 = vld [vmem:[#allocation93_spill] sm:$0xff]  ;;  %v14236_v39 = vld [vmem:[#allocation94_spill] sm:$0xff]  ;;  %v14254_v61 = vld [vmem:[#allocation123_spill] sm:$0xff] }
 0x14c   : > { %14230 = vst [vmem:[#allocation120_spill] sm:$0xff] %v12005_v49  ;;  %v12019_v54 = vrot.slane %v3040_v3, %v9474_v9  ;;  %8714 = vmatmul.mubr.msk.f32.gmra.mrb[10].mxu1 %vm1714_vm8, %v2987_v13  ;;  %v12023_v8 = vrot.slane %v3056_v16, %v9474_v9  ;;  %v12026_v14 = vrot.slane %v3057_v22, %v9474_v9  ;;  %v14240_v52 = vld [vmem:[#allocation101_spill] sm:$0xff]  ;;  %v14241_v3 = vld [vmem:[#allocation98_spill] sm:$0xff]  ;;  %v14242_v16 = vld [vmem:[#allocation108_spill] sm:$0xff] }
 0x14d   : > { %8922 = vmatprep.mubr.msk.f32.mxu0 %vm1714_vm8, %v14231_v4  ;;  %v3090_v25 = vcombine.low %v14236_v39, %v14235_v36  ;;  %v8088_v62 = vcombine.high %v14235_v36, %v14237_v17  ;;  %8716 = vmatprep.mubr.msk.f32.mxu1 %vm1714_vm8, %v3004_v2  ;;  %v12034_v12 = vrot.slane %v3073_v48, %v9474_v9  ;;  %v14243_v22 = vld [vmem:[#allocation99_spill] sm:$0xff]  ;;  %v14245_v48 = vld [vmem:[#allocation116_spill] sm:$0xff]  ;;  %v14246_v36 = vld [vmem:[#allocation113_spill] sm:$0xff] }
 0x14e   : > { %14232 = vst [vmem:[#allocation132_spill] sm:$0xff] %v12019_v54  ;;  %14233 = vst [vmem:[#allocation136_spill] sm:$0xff] %v12023_v8  ;;  %v12037_v0 = vrot.slane %v3074_v33, %v9474_v9  ;;  %v3107_v13 = vcombine.low %v14241_v3, %v14240_v52  ;;  %v3108_v59 = vcombine.low %v14243_v22, %v14242_v16  ;;  %v14247_v33 = vld [vmem:[#allocation114_spill] sm:$0xff]  ;;  %v14250_v16 = vld [vmem:[#allocation49_spill] sm:$0xff] }
 0x14f   : > { %14234 = vst [vmem:[#allocation138_spill] sm:$0xff] %v12026_v14  ;;  %14238 = vst [vmem:[#allocation233_spill] sm:$0xff] %v12034_v12  ;;  %v14244_v50 = vcombine.low %v14189_v1, %v11545_v46  ;;  %v5558_v4 = vrot.slane %v5550_v57, %v9474_v9  ;;  %v5565_v2 = vrot.slane %v5551_v45, %v9474_v9  ;;  %v14249_v3 = vld [vmem:[#allocation54_spill] sm:$0xff]  ;;  %v14252_v46 = vld [vmem:[#allocation125_spill] sm:$0xff] }
 0x150   : > { %14239 = vst [vmem:[#allocation220_spill] sm:$0xff] %v12037_v0  ;;  %v3124_v39 = vcombine.low %v14246_v36, %v14245_v48  ;;  %v3125_v17 = vcombine.low %v14248_v10, %v14247_v33  ;;  %v5549_v52 = vcombine.low %v5541_v19, %v5548_v23  ;;  %v5924_v22 = vcombine.low %v14250_v16, %v14249_v3  ;;  %v14258_v23 = vld [vmem:[#allocation61_spill] sm:$0xff]  ;;  %v12093_v3 = vld [vmem:[%s13304_s1 + $0x10] sm:$0xf]  ;;  %v14314_v6 = vld [vmem:[#allocation102_spill] sm:$0xff] }
 0x151   : > { %8923 = vmatmul.mubr.msk.f32.gmra.mrb[24].mxu0 %vm1714_vm8, %v14244_v50  ;;  %v3141_v1 = vcombine.low %v14252_v46, %v14251_v35  ;;  %v14253_v50 = vld [vmem:[#allocation128_spill] sm:$0xff]  ;;  %8717 = vmatmul.mubr.msk.f32.gmra.mrb[12].mxu1 %vm1714_vm8, %v3021_v55  ;;  %v3055_v45 = vcombine.low %v12005_v49, %v12019_v54  ;;  %v3072_v10 = vcombine.low %v12023_v8, %v12026_v14  ;;  %v14268_v46 = vld [vmem:[#allocation71_spill] sm:$0xff]  ;;  %v14279_v54 = vld [vmem:[#allocation161_spill] sm:$0xff] }
 0x152   : > { %8925 = vmatprep.mubr.msk.f32.mxu0 %vm1714_vm8, %v5515_v41  ;;  %v3142_v57 = vcombine.low %v14254_v61, %v14253_v50  ;;  %v12066_v41 = vrot.slane %v3090_v25, %v9474_v9  ;;  %v12069_v19 = vrot.slane %v8088_v62, %v9474_v9  ;;  %8719 = vmatprep.mubr.msk.f32.mxu1 %vm1714_vm8, %v3038_v7  ;;  %v14257_v61 = vld [vmem:[#allocation65_spill] sm:$0xff]  ;;  %v14269_v50 = vld [vmem:[#allocation67_spill] sm:$0xff]  ;;  %v14277_v14 = vld [vmem:[#allocation156_spill] sm:$0xff] }
 0x153   : > { %v3089_v35 = vcombine.low %v12034_v12, %v12037_v0  ;;  %v5926_v55 = vcombine.low %v14258_v23, %v14257_v61  ;;  %v12077_v48 = vrot.slane %v3107_v13, %v9474_v9  ;;  %v12080_v36 = vrot.slane %v3108_v59, %v9474_v9  ;;  %9025 = vmatprep.subr.msk.mxu1 %vm1775_vm0, %v12093_v3  ;;  %v14265_v59 = vld [vmem:[#allocation141_spill] sm:$0xff]  ;;  %v14270_v61 = vld [vmem:[#allocation78_spill] sm:$0xff]  ;;  %v14272_v25 = vld [vmem:[#allocation151_spill] sm:$0xff] }
 0x154   : > { %14255 = vst [vmem:[#allocation234_spill] sm:$0xff] %v12066_v41  ;;  %14256 = vst [vmem:[#allocation14_spill] sm:$0xff] %v12069_v19  ;;  %v5566_v62 = vcombine.low %v5558_v4, %v5565_v2  ;;  %v12085_v33 = vrot.slane %v3124_v39, %v9474_v9  ;;  %v12088_v7 = vrot.slane %v3125_v17, %v9474_v9  ;;  %v14266_v4 = vld [vmem:[#allocation127_spill] sm:$0xff]  ;;  %v14267_v2 = vld [vmem:[#allocation140_spill] sm:$0xff] }
 0x155   : > { %14259 = vst [vmem:[#allocation10_spill] sm:$0xff] %v12077_v48  ;;  %14260 = vst [vmem:[#allocation16_spill] sm:$0xff] %v12080_v36  ;;  %8926 = vmatmul.mubr.msk.f32.gmra.mrb[26].mxu0 %vm1714_vm8, %v5532_v26  ;;  %v12099_v13 = vrot.slane %v3141_v1, %v9474_v9  ;;  %v12102_v26 = vrot.slane %v3142_v57, %v9474_v9  ;;  %v3158_v17 = vcombine.low %v14266_v4, %v14265_v59  ;;  %v14271_v1 = vld [vmem:[#allocation72_spill] sm:$0xff]  ;;  %v14273_v57 = vld [vmem:[#allocation147_spill] sm:$0xff] }
 0x156   : > { %14261 = vst [vmem:[#allocation13_spill] sm:$0xff] %v12085_v33  ;;  %14262 = vst [vmem:[#allocation20_spill] sm:$0xff] %v12088_v7  ;;  %8928 = vmatprep.mubr.msk.f32.mxu0 %vm1714_vm8, %v5549_v52  ;;  %v3159_v39 = vcombine.low %v14106_v20, %v14267_v2  ;;  %8720 = vmatmul.mubr.msk.f32.gmra.mrb[14].mxu1 %vm1714_vm8, %v3055_v45  ;;  %v3106_v16 = vcombine.low %v12066_v41, %v12069_v19  ;;  %v14274_v20 = vld [vmem:[#allocation84_spill] sm:$0xff]  ;;  %v14275_v2 = vld [vmem:[#allocation79_spill] sm:$0xff] }
 0x157   : > { %14263 = vst [vmem:[#allocation15_spill] sm:$0xff] %v12099_v13  ;;  %14264 = vst [vmem:[#allocation27_spill] sm:$0xff] %v12102_v26  ;;  %v5927_v52 = vcombine.low %v14269_v50, %v14268_v46  ;;  %v5928_v23 = vcombine.low %v14271_v1, %v14270_v61  ;;  %v3175_v0 = vcombine.low %v14273_v57, %v14272_v25  ;;  %8722 = vmatprep.mubr.msk.f32.mxu1 %vm1714_vm8, %v3072_v10  ;;  %v14276_v4 = vld [vmem:[#allocation152_spill] sm:$0xff]  ;;  %v14278_v12 = vld [vmem:[#allocation162_spill] sm:$0xff] }
 0x158   : > { %v3123_v59 = vcombine.low %v12077_v48, %v12080_v36  ;;  %v3176_v41 = vcombine.low %v14277_v14, %v14276_v4  ;;  %v3192_v46 = vcombine.low %v14279_v54, %v14278_v12  ;;  %v14280_v50 = vld [vmem:[#allocation90_spill] sm:$0xff]  ;;  %v14281_v61 = vld [vmem:[#allocation85_spill] sm:$0xff]  ;;  %v14282_v25 = vld [vmem:[#allocation164_spill] sm:$0xff]  ;;  %v3140_v14 = vcombine.low %v12085_v33, %v12088_v7 }
 0x159   : > { %8929 = vmatmul.mubr.msk.f32.gmra.mrb[28].mxu0 %vm1714_vm8, %v5566_v62  ;;  %v14283_v57 = vld [vmem:[#allocation165_spill] sm:$0xff]  ;;  %v14284_v8 = vld [vmem:[#allocation176_spill] sm:$0xff]  ;;  %v14285_v49 = vld [vmem:[#allocation170_spill] sm:$0xff]  ;;  %v3157_v54 = vcombine.low %v12099_v13, %v12102_v26  ;;  %v12141_v12 = vrot.slane %v3158_v17, %v9474_v9  ;;  %v12144_v62 = vrot.slane %v3159_v39, %v9474_v9  ;;  %v8089_v4 = vcombine.high %v10867_v15, %v14115_v42 }
 0x15a   : > { %v3193_v10 = vcombine.low %v14283_v57, %v14282_v25  ;;  %v3209_v36 = vcombine.low %v14285_v49, %v14284_v8  ;;  %v14286_v19 = vld [vmem:[#allocation180_spill] sm:$0xff]  ;;  %8933 = vmatprep.mubr.msk.f32.mxu0 %vm1714_vm8, %v5924_v22  ;;  %8723 = vmatmul.mubr.msk.f32.gmra.mrb[16].mxu1 %vm1714_vm8, %v3089_v35  ;;  %v12148_v49 = vrot.slane %v3175_v0, %v9474_v9  ;;  %v14290_v8 = vld [vmem:[#allocation95_spill] sm:$0xff]  ;;  %v14297_v0 = vld [vmem:[#allocation198_spill] sm:$0xff] }
 0x15b   : > { %v3210_v45 = vcombine.low %v14286_v19, %v10867_v15  ;;  %14287 = vst [vmem:[#allocation21_spill] sm:$0xff] %v12141_v12  ;;  %14288 = vst [vmem:[#allocation28_spill] sm:$0xff] %v12144_v62  ;;  %v14291_v19 = vld [vmem:[#allocation91_spill] sm:$0xff]  ;;  %v14292_v25 = vld [vmem:[#allocation192_spill] sm:$0xff]  ;;  %8725 = vmatprep.mubr.msk.f32.mxu1 %vm1714_vm8, %v3106_v16  ;;  %v12158_v17 = vrot.slane %v3176_v41, %v9474_v9  ;;  %v12161_v39 = vrot.slane %v3192_v46, %v9474_v9 }
 0x15c   : > { %14289 = vst [vmem:[#allocation26_spill] sm:$0xff] %v12148_v49  ;;  %v14293_v57 = vld [vmem:[#allocation187_spill] sm:$0xff]  ;;  %v14296_v35 = vld [vmem:[#allocation204_spill] sm:$0xff]  ;;  %v14298_v13 = vld [vmem:[#allocation205_spill] sm:$0xff]  ;;  %v12175_v41 = vrot.slane %v3209_v36, %v9474_v9 }
 0x15d   : > { %v3227_v1 = vcombine.low %v14293_v57, %v14292_v25  ;;  %14294 = vst [vmem:[#allocation32_spill] sm:$0xff] %v12158_v17  ;;  %14295 = vst [vmem:[#allocation29_spill] sm:$0xff] %v12161_v39  ;;  %v3243_v7 = vcombine.low %v14297_v0, %v14296_v35  ;;  %v14299_v33 = vld [vmem:[#allocation201_spill] sm:$0xff]  ;;  %v14300_v26 = vld [vmem:[#allocation55_spill] sm:$0xff]  ;;  %v12172_v25 = vrot.slane %v3193_v10, %v9474_v9 }
 0x15e   : > { %v3244_v22 = vcombine.low %v14299_v33, %v14298_v13  ;;  %v14301_v48 = vld [vmem:[#allocation60_spill] sm:$0xff]  ;;  %14304 = vst [vmem:[#allocation30_spill] sm:$0xff] %v12175_v41  ;;  %v12178_v16 = vrot.slane %v3210_v45, %v9474_v9  ;;  %v14306_v46 = vld [vmem:[#allocation214_spill] sm:$0xff]  ;;  %v14307_v57 = vld [vmem:[#allocation211_spill] sm:$0xff]  ;;  %v4136_v45 = vrot.slane %v11731_v58, 7  ;;  %8726 = vmatmul.mubr.msk.f32.gmra.mrb[18].mxu1 %vm1714_vm8, %v3123_v59  ;;  %v3191_v59 = vcombine.low %v12148_v49, %v12158_v17 }
 0x15f   : > { %v14302_v15 = vcombine.low %v14300_v26, %v14301_v48  ;;  %14303 = vst [vmem:[#allocation35_spill] sm:$0xff] %v12172_v25  ;;  %v3260_v35 = vcombine.low %v14307_v57, %v14306_v46  ;;  %v14308_v48 = vld [vmem:[#allocation217_spill] sm:$0xff]  ;;  %v14313_v36 = vld [vmem:[#allocation222_spill] sm:$0xff]  ;;  %v14315_v46 = vld [vmem:[#allocation96_spill] sm:$0xff]  ;;  %8728 = vmatprep.mubr.msk.f32.mxu1 %vm1714_vm8, %v3140_v14 }
 0x160   : > { %14305 = vst [vmem:[#allocation37_spill] sm:$0xff] %v12178_v16  ;;  %v14309_v33 = vld [vmem:[#allocation213_spill] sm:$0xff]  ;;  %v5932_v57 = vcombine.low %v14315_v46, %v14314_v6  ;;  %v12212_v6 = vrot.slane %v3244_v22, %v9474_v9  ;;  %v14321_v14 = vld [vmem:[#allocation104_spill] sm:$0xff]  ;;  %v14323_v46 = vld [vmem:[#allocation106_spill] sm:$0xff] }
 0x161   : > { %8934 = vmatmul.mubr.msk.f32.vlgmr.msra.gmra.mrb[0].mxu0 %vm1714_vm8, %v14302_v15  ;;  %v3261_v13 = vcombine.low %v14309_v33, %v14308_v48  ;;  %v14310_v26 = vld [vmem:[#allocation225_spill] sm:$0xff]  ;;  %v14312_v15 = vld [vmem:[#allocation226_spill] sm:$0xff]  ;;  %v14318_v48 = vld [vmem:[#allocation11_spill] sm:$0xff] }
 0x162   : > { %8979 = vmatpush3.msk.msra.mxu0 %vm1775_vm0, %v11699_v32  ;;  %8936 = vmatprep.mubr.msk.f32.mxu0 %vm1714_vm8, %v5926_v55  ;;  %v14311_v10 = vld [vmem:[#allocation221_spill] sm:$0xff]  ;;  %v3278_v42 = vcombine.low %v14313_v36, %v14312_v15  ;;  %v12196_v32 = vrot.slane %v8089_v4, %v9474_v9  ;;  %v12199_v55 = vrot.slane %v3227_v1, %v9474_v9  ;;  %v14322_v4 = vld [vmem:[#allocation103_spill] sm:$0xff]  ;;  %v14357_v60 = vld [vmem:[#allocation158_spill] sm:$0xff] }
 0x163   : > { %v3277_v0 = vcombine.low %v14311_v10, %v14310_v26  ;;  %v3675_v33 = vcombine.low %v14053_v21, %v14318_v48  ;;  %v3174_v26 = vcombine.low %v12141_v12, %v12144_v62  ;;  %v12209_v10 = vrot.slane %v3243_v7, %v9474_v9  ;;  %14320 = vst [vmem:[#allocation38_spill] sm:$0xff] %v12212_v6  ;;  %v14324_v48 = vld [vmem:[#allocation105_spill] sm:$0xff]  ;;  %v14334_v17 = vld [vmem:[#allocation155_spill] sm:$0xff] }
 0x164   : > { %14316 = vst [vmem:[#allocation36_spill] sm:$0xff] %v12196_v32  ;;  %14317 = vst [vmem:[#allocation39_spill] sm:$0xff] %v12199_v55  ;;  %v3208_v1 = vcombine.low %v12161_v39, %v12172_v25  ;;  %v3225_v21 = vcombine.low %v12175_v41, %v12178_v16  ;;  %v5933_v15 = vcombine.low %v14322_v4, %v14321_v14  ;;  %8729 = vmatmul.mubr.msk.f32.gmra.mrb[20].mxu1 %vm1714_vm8, %v3157_v54  ;;  %v14328_v4 = vld [vmem:[#allocation110_spill] sm:$0xff]  ;;  %v14333_v41 = vld [vmem:[#allocation131_spill] sm:$0xff] }
 0x165   : > { %14319 = vst [vmem:[#allocation40_spill] sm:$0xff] %v12209_v10  ;;  %8937 = vmatmul.mubr.msk.f32.gmra.mrb[2].mxu0 %vm1714_vm8, %v5927_v52  ;;  %v5934_v58 = vcombine.low %v14324_v48, %v14323_v46  ;;  %v12225_v7 = vrot.slane %v3260_v35, %v9474_v9  ;;  %v12228_v22 = vrot.slane %v3261_v13, %v9474_v9  ;;  %v14329_v46 = vld [vmem:[#allocation107_spill] sm:$0xff]  ;;  %v14330_v48 = vld [vmem:[#allocation129_spill] sm:$0xff]  ;;  %v14335_v39 = vld [vmem:[#allocation144_spill] sm:$0xff] }
 0x166   : > { %8939 = vmatprep.mubr.msk.f32.mxu0 %vm1714_vm8, %v5928_v23  ;;  %v12231_v52 = vrot.slane %v3277_v0, %v9474_v9  ;;  %v12234_v36 = vrot.slane %v3278_v42, %v9474_v9  ;;  %v3242_v14 = vcombine.low %v12196_v32, %v12199_v55  ;;  %v14331_v35 = vld [vmem:[#allocation117_spill] sm:$0xff]  ;;  %v12244_v13 = vrot.slane %v3675_v33, %v9474_v9  ;;  %v14332_v0 = vld [vmem:[#allocation142_spill] sm:$0xff]  ;;  %v14338_v33 = vld [vmem:[#allocation167_spill] sm:$0xff] }
 0x167   : > { %14325 = vst [vmem:[#allocation19_spill] sm:$0xff] %v12225_v7  ;;  %14326 = vst [vmem:[#allocation41_spill] sm:$0xff] %v12228_v22  ;;  %8731 = vmatprep.mubr.msk.f32.mxu1 %vm1714_vm8, %v3174_v26  ;;  %v3259_v42 = vcombine.low %v12209_v10, %v12212_v6  ;;  %v14336_v62 = vld [vmem:[#allocation109_spill] sm:$0xff]  ;;  %v14337_v23 = vcombine.low %v14275_v2, %v14274_v20  ;;  %v14339_v25 = vld [vmem:[#allocation159_spill] sm:$0xff]  ;;  %v4138_v26 = vrot.slane %v4136_v45, 2 }
 0x168   : > { %14327 = vst [vmem:[#allocation42_spill] sm:$0xff] %v12234_v36  ;;  %v4145_v49 = vrot.slane %v14336_v62, 7  ;;  %v14340_v32 = vld [vmem:[#allocation137_spill] sm:$0xff]  ;;  %v14341_v6 = vld [vmem:[#allocation124_spill] sm:$0xff]  ;;  %v14342_v54 = vcombine.low %v14281_v61, %v14280_v50  ;;  %v3276_v55 = vcombine.low %v12225_v7, %v12228_v22  ;;  %8732 = vmatmul.mubr.msk.f32.gmra.mrb[22].mxu1 %vm1714_vm8, %v3191_v59  ;;  %v12285_v2 = vcombine.low %v11777_v11, %v11787_v38  ;;  %v14363_v7 = vld [vmem:[#allocation206_spill] sm:$0xff] }
 0x169   : > { %8940 = vmatmul.mubr.msk.f32.gmra.mrb[4].mxu0 %vm1714_vm8, %v14337_v23  ;;  %v4148_v12 = vrot.slane %v14340_v32, 7  ;;  %v4151_v10 = vrot.slane %v14341_v6, 7  ;;  %v14343_v23 = vld [vmem:[#allocation237_spill] sm:$0xff]  ;;  %8734 = vmatprep.mubr.msk.f32.mxu1 %vm1714_vm8, %v3208_v1  ;;  %v14350_v59 = vrot.slane %v11404_v40, 9  ;;  %v14353_v61 = vrot.slane %v11450_v31, 7  ;;  %v14360_v22 = vld [vmem:[#allocation224_spill] sm:$0xff] }
 0x16a   : > { %8942 = vmatprep.mubr.msk.f32.mxu0 %vm1714_vm8, %v14342_v54  ;;  %v4154_v16 = vrot.slane %v14343_v23, 7  ;;  %v14345_v50 = vld [vmem:[#allocation169_spill] sm:$0xff]  ;;  %14349 = vst [vmem:[#allocation44_spill] sm:$0xff] %v12285_v2  ;;  %v4147_v6 = vrot.slane %v4145_v49, 2  ;;  %v14355_v1 = vrot.slane %v11424_v27, 7  ;;  %v14365_v40 = vld [vmem:[#allocation52_spill] sm:$0xff] }
 0x16b   : > { %v14346_v54 = vld [vmem:[#allocation33_spill] sm:$0xff]  ;;  %v12291_v32 = vsel %vm9511_vm7, %v14350_v59, %v4136_v45  ;;  %v4144_v23 = vrot.slane %v14353_v61, 2  ;;  %v4150_v38 = vrot.slane %v4148_v12, 2  ;;  %v4157_v45 = vrot.slane %v14357_v60, 7  ;;  %v14366_v59 = vld [vmem:[#allocation50_spill] sm:$0xff] }
 0x16c   : > { %v3686_v62 = vcombine.low %v14150_v5, %v14346_v54  ;;  %14352 = vst [vmem:[#allocation43_spill] sm:$0xff] %v12291_v32  ;;  %v14354_v5 = vcombine.low %v14291_v19, %v14290_v8  ;;  %v12303_v11 = vsel %vm9511_vm7, %v4138_v26, %v14355_v1  ;;  %v4153_v54 = vrot.slane %v4151_v10, 2  ;;  %8735 = vmatmul.mubr.msk.f32.gmra.mrb[24].mxu1 %vm1714_vm8, %v3225_v21  ;;  %v14362_v1 = vld [vmem:[#allocation215_spill] sm:$0xff]  ;;  %v14446_v20 = vld [vmem:[#allocation37_spill] sm:$0xff] }
 0x16d   : > { %14356 = vst [vmem:[#allocation22_spill] sm:$0xff] %v12303_v11  ;;  %v12311_v8 = vcombine.low %v14360_v22, %v11794_v43  ;;  %v4156_v19 = vrot.slane %v4154_v16, 2  ;;  %v3698_v61 = vcombine.low %v14366_v59, %v14365_v40  ;;  %8737 = vmatprep.mubr.msk.f32.mxu1 %vm1714_vm8, %v3242_v14  ;;  %v5946_v43 = vcombine.low %v12291_v32, %v12303_v11  ;;  %v14368_v22 = vld [vmem:[#allocation184_spill] sm:$0xff]  ;;  %v14378_v11 = vld [vmem:[#allocation235_spill] sm:$0xff] }
 0x16e   : > { %8943 = vmatmul.mubr.msk.f32.gmra.mrb[6].mxu0 %vm1714_vm8, %v14354_v5  ;;  %v14361_v5 = vld [vmem:[#allocation238_spill] sm:$0xff]  ;;  %v12316_v26 = vrot.slane %v3686_v62, %v9474_v9  ;;  %v14367_v21 = vrot.slane %v11450_v31, 7  ;;  %v12338_v60 = vsel %vm9511_vm7, %v4144_v23, %v4145_v49  ;;  %v12347_v40 = vsel %vm9511_vm7, %v4150_v38, %v4151_v10  ;;  %v14375_v23 = vld [vmem:[#allocation240_spill] sm:$0xff]  ;;  %v14376_v10 = vld [vmem:[#allocation229_spill] sm:$0xff] }
 0x16f   : > { %8945 = vmatprep.mubr.msk.f32.mxu0 %vm1714_vm8, %v5932_v57  ;;  %v4160_v27 = vrot.slane %v14361_v5, 7  ;;  %v14364_v57 = vld [vmem:[#allocation143_spill] sm:$0xff]  ;;  %14369 = vst [vmem:[#allocation25_spill] sm:$0xff] %v12338_v60  ;;  %14370 = vst [vmem:[#allocation45_spill] sm:$0xff] %v12347_v40  ;;  %v12351_v14 = vsel %vm9511_vm7, %v4153_v54, %v4154_v16  ;;  %v4159_v59 = vrot.slane %v4157_v45, 2  ;;  %v12357_v49 = vsel %vm9511_vm7, %v4156_v19, %v4157_v45  ;;  %v14377_v38 = vld [vmem:[#allocation216_spill] sm:$0xff] }
 0x170   : > { %v12322_v2 = vcombine.low %v14364_v57, %v11844_v53  ;;  %v12334_v62 = vsel %vm9511_vm7, %v14368_v22, %v14367_v21  ;;  %v12342_v53 = vsel %vm9511_vm7, %v4147_v6, %v4148_v12  ;;  %14371 = vst [vmem:[#allocation47_spill] sm:$0xff] %v12351_v14  ;;  %v14372_v57 = vld [vmem:[#allocation154_spill] sm:$0xff]  ;;  %14373 = vst [vmem:[#allocation46_spill] sm:$0xff] %v12357_v49  ;;  %v14374_v6 = vld [vmem:[#allocation239_spill] sm:$0xff]  ;;  %v4169_v22 = vrot.slane %v14375_v23, 7 }
 0x171   : > { %v4163_v21 = vrot.slane %v14372_v57, 7  ;;  %v4162_v12 = vrot.slane %v4160_v27, 2  ;;  %8738 = vmatmul.mubr.msk.f32.gmra.mrb[26].mxu1 %vm1714_vm8, %v3259_v42  ;;  %v12365_v54 = vrot.slane %v3698_v61, %v9474_v9  ;;  %v14379_v32 = vld [vmem:[#allocation231_spill] sm:$0xff]  ;;  %v14380_v5 = vld [vmem:[#allocation178_spill] sm:$0xff]  ;;  %v12378_v42 = vrot.slane %v5946_v43, %v9474_v9 }
 0x172   : > { %8946 = vmatmul.mubr.msk.f32.gmra.mrb[8].mxu0 %vm1714_vm8, %v5933_v15  ;;  %v4166_v15 = vrot.slane %v14374_v6, 7  ;;  %v4172_v57 = vrot.slane %v14380_v5, 7  ;;  %8740 = vmatprep.mubr.msk.f32.mxu1 %vm1714_vm8, %v3276_v55  ;;  %v14381_v45 = vld [vmem:[#allocation219_spill] sm:$0xff]  ;;  %v12375_v6 = vcombine.low %v11878_v47, %v11926_v56  ;;  %v5955_v61 = vcombine.low %v12334_v62, %v12338_v60  ;;  %v14428_v60 = vld [vmem:[#allocation18_spill] sm:$0xff] }
 0x173   : > { %8948 = vmatprep.mubr.msk.f32.mxu0 %vm1714_vm8, %v5934_v58  ;;  %v3694_v19 = vcombine.low %v14381_v45, %v12316_v26  ;;  %v14382_v58 = vcombine.low %v14329_v46, %v14328_v4  ;;  %v5956_v55 = vcombine.low %v12342_v53, %v12347_v40  ;;  %v12390_v26 = vsel %vm9511_vm7, %v4159_v59, %v4160_v27  ;;  %v14389_v59 = vld [vmem:[#allocation73_spill] sm:$0xff] }
 0x174   : > { %14383 = vst [vmem:[#allocation48_spill] sm:$0xff] %v12390_v26  ;;  %v5972_v47 = vcombine.low %v12351_v14, %v12357_v49  ;;  %v4165_v56 = vrot.slane %v4163_v21, 2  ;;  %v14384_v43 = vcombine.low %v14331_v35, %v14330_v48  ;;  %v12400_v4 = vsel %vm9511_vm7, %v4162_v12, %v4163_v21  ;;  %v14426_v40 = vld [vmem:[#allocation17_spill] sm:$0xff] }
 0x175   : > { %14385 = vst [vmem:[#allocation23_spill] sm:$0xff] %v12400_v4  ;;  %v4168_v46 = vrot.slane %v4166_v15, 2  ;;  %v4175_v45 = vrot.slane %v14198_v29, 7  ;;  %v14386_v27 = vcombine.low %v12231_v52, %v12234_v36  ;;  %v12411_v48 = vcombine.low %v11940_v28, %v11944_v44  ;;  %v14390_v36 = vld [vmem:[#allocation69_spill] sm:$0xff]  ;;  %v14391_v44 = vld [vmem:[#allocation135_spill] sm:$0xff] }
 0x176   : > { %8949 = vmatmul.mubr.msk.f32.gmra.mrb[10].mxu0 %vm1714_vm8, %v14382_v58  ;;  %v4171_v58 = vrot.slane %v4169_v22, 2  ;;  %v12415_v35 = vcombine.low %v11947_v18, %v11955_v51  ;;  %v4174_v21 = vrot.slane %v4172_v57, 2  ;;  %v14387_v12 = vcombine.low %v12244_v13, %v11715_v37 }
 0x177   : > { %8951 = vmatprep.mubr.msk.f32.mxu0 %vm1714_vm8, %v14384_v43  ;;  %8741 = vmatmul.mubr.msk.f32.gmra.mrb[28].mxu1 %vm1714_vm8, %v14386_v27  ;;  %v14388_v43 = vld [vmem:[#allocation236_spill] sm:$0xff]  ;;  %v12424_v16 = vrot.slane %v5955_v61, %v9474_v9  ;;  %v3710_v28 = vcombine.low %v14390_v36, %v14389_v59  ;;  %v5881_v49 = vrot.slane %v14391_v44, 7  ;;  %v14392_v18 = vcombine.low %v14333_v41, %v14332_v0  ;;  %v14408_v27 = vld [vmem:[#allocation6_spill] sm:$0xff] }
 0x178   : > { %8745 = vmatprep.mubr.msk.f32.mxu1 %vm1714_vm8, %v14387_v12  ;;  %v12434_v37 = vrot.slane %v5956_v55, %v9474_v9  ;;  %v5973_v51 = vcombine.low %v12390_v26, %v12400_v4  ;;  %v12439_v13 = vrot.slane %v5972_v47, %v9474_v9  ;;  %v12443_v61 = vsel %vm9511_vm7, %v4165_v56, %v4166_v15  ;;  %v14397_v47 = vld [vmem:[#allocation146_spill] sm:$0xff]  ;;  %v14398_v12 = vld [vmem:[#allocation203_spill] sm:$0xff] }
 0x179   : > { %14393 = vst [vmem:[#allocation24_spill] sm:$0xff] %v12443_v61  ;;  %v14394_v36 = vcombine.low %v14335_v39, %v14334_v17  ;;  %v12451_v41 = vsel %vm9511_vm7, %v4168_v46, %v4169_v22  ;;  %v12455_v0 = vsel %vm9511_vm7, %v4171_v58, %v4172_v57  ;;  %v4177_v55 = vrot.slane %v4175_v45, 2  ;;  %v14403_v56 = vld [vmem:[#allocation150_spill] sm:$0xff] }
 0x17a   : > { %8952 = vmatmul.mubr.msk.f32.gmra.mrb[12].mxu0 %vm1714_vm8, %v14392_v18  ;;  %14395 = vst [vmem:[#allocation31_spill] sm:$0xff] %v12451_v41  ;;  %14396 = vst [vmem:[#allocation242_spill] sm:$0xff] %v12455_v0  ;;  %v8254_v59 = vrot.slane %v14397_v47, 9  ;;  %v14399_v18 = vld [vmem:[#allocation119_spill] sm:$0xff]  ;;  %v12464_v17 = vsel %vm9511_vm7, %v4174_v21, %v4175_v45  ;;  %v14402_v39 = vrot.slane %v11857_v34, 7  ;;  %v5884_v46 = vrot.slane %v14403_v56, 7 }
 0x17b   : > { %8954 = vmatprep.mubr.msk.f32.mxu0 %vm1714_vm8, %v14394_v36  ;;  %v14400_v15 = vcombine.low %v14398_v12, %v14399_v18  ;;  %14401 = vst [vmem:[#allocation241_spill] sm:$0xff] %v12464_v17  ;;  %v14404_v36 = vld [vmem:[#allocation121_spill] sm:$0xff]  ;;  %v14405_v58 = vcombine.low %v11745_v24, %v11765_v30  ;;  %v5883_v12 = vrot.slane %v5881_v49, 2  ;;  %v14407_v45 = vld [vmem:[#allocation115_spill] sm:$0xff]  ;;  %v5896_v44 = vrot.slane %v14408_v27, 7  ;;  %v14410_v24 = vld [vmem:[#allocation182_spill] sm:$0xff] }
 0x17c   : > { %v5880_v22 = vrot.slane %v14402_v39, 2  ;;  %v5887_v57 = vrot.slane %v14404_v36, 7  ;;  %v14406_v18 = vld [vmem:[#allocation173_spill] sm:$0xff]  ;;  %v5893_v21 = vrot.slane %v14407_v45, 7  ;;  %v14409_v39 = vcombine.low %v14339_v25, %v14338_v33  ;;  %v14419_v27 = vld [vmem:[#allocation179_spill] sm:$0xff] }
 0x17d   : > { %8746 = vmatmul.mubr.msk.f32.vlgmr.msra.gmra.mrb[0].mxu1 %vm1714_vm8, %v14400_v15  ;;  %v5890_v15 = vrot.slane %v14406_v18, 7  ;;  %v12484_v36 = vrot.slane %v3710_v28, %v9474_v9  ;;  %v5899_v30 = vrot.slane %v14410_v24, 7  ;;  %v14413_v18 = vld [vmem:[#allocation177_spill] sm:$0xff]  ;;  %v12494_v45 = vrot.slane %v5973_v51, %v9474_v9 }
 0x17e   : > { %8748 = vmatprep.mubr.msk.f32.mxu1 %vm1714_vm8, %v14405_v58  ;;  %9026 = vmatpush3.msk.msra.mxu1 %vm1775_vm0, %v12093_v3  ;;  %v14411_v58 = vld [vmem:[#allocation3_spill] sm:$0xff]  ;;  %v14414_v4 = vcombine.low %v14345_v50, %v14413_v18  ;;  %v5989_v25 = vcombine.low %v12443_v61, %v12451_v41  ;;  %v5990_v33 = vcombine.low %v12455_v0, %v12464_v17  ;;  %v14415_v28 = vrot.slane %v11857_v34, 7  ;;  %v14423_v0 = vld [vmem:[#allocation194_spill] sm:$0xff] }
 0x17f   : > { %8955 = vmatmul.mubr.msk.f32.gmra.mrb[14].mxu0 %vm1714_vm8, %v14409_v39  ;;  %v5902_v56 = vrot.slane %v14411_v58, 7  ;;  %v14412_v3 = vld [vmem:[#allocation175_spill] sm:$0xff]  ;;  %v5882_v51 = vsel %vm9511_vm7, %v5880_v22, %v5881_v49  ;;  %v5886_v18 = vrot.slane %v5884_v46, 2  ;;  %v5889_v24 = vrot.slane %v5887_v57, 2  ;;  %v14418_v58 = vld [vmem:[#allocation44_spill] sm:$0xff]  ;;  %v14424_v61 = vld [vmem:[#allocation202_spill] sm:$0xff] }
 0x180   : > { %v5905_v47 = vrot.slane %v14412_v3, 7  ;;  %8957 = vmatprep.mubr.msk.f32.mxu0 %vm1714_vm8, %v14414_v4  ;;  %v5879_v39 = vsel %vm9511_vm7, %v8254_v59, %v14415_v28  ;;  %v14416_v3 = vld [vmem:[#allocation245_spill] sm:$0xff]  ;;  %v5885_v34 = vsel %vm9511_vm7, %v5883_v12, %v5884_v46  ;;  %v5892_v59 = vrot.slane %v5890_v15, 2  ;;  %v14422_v49 = vld [vmem:[#allocation7_spill] sm:$0xff] }
 0x181   : > { %8749 = vmatmul.mubr.msk.f32.gmra.mrb[2].mxu1 %vm1714_vm8, %v3694_v19  ;;  %v14417_v50 = vrot.slane %v14416_v3, 7  ;;  %v5895_v28 = vrot.slane %v5893_v21, 2  ;;  %v5898_v19 = vrot.slane %v5896_v44, 2  ;;  %v14420_v3 = vld [vmem:[#allocation191_spill] sm:$0xff]  ;;  %v5908_v22 = vrot.slane %v14422_v49, 7  ;;  %v14427_v12 = vld [vmem:[#allocation197_spill] sm:$0xff] }
 0x182   : > { %8751 = vmatprep.mubr.msk.f32.mxu1 %vm1714_vm8, %v14418_v58  ;;  %v14421_v17 = vcombine.low %v14419_v27, %v14420_v3  ;;  %v5907_v41 = vrot.slane %v5905_v47, 2  ;;  %v14425_v26 = vcombine.low %v14423_v0, %v14424_v61  ;;  %v12528_v46 = vcombine.high %v14426_v40, %v14426_v40 }
 0x183   : > { %v12509_v4 = vsel %vm9511_vm7, %v4177_v55, %v14417_v50  ;;  %v5901_v55 = vrot.slane %v5899_v30, 2  ;;  %v5904_v50 = vrot.slane %v5902_v56, 2  ;;  %v5911_v14 = vrot.slane %v14427_v12, 7 }
 0x184   : > { %8958 = vmatmul.mubr.msk.f32.gmra.mrb[16].mxu0 %vm1714_vm8, %v14421_v17  ;;  %v5914_v27 = vrot.slane %v14428_v60, 7  ;;  %v5917_v17 = vrot.slane %v14426_v40, 7  ;;  %v6006_v3 = vcombine.low %v12509_v4, %v5879_v39  ;;  %v6007_v49 = vcombine.low %v5882_v51, %v5885_v34  ;;  %v14429_v39 = vld [vmem:[#allocation10_spill] sm:$0xff] }
 0x185   : > { %8960 = vmatprep.mubr.msk.f32.mxu0 %vm1714_vm8, %v14425_v26  ;;  %8752 = vmatmul.mubr.msk.f32.gmra.mrb[4].mxu1 %vm1714_vm8, %v12311_v8  ;;  %v5888_v61 = vsel %vm9511_vm7, %v5886_v18, %v5887_v57  ;;  %v5891_v26 = vsel %vm9511_vm7, %v5889_v24, %v5890_v15  ;;  %v5894_v0 = vsel %vm9511_vm7, %v5892_v59, %v5893_v21  ;;  %v14430_v51 = vld [vmem:[#allocation14_spill] sm:$0xff]  ;;  %v5910_v24 = vrot.slane %v5908_v22, 2 }
 0x186   : > { %8754 = vmatprep.mubr.msk.f32.mxu1 %vm1714_vm8, %v12322_v2  ;;  %v5897_v40 = vsel %vm9511_vm7, %v5895_v28, %v5896_v44  ;;  %v5900_v12 = vsel %vm9511_vm7, %v5898_v19, %v5899_v30  ;;  %v6386_v34 = vcombine.low %v14430_v51, %v14429_v39  ;;  %v14431_v57 = vcombine.low %v14363_v7, %v14362_v1 }
 0x187   : > { %v5903_v15 = vsel %vm9511_vm7, %v5901_v55, %v5902_v56  ;;  %v5906_v21 = vsel %vm9511_vm7, %v5904_v50, %v5905_v47  ;;  %v5909_v44 = vsel %vm9511_vm7, %v5907_v41, %v5908_v22  ;;  %v14432_v30 = vcombine.low %v14377_v38, %v14376_v10  ;;  %v14434_v55 = vld [vmem:[#allocation21_spill] sm:$0xff]  ;;  %v14435_v50 = vld [vmem:[#allocation27_spill] sm:$0xff] }
 0x188   : > { %8961 = vmatmul.mubr.msk.f32.gmra.mrb[18].mxu0 %vm1714_vm8, %v14431_v57  ;;  %v5913_v18 = vrot.slane %v5911_v14, 2  ;;  %v5916_v59 = vrot.slane %v5914_v27, 2  ;;  %v5919_v7 = vrot.slane %v5917_v17, 2  ;;  %v5920_v1 = vrot.slane %v12528_v46, 7 }
 0x189   : > { %8963 = vmatprep.mubr.msk.f32.mxu0 %vm1714_vm8, %v14432_v30  ;;  %v14433_v56 = vcombine.low %v11850_v63, %v12365_v54  ;;  %v5971_v47 = vcombine.low %v12424_v16, %v12434_v37  ;;  %v5988_v41 = vcombine.low %v12439_v13, %v12494_v45  ;;  %v5997_v10 = vrot.slane %v5989_v25, %v9474_v9  ;;  %v14437_v25 = vld [vmem:[#allocation208_spill] sm:$0xff] }
 0x18a   : > { %v6004_v38 = vrot.slane %v5990_v33, %v9474_v9  ;;  %v6014_v28 = vrot.slane %v6006_v3, %v9474_v9  ;;  %v6021_v19 = vrot.slane %v6007_v49, %v9474_v9  ;;  %v6023_v54 = vcombine.low %v5888_v61, %v5891_v26  ;;  %v14438_v33 = vld [vmem:[#allocation188_spill] sm:$0xff] }
 0x18b   : > { %8755 = vmatmul.mubr.msk.f32.gmra.mrb[6].mxu1 %vm1714_vm8, %v14433_v56  ;;  %v6387_v22 = vcombine.low %v14435_v50, %v14434_v55  ;;  %v14436_v16 = vcombine.low %v14379_v32, %v14378_v11  ;;  %v6024_v37 = vcombine.low %v5894_v0, %v5897_v40  ;;  %v6040_v13 = vcombine.low %v5900_v12, %v5903_v15  ;;  %v14440_v40 = vld [vmem:[#allocation120_spill] sm:$0xff]  ;;  %v14442_v12 = vld [vmem:[#allocation97_spill] sm:$0xff]  ;;  %v14448_v56 = vld [vmem:[#allocation138_spill] sm:$0xff] }
 0x18c   : > { %8757 = vmatprep.mubr.msk.f32.mxu1 %vm1714_vm8, %v12375_v6  ;;  %v6041_v45 = vcombine.low %v5906_v21, %v5909_v44  ;;  %v4487_v57 = vcombine.low %v14438_v33, %v14437_v25  ;;  %v14439_v3 = vcombine.low %v14388_v43, %v12378_v42  ;;  %v5912_v49 = vsel %vm9511_vm7, %v5910_v24, %v5911_v14  ;;  %v14441_v43 = vld [vmem:[#allocation100_spill] sm:$0xff]  ;;  %v14513_v55 = vld [vmem:[#allocation210_spill] sm:$0xff] }
 0x18d   : > { %8964 = vmatmul.mubr.msk.f32.gmra.mrb[20].mxu0 %vm1714_vm8, %v14436_v16  ;;  %v5915_v61 = vsel %vm9511_vm7, %v5913_v18, %v5914_v27  ;;  %v5918_v32 = vsel %vm9511_vm7, %v5916_v59, %v5917_v17  ;;  %v5921_v11 = vsel %vm9511_vm7, %v5919_v7, %v5920_v1  ;;  %v3718_v42 = vcombine.low %v12484_v36, %v14440_v40  ;;  %v14443_v27 = vld [vmem:[#allocation136_spill] sm:$0xff]  ;;  %v14447_v1 = vld [vmem:[#allocation233_spill] sm:$0xff] }
 0x18e   : > { %8966 = vmatprep.mubr.msk.f32.mxu0 %vm1714_vm8, %v14439_v3  ;;  %v3722_v26 = vcombine.low %v14442_v12, %v14441_v43  ;;  %v6005_v14 = vcombine.low %v5997_v10, %v6004_v38  ;;  %v14444_v0 = vld [vmem:[#allocation132_spill] sm:$0xff]  ;;  %v6031_v44 = vrot.slane %v6023_v54, %v9474_v9  ;;  %v6038_v36 = vrot.slane %v6024_v37, %v9474_v9  ;;  %v14449_v38 = vld [vmem:[#allocation234_spill] sm:$0xff]  ;;  %v14455_v12 = vld [vmem:[#allocation15_spill] sm:$0xff] }
 0x18f   : > { %8758 = vmatmul.mubr.msk.f32.gmra.mrb[8].mxu1 %vm1714_vm8, %v12411_v48  ;;  %v12609_v15 = vcombine.low %v14444_v0, %v14443_v27  ;;  %v14445_v17 = vld [vmem:[#allocation36_spill] sm:$0xff]  ;;  %v6057_v24 = vcombine.low %v5912_v49, %v5915_v61  ;;  %v6058_v30 = vcombine.low %v5918_v32, %v5921_v11  ;;  %v6022_v18 = vcombine.low %v6014_v28, %v6021_v19  ;;  %v14452_v28 = vld [vmem:[#allocation127_spill] sm:$0xff]  ;;  %v14453_v61 = vld [vmem:[#allocation13_spill] sm:$0xff] }
 0x190   : > { %8760 = vmatprep.mubr.msk.f32.mxu1 %vm1714_vm8, %v12415_v35  ;;  %v6388_v21 = vcombine.low %v14446_v20, %v14445_v17  ;;  %v6048_v59 = vrot.slane %v6040_v13, %v9474_v9  ;;  %v6055_v7 = vrot.slane %v6041_v45, %v9474_v9  ;;  %v12622_v10 = vcombine.low %v14448_v56, %v14447_v1  ;;  %v14450_v54 = vld [vmem:[#allocation220_spill] sm:$0xff]  ;;  %v14457_v0 = vld [vmem:[#allocation189_spill] sm:$0xff] }
 0x191   : > { %8967 = vmatmul.mubr.msk.f32.gmra.mrb[22].mxu0 %vm1714_vm8, %v5971_v47  ;;  %v3729_v47 = vrot.slane %v3722_v26, %v9474_v9  ;;  %v12629_v16 = vcombine.low %v14450_v54, %v14449_v38  ;;  %v6039_v37 = vcombine.low %v6031_v44, %v6038_v36  ;;  %v6065_v13 = vrot.slane %v6057_v24, %v9474_v9  ;;  %v14454_v32 = vld [vmem:[#allocation16_spill] sm:$0xff]  ;;  %v14458_v44 = vld [vmem:[#allocation185_spill] sm:$0xff]  ;;  %v14459_v24 = vld [vmem:[#allocation26_spill] sm:$0xff] }
 0x192   : > { %8969 = vmatprep.mubr.msk.f32.mxu0 %vm1714_vm8, %v5988_v41  ;;  %v14451_v41 = vld [vmem:[#allocation139_spill] sm:$0xff]  ;;  %v6072_v45 = vrot.slane %v6058_v30, %v9474_v9  ;;  %v6056_v3 = vcombine.low %v6048_v59, %v6055_v7  ;;  %v12644_v11 = vcombine.low %v14454_v32, %v14453_v61  ;;  %v14456_v26 = vld [vmem:[#allocation20_spill] sm:$0xff]  ;;  %v3745_v36 = vcombine.low %v14458_v44, %v14457_v0  ;;  %v14461_v59 = vld [vmem:[#allocation29_spill] sm:$0xff] }
 0x193   : > { %8761 = vmatmul.mubr.msk.f32.gmra.mrb[10].mxu1 %vm1714_vm8, %v3718_v42  ;;  %v3733_v19 = vcombine.low %v14452_v28, %v14451_v41  ;;  %v3730_v49 = vcombine.low %v3729_v47, %v14429_v39  ;;  %v14460_v30 = vld [vmem:[#allocation28_spill] sm:$0xff]  ;;  %v14463_v47 = vld [vmem:[#allocation134_spill] sm:$0xff]  ;;  %v14465_v54 = vld [vmem:[#allocation35_spill] sm:$0xff] }
 0x194   : > { %8763 = vmatprep.mubr.msk.f32.mxu1 %vm1714_vm8, %v12609_v15  ;;  %v6073_v43 = vcombine.low %v6065_v13, %v6072_v45  ;;  %v14462_v7 = vld [vmem:[#allocation32_spill] sm:$0xff]  ;;  %v3752_v56 = vrot.slane %v3745_v36, %v9474_v9  ;;  %v14464_v38 = vld [vmem:[#allocation30_spill] sm:$0xff]  ;;  %v14472_v61 = vld [vmem:[#allocation39_spill] sm:$0xff] }
 0x195   : > { %8970 = vmatmul.mubr.msk.f32.gmra.mrb[24].mxu0 %vm1714_vm8, %v6005_v14  ;;  %v3740_v42 = vrot.slane %v3733_v19, %v9474_v9  ;;  %v12652_v14 = vcombine.low %v14456_v26, %v14455_v12  ;;  %v12671_v1 = vcombine.low %v14462_v7, %v14461_v59  ;;  %v12684_v41 = vcombine.low %v14465_v54, %v14464_v38  ;;  %v14466_v19 = vld [vmem:[#allocation4_spill] sm:$0xff]  ;;  %v14468_v13 = vld [vmem:[#allocation34_spill] sm:$0xff]  ;;  %v14478_v36 = vld [vmem:[#allocation237_spill] sm:$0xff] }
 0x196   : > { %8972 = vmatprep.mubr.msk.f32.mxu0 %vm1714_vm8, %v6022_v18  ;;  %v12666_v18 = vcombine.low %v14460_v30, %v14459_v24  ;;  %v3753_v28 = vcombine.low %v14446_v20, %v3752_v56  ;;  %v14475_v26 = vld [vmem:[#allocation124_spill] sm:$0xff]  ;;  %v14477_v44 = vld [vmem:[#allocation158_spill] sm:$0xff] }
 0x197   : > { %8764 = vmatmul.mubr.msk.f32.gmra.mrb[12].mxu1 %vm1714_vm8, %v12622_v10  ;;  %v3741_v27 = vcombine.low %v14435_v50, %v3740_v42  ;;  %v14473_v42 = vld [vmem:[#allocation19_spill] sm:$0xff]  ;;  %v3791_v24 = vcombine.low %v14478_v36, %v14477_v44  ;;  %v14479_v30 = vld [vmem:[#allocation154_spill] sm:$0xff]  ;;  %v14481_v56 = vld [vmem:[#allocation12_spill] sm:$0xff] }
 0x198   : > { %8766 = vmatprep.mubr.msk.f32.mxu1 %vm1714_vm8, %v12629_v16  ;;  %v14480_v59 = vld [vmem:[#allocation238_spill] sm:$0xff] }
 0x199   : > { %8973 = vmatmul.mubr.msk.f32.gmra.mrb[26].mxu0 %vm1714_vm8, %v6039_v37  ;;  %v3792_v7 = vcombine.low %v14480_v59, %v14479_v30  ;;  %v14493_v30 = vld [vmem:[#allocation153_spill] sm:$0xff] }
 0x19a   : > { %8975 = vmatprep.mubr.msk.f32.mxu0 %vm1714_vm8, %v6056_v3 }
 0x19b   : > { %8767 = vmatmul.mubr.msk.f32.gmra.mrb[14].mxu1 %vm1714_vm8, %v3730_v49  ;;  %v14471_v49 = vld [vmem:[#allocation40_spill] sm:$0xff] }
 0x19c   : > { %8769 = vmatprep.mubr.msk.f32.mxu1 %vm1714_vm8, %v12644_v11  ;;  %v12702_v32 = vcombine.low %v14472_v61, %v14471_v49 }
 0x19d   : > { %8976 = vmatmul.mubr.msk.f32.gmra.mrb[28].mxu0 %vm1714_vm8, %v6073_v43  ;;  %v14474_v43 = vld [vmem:[#allocation38_spill] sm:$0xff] }
 0x19e   : > { %8980 = vmatprep.mubr.msk.f32.mxu0 %vm1714_vm8, %v14418_v58  ;;  %v6384_v58 = vcombine.low %v11850_v63, %v14463_v47  ;;  %v14469_v63 = vld [vmem:[#allocation196_spill] sm:$0xff]  ;;  %v12706_v12 = vcombine.low %v14474_v43, %v14473_v42  ;;  %v6385_v47 = vcombine.low %v14481_v56, %v14440_v40  ;;  %v3809_v40 = vcombine.low %v14380_v5, %v14198_v29 }
 0x19f   : > { %8770 = vmatmul.mubr.msk.f32.gmra.mrb[16].mxu1 %vm1714_vm8, %v12652_v14  ;;  %v3758_v45 = vcombine.low %v14469_v63, %v14468_v13  ;;  %v3799_v13 = vrot.slane %v3791_v24, %v9474_v9  ;;  %v3806_v63 = vrot.slane %v3792_v7, %v9474_v9  ;;  %v14492_v24 = vld [vmem:[#allocation157_spill] sm:$0xff]  ;;  %v14494_v7 = vld [vmem:[#allocation163_spill] sm:$0xff]  ;;  %v14495_v56 = vld [vmem:[#allocation160_spill] sm:$0xff] }
 0x1a0   : > { %8772 = vmatprep.mubr.msk.f32.mxu1 %vm1714_vm8, %v3741_v27  ;;  %v14476_v27 = vld [vmem:[#allocation137_spill] sm:$0xff]  ;;  %v3823_v49 = vrot.slane %v3809_v40, %v9474_v9  ;;  %v4505_v59 = vcombine.low %v14493_v30, %v14492_v24  ;;  %v14499_v40 = vld [vmem:[#allocation171_spill] sm:$0xff]  ;;  %v14510_v24 = vld [vmem:[#allocation212_spill] sm:$0xff] }
 0x1a1   : > { %8981 = vmatmul.mubr.msk.f32.vlgmr.msra.gmra.mrb[0].mxu0 %vm1714_vm8, %v12311_v8  ;;  %v14467_v8 = vld [vmem:[#allocation222_spill] sm:$0xff]  ;;  %v3775_v0 = vcombine.low %v14476_v27, %v14475_v26  ;;  %v12757_v42 = vcombine.low %v3799_v13, %v3806_v63  ;;  %v14488_v26 = vld [vmem:[#allocation145_spill] sm:$0xff]  ;;  %v14503_v63 = vld [vmem:[#allocation183_spill] sm:$0xff] }
 0x1a2   : > { %8983 = vmatprep.mubr.msk.f32.mxu0 %vm1714_vm8, %v12322_v2  ;;  %v3757_v37 = vcombine.low %v14467_v8, %v14466_v19  ;;  %v14470_v2 = vld [vmem:[#allocation109_spill] sm:$0xff]  ;;  %v14483_v19 = vld [vmem:[#allocation239_spill] sm:$0xff]  ;;  %v14484_v8 = vld [vmem:[#allocation118_spill] sm:$0xff] }
 0x1a3   : > { %8773 = vmatmul.mubr.msk.f32.gmra.mrb[18].mxu1 %vm1714_vm8, %v12666_v18  ;;  %v3774_v3 = vcombine.low %v11450_v31, %v14470_v2  ;;  %v12713_v31 = vrot.slane %v3758_v45, %v9474_v9  ;;  %v14486_v45 = vld [vmem:[#allocation126_spill] sm:$0xff]  ;;  %v14489_v27 = vld [vmem:[#allocation133_spill] sm:$0xff] }
 0x1a4   : > { %8775 = vmatprep.mubr.msk.f32.mxu1 %vm1714_vm8, %v12671_v1  ;;  %v14487_v2 = vld [vmem:[#allocation122_spill] sm:$0xff]  ;;  %v14511_v30 = vld [vmem:[#allocation209_spill] sm:$0xff] }
 0x1a5   : > { %8984 = vmatmul.mubr.msk.f32.gmra.mrb[2].mxu0 %vm1714_vm8, %v6384_v58  ;;  %v14482_v58 = vld [vmem:[#allocation41_spill] sm:$0xff]  ;;  %v3782_v54 = vrot.slane %v3774_v3, %v9474_v9  ;;  %v4455_v3 = vcombine.low %v14487_v2, %v14486_v45  ;;  %v14502_v13 = vld [vmem:[#allocation186_spill] sm:$0xff]  ;;  %v4513_v2 = vrot.slane %v4505_v59, %v9474_v9  ;;  %v4574_v59 = vcombine.low %v14511_v30, %v14510_v24  ;;  %v14533_v30 = vld [vmem:[#allocation135_spill] sm:$0xff] }
 0x1a6   : > { %8986 = vmatprep.mubr.msk.f32.mxu0 %vm1714_vm8, %v12375_v6  ;;  %v3765_v6 = vrot.slane %v3757_v37, %v9474_v9  ;;  %v12727_v38 = vcombine.low %v14482_v58, %v12231_v52  ;;  %v14485_v37 = vld [vmem:[#allocation112_spill] sm:$0xff]  ;;  %v4540_v45 = vcombine.low %v14503_v63, %v14502_v13  ;;  %v14522_v63 = vld [vmem:[#allocation22_spill] sm:$0xff] }
 0x1a7   : > { %8776 = vmatmul.mubr.msk.f32.gmra.mrb[20].mxu1 %vm1714_vm8, %v12684_v41  ;;  %v4469_v43 = vrot.slane %v4455_v3, %v9474_v9  ;;  %v14496_v58 = vld [vmem:[#allocation168_spill] sm:$0xff]  ;;  %v14532_v24 = vld [vmem:[#allocation150_spill] sm:$0xff] }
 0x1a8   : > { %8778 = vmatprep.mubr.msk.f32.mxu1 %vm1714_vm8, %v3753_v28  ;;  %v3789_v28 = vrot.slane %v3775_v0, %v9474_v9  ;;  %v3773_v52 = vcombine.low %v3765_v6, %v12713_v31  ;;  %v14490_v0 = vld [vmem:[#allocation149_spill] sm:$0xff]  ;;  %v14491_v6 = vld [vmem:[#allocation148_spill] sm:$0xff] }
 0x1a9   : > { %8987 = vmatmul.mubr.msk.f32.gmra.mrb[4].mxu0 %vm1714_vm8, %v12411_v48  ;;  %v3808_v48 = vcombine.low %v14483_v19, %v14375_v23  ;;  %v4489_v44 = vcombine.low %v14491_v6, %v14490_v0  ;;  %v14508_v0 = vld [vmem:[#allocation207_spill] sm:$0xff]  ;;  %v14509_v6 = vld [vmem:[#allocation200_spill] sm:$0xff] }
 0x1aa   : > { %8989 = vmatprep.mubr.msk.f32.mxu0 %vm1714_vm8, %v12415_v35  ;;  %v4454_v35 = vcombine.low %v14485_v37, %v14484_v8  ;;  %v12751_v5 = vcombine.low %v3782_v54, %v3789_v28  ;;  %v14497_v54 = vld [vmem:[#allocation166_spill] sm:$0xff]  ;;  %v14500_v37 = vld [vmem:[#allocation181_spill] sm:$0xff] }
 0x1ab   : > { %8779 = vmatmul.mubr.msk.f32.gmra.mrb[22].mxu1 %vm1714_vm8, %v12702_v32  ;;  %v3816_v23 = vrot.slane %v3808_v48, %v9474_v9  ;;  %v4522_v28 = vcombine.low %v14497_v54, %v14496_v58  ;;  %v4503_v19 = vrot.slane %v4489_v44, %v9474_v9  ;;  %v14498_v48 = vld [vmem:[#allocation172_spill] sm:$0xff]  ;;  %v4573_v44 = vcombine.low %v14509_v6, %v14508_v0  ;;  %v14531_v6 = vld [vmem:[#allocation146_spill] sm:$0xff] }
 0x1ac   : > { %8781 = vmatprep.mubr.msk.f32.mxu1 %vm1714_vm8, %v12706_v12  ;;  %v4462_v61 = vrot.slane %v4454_v35, %v9474_v9  ;;  %v4523_v8 = vcombine.low %v14499_v40, %v14498_v48  ;;  %v14501_v35 = vld [vmem:[#allocation174_spill] sm:$0xff]  ;;  %v14517_v48 = vld [vmem:[#allocation228_spill] sm:$0xff] }
 0x1ad   : > { %8990 = vmatmul.mubr.msk.f32.gmra.mrb[6].mxu0 %vm1714_vm8, %v6385_v47  ;;  %v12770_v36 = vcombine.low %v3816_v23, %v3823_v49  ;;  %v4506_v47 = vcombine.low %v14495_v56, %v14494_v7  ;;  %v4530_v39 = vrot.slane %v4522_v28, %v9474_v9  ;;  %v14505_v23 = vld [vmem:[#allocation190_spill] sm:$0xff]  ;;  %v14515_v56 = vld [vmem:[#allocation223_spill] sm:$0xff]  ;;  %v4581_v33 = vrot.slane %v4573_v44, %v9474_v9 }
 0x1ae   : > { %8992 = vmatprep.mubr.msk.f32.mxu0 %vm1714_vm8, %v12609_v15  ;;  %v4488_v15 = vcombine.low %v14489_v27, %v14488_v26  ;;  %v14512_v7 = vld [vmem:[#allocation218_spill] sm:$0xff]  ;;  %v8288_v44 = vcombine.high %v14198_v29, %v14531_v6 }
 0x1af   : > { %8782 = vmatmul.mubr.msk.f32.gmra.mrb[24].mxu1 %vm1714_vm8, %v12727_v38  ;;  %v4520_v3 = vrot.slane %v4506_v47, %v9474_v9  ;;  %v4590_v50 = vcombine.low %v14513_v55, %v14512_v7  ;;  %v14535_v55 = vld [vmem:[#allocation31_spill] sm:$0xff] }
 0x1b0   : > { %8784 = vmatprep.mubr.msk.f32.mxu1 %vm1714_vm8, %v3773_v52  ;;  %v4539_v52 = vcombine.low %v14501_v35, %v14500_v37  ;;  %v14519_v37 = vld [vmem:[#allocation2_spill] sm:$0xff]  ;;  %v14520_v35 = vld [vmem:[#allocation43_spill] sm:$0xff] }
 0x1b1   : > { %8993 = vmatmul.mubr.msk.f32.gmra.mrb[8].mxu0 %vm1714_vm8, %v12622_v10  ;;  %v4470_v10 = vcombine.low %v4462_v61, %v4469_v43  ;;  %v14506_v61 = vld [vmem:[#allocation199_spill] sm:$0xff] }
 0x1b2   : > { %8995 = vmatprep.mubr.msk.f32.mxu0 %vm1714_vm8, %v12629_v16  ;;  %v4496_v16 = vrot.slane %v4488_v15, %v9474_v9  ;;  %v14507_v43 = vld [vmem:[#allocation195_spill] sm:$0xff]  ;;  %v4547_v27 = vrot.slane %v4539_v52, %v9474_v9  ;;  %v4554_v15 = vrot.slane %v4540_v45, %v9474_v9  ;;  %v14521_v52 = vld [vmem:[#allocation232_spill] sm:$0xff]  ;;  %v4625_v45 = vcombine.low %v14522_v63, %v12334_v62 }
 0x1b3   : > { %8785 = vmatmul.mubr.msk.f32.gmra.mrb[26].mxu1 %vm1714_vm8, %v12751_v5  ;;  %v4557_v26 = vcombine.low %v14507_v43, %v14506_v61  ;;  %v4624_v13 = vcombine.low %v14521_v52, %v14520_v35  ;;  %v14524_v62 = vld [vmem:[#allocation47_spill] sm:$0xff] }
 0x1b4   : > { %8787 = vmatprep.mubr.msk.f32.mxu1 %vm1714_vm8, %v12757_v42  ;;  %v4504_v51 = vcombine.low %v4496_v16, %v4503_v19  ;;  %v4555_v25 = vcombine.low %v4547_v27, %v4554_v15  ;;  %v14516_v19 = vld [vmem:[#allocation230_spill] sm:$0xff]  ;;  %v4639_v20 = vrot.slane %v4625_v45, %v9474_v9  ;;  %v14529_v43 = vld [vmem:[#allocation23_spill] sm:$0xff]  ;;  %v14546_v45 = vld [vmem:[#allocation17_spill] sm:$0xff] }
 0x1b5   : > { %8996 = vmatmul.mubr.msk.f32.gmra.mrb[10].mxu0 %vm1714_vm8, %v6386_v34  ;;  %v4537_v34 = vrot.slane %v4523_v8, %v9474_v9  ;;  %v4571_v28 = vrot.slane %v4557_v26, %v9474_v9  ;;  %v4607_v40 = vcombine.low %v14517_v48, %v14516_v19  ;;  %v14518_v8 = vld [vmem:[#allocation5_spill] sm:$0xff]  ;;  %v4632_v17 = vrot.slane %v4624_v13, %v9474_v9  ;;  %v14530_v27 = vld [vmem:[#allocation42_spill] sm:$0xff]  ;;  %v14543_v48 = vld [vmem:[#allocation7_spill] sm:$0xff] }
 0x1b6   : > { %8998 = vmatprep.mubr.msk.f32.mxu0 %vm1714_vm8, %v12644_v11  ;;  %v14504_v11 = vld [vmem:[#allocation193_spill] sm:$0xff]  ;;  %v6389_v15 = vcombine.low %v14530_v27, %v12713_v31 }
 0x1b7   : > { %8788 = vmatmul.mubr.msk.f32.gmra.mrb[28].mxu1 %vm1714_vm8, %v12770_v36  ;;  %v4556_v49 = vcombine.low %v14505_v23, %v14504_v11  ;;  %v4538_v58 = vcombine.low %v4530_v39, %v4537_v34  ;;  %v4615_v34 = vrot.slane %v4607_v40, %v9474_v9  ;;  %v14525_v23 = vld [vmem:[#allocation45_spill] sm:$0xff]  ;;  %v4640_v31 = vcombine.low %v4632_v17, %v4639_v20  ;;  %v14544_v40 = vld [vmem:[#allocation175_spill] sm:$0xff] }
 0x1b8   : > { %8816 = vmatprep.mubr.msk.f32.mxu1 %vm1714_vm8, %v4470_v10  ;;  %v4598_v10 = vrot.slane %v4590_v50, %v9474_v9  ;;  %v14545_v13 = vld [vmem:[#allocation197_spill] sm:$0xff] }
 0x1b9   : > { %8999 = vmatmul.mubr.msk.f32.gmra.mrb[12].mxu0 %vm1714_vm8, %v12652_v14  ;;  %v4521_v14 = vcombine.low %v4513_v2, %v4520_v3  ;;  %v4564_v54 = vrot.slane %v4556_v49, %v9474_v9  ;;  %v14523_v3 = vld [vmem:[#allocation25_spill] sm:$0xff]  ;;  %v4642_v49 = vcombine.low %v14525_v23, %v14524_v62  ;;  %v6441_v63 = vcombine.low %v14545_v13, %v14428_v60 }
 0x1ba   : > { %9001 = vmatprep.mubr.msk.f32.mxu0 %vm1714_vm8, %v6387_v22  ;;  %v14514_v22 = vld [vmem:[#allocation227_spill] sm:$0xff]  ;;  %v4641_v39 = vcombine.low %v14523_v3, %v12342_v53  ;;  %v14528_v53 = vld [vmem:[#allocation24_spill] sm:$0xff] }
 0x1bb   : > { %8817 = vmatmul.mubr.msk.f32.vlgmr.msra.gmra.mrb[16].mxu1 %vm1714_vm8, %v4487_v57  ;;  %v4591_v47 = vcombine.low %v14515_v56, %v14514_v22  ;;  %v4588_v57 = vrot.slane %v4574_v59, %v9474_v9  ;;  %v4659_v26 = vcombine.low %v14529_v43, %v14528_v53  ;;  %v6391_v59 = vcombine.low %v14533_v30, %v14532_v24  ;;  %v12954_v24 = vld [vmem:[%s13305_s2] ss:$0 sm:$0xff] }
 0x1bc   : > { %8819 = vmatprep.mubr.msk.f32.mxu1 %vm1714_vm8, %v4504_v51  ;;  %v4649_v0 = vrot.slane %v4641_v39, %v9474_v9  ;;  %v4656_v7 = vrot.slane %v4642_v49, %v9474_v9 }
 0x1bd   : > { %9002 = vmatmul.mubr.msk.f32.gmra.mrb[14].mxu0 %vm1714_vm8, %v12666_v18  ;;  %v4605_v16 = vrot.slane %v4591_v47, %v9474_v9  ;;  %v4608_v18 = vcombine.low %v14519_v37, %v14518_v8  ;;  %v4589_v2 = vcombine.low %v4581_v33, %v4588_v57  ;;  %v4673_v29 = vrot.slane %v4659_v26, %v9474_v9  ;;  %v14537_v47 = vld [vmem:[#allocation173_spill] sm:$0xff] }
 0x1be   : > { %9004 = vmatprep.mubr.msk.f32.mxu0 %vm1714_vm8, %v12671_v1  ;;  %v4572_v1 = vcombine.low %v4564_v54, %v4571_v28  ;;  %v14539_v28 = vld [vmem:[#allocation6_spill] sm:$0xff]  ;;  %v6405_v57 = vrot.slane %v6391_v59, %v9474_v9  ;;  %v6425_v8 = vcombine.low %v14544_v40, %v14543_v48 }
 0x1bf   : > { %8820 = vmatmul.mubr.msk.f32.gmra.mrb[18].mxu1 %vm1714_vm8, %v4521_v14  ;;  %v4606_v51 = vcombine.low %v4598_v10, %v4605_v16  ;;  %v4622_v11 = vrot.slane %v4608_v18, %v9474_v9  ;;  %v14541_v10 = vld [vmem:[#allocation3_spill] sm:$0xff]  ;;  %v14542_v16 = vld [vmem:[#allocation182_spill] sm:$0xff] }
 0x1c0   : > { %8822 = vmatprep.mubr.msk.f32.mxu1 %vm1714_vm8, %v4538_v58  ;;  %v14538_v58 = vld [vmem:[#allocation121_spill] sm:$0xff]  ;;  %v6424_v19 = vcombine.low %v14542_v16, %v14541_v10 }
 0x1c1   : > { %9005 = vmatmul.mubr.msk.f32.gmra.mrb[16].mxu0 %vm1714_vm8, %v12684_v41  ;;  %v14527_v41 = vld [vmem:[#allocation46_spill] sm:$0xff]  ;;  %v4623_v14 = vcombine.low %v4615_v34, %v4622_v11  ;;  %v6407_v54 = vcombine.low %v14538_v58, %v14537_v47  ;;  %v6449_v34 = vrot.slane %v6441_v63, %v9474_v9 }
 0x1c2   : > { %9007 = vmatprep.mubr.msk.f32.mxu0 %vm1714_vm8, %v6388_v21  ;;  %v14526_v21 = vld [vmem:[#allocation48_spill] sm:$0xff]  ;;  %v6432_v39 = vrot.slane %v6424_v19, %v9474_v9 }
 0x1c3   : > { %8823 = vmatmul.mubr.msk.f32.gmra.mrb[20].mxu1 %vm1714_vm8, %v4555_v25  ;;  %v4658_v61 = vcombine.low %v14527_v41, %v14526_v21  ;;  %v14540_v25 = vld [vmem:[#allocation115_spill] sm:$0xff]  ;;  %v6415_v35 = vrot.slane %v6407_v54, %v9474_v9 }
 0x1c4   : > { %8825 = vmatprep.mubr.msk.f32.mxu1 %vm1714_vm8, %v4572_v1  ;;  %v6408_v33 = vcombine.low %v14540_v25, %v14539_v28 }
 0x1c5   : > { %9008 = vmatmul.mubr.msk.f32.gmra.mrb[18].mxu0 %vm1714_vm8, %v12702_v32  ;;  %v14534_v32 = vld [vmem:[#allocation242_spill] sm:$0xff]  ;;  %v4666_v56 = vrot.slane %v4658_v61, %v9474_v9 }
 0x1c6   : > { %9010 = vmatprep.mubr.msk.f32.mxu0 %vm1714_vm8, %v12706_v12  ;;  %v4675_v50 = vcombine.low %v14535_v55, %v14534_v32  ;;  %v14536_v12 = vld [vmem:[#allocation241_spill] sm:$0xff]  ;;  %v6422_v52 = vrot.slane %v6408_v33, %v9474_v9 }
 0x1c7   : > { %8826 = vmatmul.mubr.msk.f32.gmra.mrb[22].mxu1 %vm1714_vm8, %v4589_v2  ;;  %v4676_v22 = vcombine.low %v14536_v12, %v12509_v4  ;;  %v6398_v4 = vrot.slane %v8288_v44, %v9474_v9  ;;  %v4674_v1 = vcombine.low %v4666_v56, %v4673_v29  ;;  %v6442_v2 = vcombine.low %v14546_v45, %v12528_v46 }
 0x1c8   : > { %8828 = vmatprep.mubr.msk.f32.mxu1 %vm1714_vm8, %v4606_v51  ;;  %v4683_v37 = vrot.slane %v4675_v50, %v9474_v9  ;;  %v6439_v51 = vrot.slane %v6425_v8, %v9474_v9  ;;  %v6423_v60 = vcombine.low %v6415_v35, %v6422_v52 }
 0x1c9   : > { %9011 = vmatmul.mubr.msk.f32.gmra.mrb[20].mxu0 %vm1714_vm8, %v12727_v38  ;;  %v4657_v38 = vcombine.low %v4649_v0, %v4656_v7  ;;  %v4690_v18 = vrot.slane %v4676_v22, %v9474_v9  ;;  %v6406_v3 = vcombine.low %v6398_v4, %v6405_v57  ;;  %v6456_v46 = vrot.slane %v6442_v2, %v9474_v9 }
 0x1ca   : > { %9013 = vmatprep.mubr.msk.f32.mxu0 %vm1714_vm8, %v6389_v15 }
 0x1cb   : > { %8829 = vmatmul.mubr.msk.f32.gmra.mrb[24].mxu1 %vm1714_vm8, %v4623_v14  ;;  %v6457_v11 = vcombine.low %v6449_v34, %v6456_v46 }
 0x1cc   : > { %8831 = vmatprep.mubr.msk.f32.mxu1 %vm1714_vm8, %v4640_v31 }
 0x1cd   : > { %9014 = vmatmul.mubr.msk.f32.gmra.mrb[22].mxu0 %vm1714_vm8, %v12751_v5  ;;  %v4691_v5 = vcombine.low %v4683_v37, %v4690_v18 }
 0x1ce   : > { %9016 = vmatprep.mubr.msk.f32.mxu0 %vm1714_vm8, %v12757_v42  ;;  %v6440_v42 = vcombine.low %v6432_v39, %v6439_v51 }
 0x1cf   : > { %8832 = vmatmul.mubr.msk.f32.gmra.mrb[26].mxu1 %vm1714_vm8, %v4657_v38 }
 0x1d0   : > { %8834 = vmatprep.mubr.msk.f32.mxu1 %vm1714_vm8, %v4674_v1 }
 0x1d1   : > { %9017 = vmatmul.mubr.msk.f32.gmra.mrb[24].mxu0 %vm1714_vm8, %v12770_v36 }
 0x1d2   : > { %9019 = vmatprep.mubr.msk.f32.mxu0 %vm1714_vm8, %v6406_v3 }
 0x1d3   : > { %8835 = vmatmul.mubr.msk.f32.gmra.mrb[28].mxu1 %vm1714_vm8, %v4691_v5 }
 0x1d5   : > { %9020 = vmatmul.mubr.msk.f32.gmra.mrb[26].mxu0 %vm1714_vm8, %v6423_v60 }
 0x1d6   : > { %9022 = vmatprep.mubr.msk.f32.mxu0 %vm1714_vm8, %v6440_v42 }
 0x1d9   : > { %9023 = vmatmul.mubr.msk.f32.gmra.mrb[28].mxu0 %vm1714_vm8, %v6457_v11 }
 0x250   : > { %v8747_v62 = vpop.f32.mrb[0].mxu1 }
 0x251   : > { %v3954_v36 = vpop.f32.mrb[1].mxu1 }
 0x254   : > { %v8750_v23 = vpop.f32.mrb[2].mxu1 }
 0x255   : > { %v3964_v49 = vpop.f32.mrb[3].mxu1 }
 0x258   : > { %v12926_v17 = vpop.f32.mrb[4].mxu1 }
 0x259   : > { %v12928_v20 = vpop.f32.mrb[5].mxu1 }
 0x25e   : > { %v12930_v21 = vpop.f32.mrb[6].mxu1 }
 0x25f   : > { %v12932_v41 = vpop.f32.mrb[7].mxu1 }
 0x262   : > { %v12934_v61 = vpop.f32.mrb[8].mxu1 }
 0x263   : > { %v12936_v53 = vpop.f32.mrb[9].mxu1 }
 0x266   : > { %v12938_v43 = vpop.f32.mrb[10].mxu1 }
 0x267   : > { %v12940_v26 = vpop.f32.mrb[11].mxu1 }
 0x26a   : > { %v12942_v27 = vpop.f32.mrb[12].mxu1 }
 0x26b   : > { %v12944_v15 = vpop.f32.mrb[13].mxu1 }
 0x26e   : > { %v12946_v0 = vpop.f32.mrb[14].mxu1 }
 0x26f   : > { %v12949_v6 = vpop.f32.mrb[15].mxu1 }
 0x274   : > { %v8982_v44 = vpop.f32.mrb[0].mxu0 }
 0x275   : > { %v9027_v30 = vadd.f32 %v8982_v44, %v8747_v62  ;;  %v6547_v59 = vpop.f32.mrb[1].mxu0 }
 0x276   : > { %v9028_v14 = vadd.f32 %v6547_v59, %v3954_v36 }
 0x277   : > { %v6734_v7 = vadd.f32 %v9027_v30, %v12954_v24 }
 0x278   : > { %v6733_v32 = vadd.f32 %v9028_v14, %v12954_v24  ;;  %v8985_v55 = vpop.f32.mrb[2].mxu0 }
 0x279   : > { %v6810_v50 = vcombine.high %v6734_v7, %v6734_v7  ;;  %v6817_v12 = vrot.slane %v6734_v7, %v9474_v9  ;;  %v9029_v22 = vadd.f32 %v8985_v55, %v8750_v23  ;;  %v6557_v31 = vpop.f32.mrb[3].mxu0 }
 0x27a   : > { %v6793_v56 = vcombine.high %v6733_v32, %v6733_v32  ;;  %v6800_v29 = vrot.slane %v6733_v32, %v9474_v9  ;;  %v9030_v47 = vadd.f32 %v6557_v31, %v3964_v49 }
 0x27b   : > { %v6824_v58 = vrot.slane %v6810_v50, %v9474_v9  ;;  %v6825_v54 = vcombine.high %v6817_v12, %v6817_v12  ;;  %v6736_v28 = vadd.f32 %v9029_v22, %v12954_v24 }
 0x27c   : > { %v6807_v25 = vrot.slane %v6793_v56, %v9474_v9  ;;  %v6808_v33 = vcombine.high %v6800_v29, %v6800_v29  ;;  %v6735_v4 = vadd.f32 %v9030_v47, %v12954_v24  ;;  %v8988_v57 = vpop.f32.mrb[4].mxu0 }
 0x27d   : > { %v6826_v10 = vcombine.high %v6824_v58, %v6824_v58  ;;  %v7320_v16 = vcombine.low %v6817_v12, %v6825_v54  ;;  %v6844_v19 = vcombine.high %v6736_v28, %v6736_v28  ;;  %v6851_v48 = vrot.slane %v6736_v28, %v9474_v9  ;;  %v6567_v40 = vpop.f32.mrb[5].mxu0 }
 0x27e   : > { %v6809_v8 = vcombine.high %v6807_v25, %v6807_v25  ;;  %v7303_v38 = vcombine.low %v6800_v29, %v6808_v33  ;;  %v6827_v37 = vcombine.high %v6735_v4, %v6735_v4  ;;  %v6834_v18 = vrot.slane %v6735_v4, %v9474_v9 }
 0x27f   : > { %v7321_v1 = vcombine.low %v6824_v58, %v6826_v10  ;;  %v7328_v35 = vrot.slane %v7320_v16, %v9474_v9  ;;  %v6858_v52 = vrot.slane %v6844_v19, %v9474_v9  ;;  %v6859_v13 = vcombine.high %v6851_v48, %v6851_v48 }
 0x280   : > { %v7304_v63 = vcombine.low %v6807_v25, %v6809_v8  ;;  %v7311_v45 = vrot.slane %v7303_v38, %v9474_v9  ;;  %v6841_v2 = vrot.slane %v6827_v37, %v9474_v9  ;;  %v6842_v3 = vcombine.high %v6834_v18, %v6834_v18  ;;  %v8991_v39 = vpop.f32.mrb[6].mxu0 }
 0x281   : > { %v7335_v51 = vrot.slane %v7321_v1, %v9474_v9  ;;  %v7354_v5 = vcombine.low %v6851_v48, %v6859_v13  ;;  %v7368_v60 = vrot.slane %v6858_v52, %v9474_v9  ;;  %v9031_v34 = vadd.f32 %v8988_v57, %v12926_v17  ;;  %v6577_v46 = vpop.f32.mrb[7].mxu0 }
 0x282   : > { %v7318_v42 = vrot.slane %v7304_v63, %v9474_v9  ;;  %v6843_v11 = vcombine.high %v6841_v2, %v6841_v2  ;;  %v7337_v62 = vcombine.low %v6834_v18, %v6842_v3  ;;  %v9032_v36 = vadd.f32 %v6567_v40, %v12928_v20 }
 0x283   : > { %v7336_v23 = vcombine.low %v7328_v35, %v7335_v51  ;;  %v7361_v49 = vrot.slane %v7354_v5, %v9474_v9  ;;  %v6738_v44 = vadd.f32 %v9031_v34, %v12954_v24  ;;  %v6860_v17 = vcombine.high %v6858_v52, %v6858_v52 }
 0x284   : > { %v7319_v30 = vcombine.low %v7311_v45, %v7318_v42  ;;  %v7338_v59 = vcombine.low %v6841_v2, %v6843_v11  ;;  %v7345_v14 = vrot.slane %v7337_v62, %v9474_v9  ;;  %v6737_v7 = vadd.f32 %v9032_v36, %v12954_v24  ;;  %v8994_v32 = vpop.f32.mrb[8].mxu0 }
 0x285   : > { %7873 = vst.msk [vmem:[%s12980_s9 + $0x8] sm:$0xff] %vm7871_vm9, %v7336_v23  ;;  %v7369_v55 = vcombine.low %v7361_v49, %v7368_v60  ;;  %v6878_v50 = vcombine.high %v6738_v44, %v6738_v44  ;;  %v6885_v20 = vrot.slane %v6738_v44, %v9474_v9  ;;  %v9033_v12 = vadd.f32 %v8991_v39, %v12930_v21  ;;  %v6587_v22 = vpop.f32.mrb[9].mxu0 }
 0x286   : > { %7872 = vst.msk [vmem:[%s12980_s9] sm:$0xff] %vm7871_vm9, %v7319_v30  ;;  %v7352_v31 = vrot.slane %v7338_v59, %v9474_v9  ;;  %v6861_v56 = vcombine.high %v6737_v7, %v6737_v7  ;;  %v6868_v29 = vrot.slane %v6737_v7, %v9474_v9  ;;  %v9034_v47 = vadd.f32 %v6577_v46, %v12932_v41 }
 0x287   : > { %7876 = vst.msk [vmem:[%s12980_s9 + $0x18] sm:$0x3f] %vm7875_vm10, %v7369_v55  ;;  %v6892_v58 = vrot.slane %v6878_v50, %v9474_v9  ;;  %v6893_v54 = vcombine.high %v6885_v20, %v6885_v20  ;;  %v6740_v28 = vadd.f32 %v9033_v12, %v12954_v24  ;;  %v9035_v21 = vadd.f32 %v8994_v32, %v12934_v61 }
 0x288   : > { %v7353_v25 = vcombine.low %v7345_v14, %v7352_v31  ;;  %v6875_v33 = vrot.slane %v6861_v56, %v9474_v9  ;;  %v6876_v4 = vcombine.high %v6868_v29, %v6868_v29  ;;  %v7370_v57 = vcombine.low %v6860_v17, %v6868_v29  ;;  %v8997_v10 = vpop.f32.mrb[10].mxu0 }
 0x289   : > { %v7388_v16 = vcombine.low %v6893_v54, %v6892_v58  ;;  %v6912_v19 = vcombine.high %v6740_v28, %v6740_v28  ;;  %v6919_v41 = vrot.slane %v6740_v28, %v9474_v9  ;;  %v6739_v48 = vadd.f32 %v9034_v47, %v12954_v24  ;;  %v6597_v40 = vpop.f32.mrb[11].mxu0 }
 0x28a   : > { %7874 = vst.msk [vmem:[%s12980_s9 + $0x10] sm:$0xff] %vm7871_vm9, %v7353_v25  ;;  %v6877_v8 = vcombine.high %v6875_v33, %v6875_v33  ;;  %v7371_v38 = vcombine.low %v6876_v4, %v6875_v33  ;;  %v7378_v37 = vrot.slane %v7370_v57, %v9474_v9  ;;  %v6894_v61 = vcombine.high %v6892_v58, %v6892_v58 }
 0x28b   : > { %v7402_v18 = vrot.slane %v7388_v16, %v9474_v9  ;;  %v6926_v1 = vrot.slane %v6912_v19, %v9474_v9  ;;  %v6927_v35 = vcombine.high %v6919_v41, %v6919_v41  ;;  %v6895_v52 = vcombine.high %v6739_v48, %v6739_v48 }
 0x28c   : > { %v7385_v13 = vrot.slane %v7371_v38, %v9474_v9  ;;  %v7387_v63 = vcombine.low %v6877_v8, %v6885_v20  ;;  %v6902_v45 = vrot.slane %v6739_v48, %v9474_v9  ;;  %v6742_v2 = vadd.f32 %v9035_v21, %v12954_v24  ;;  %v9000_v3 = vpop.f32.mrb[12].mxu0 }
 0x28d   : > { %v6928_v39 = vcombine.high %v6926_v1, %v6926_v1  ;;  %v7435_v51 = vrot.slane %v6927_v35, %v9474_v9  ;;  %v6909_v5 = vrot.slane %v6895_v52, %v9474_v9  ;;  %v9036_v60 = vadd.f32 %v6587_v22, %v12936_v53  ;;  %v13016_v34 = vpop.f32.mrb[13].mxu0 }
 0x28e   : > { %v7386_v46 = vcombine.low %v7378_v37, %v7385_v13  ;;  %v7395_v42 = vrot.slane %v7387_v63, %v9474_v9  ;;  %v6910_v11 = vcombine.high %v6902_v45, %v6902_v45  ;;  %v7404_v62 = vcombine.low %v6894_v61, %v6902_v45  ;;  %v13019_v36 = vpop.f32.mrb[16].mxu1 }
 0x28f   : > { %v7437_v23 = vcombine.low %v6926_v1, %v6928_v39  ;;  %v6911_v49 = vcombine.high %v6909_v5, %v6909_v5  ;;  %v6946_v44 = vcombine.high %v6742_v2, %v6742_v2  ;;  %v6953_v17 = vrot.slane %v6742_v2, %v9474_v9  ;;  %v13022_v30 = vpop.f32.mrb[17].mxu1 }
 0x290   : > { %v7403_v59 = vcombine.low %v7395_v42, %v7402_v18  ;;  %7877 = vst.msk [vmem:[%s12980_s9 + $0x20] sm:$0xff] %vm7871_vm9, %v7386_v46  ;;  %v7405_v53 = vcombine.low %v6910_v11, %v6909_v5  ;;  %v7412_v14 = vrot.slane %v7404_v62, %v9474_v9  ;;  %v6741_v7 = vadd.f32 %v9036_v60, %v12954_v24  ;;  %v13028_v32 = vpop.f32.mrb[14].mxu0 }
 0x291   : > { %v7445_v55 = vrot.slane %v7437_v23, %v9474_v9  ;;  %v7421_v50 = vcombine.low %v6911_v49, %v6919_v41  ;;  %v6960_v20 = vrot.slane %v6946_v44, %v9474_v9  ;;  %v6961_v12 = vcombine.high %v6953_v17, %v6953_v17  ;;  %v13032_v22 = vpop.f32.mrb[15].mxu0 }
 0x292   : > { %7878 = vst.msk [vmem:[%s12980_s9 + $0x28] sm:$0xff] %vm7871_vm9, %v7403_v59  ;;  %v7419_v31 = vrot.slane %v7405_v53, %v9474_v9  ;;  %v6929_v56 = vcombine.high %v6741_v7, %v6741_v7  ;;  %v6936_v29 = vrot.slane %v6741_v7, %v9474_v9  ;;  %v9037_v47 = vadd.f32 %v8997_v10, %v12938_v43  ;;  %v13039_v58 = vpop.f32.mrb[18].mxu1 }
 0x293   : > { %v7428_v54 = vrot.slane %v7421_v50, %v9474_v9  ;;  %v6962_v28 = vcombine.high %v6960_v20, %v6960_v20  ;;  %v7455_v21 = vcombine.low %v6953_v17, %v6961_v12  ;;  %v9038_v25 = vadd.f32 %v6597_v40, %v12940_v26  ;;  %v13043_v33 = vpop.f32.mrb[19].mxu1 }
 0x294   : > { %v7420_v4 = vcombine.low %v7412_v14, %v7419_v31  ;;  %v6943_v57 = vrot.slane %v6929_v56, %v9474_v9  ;;  %v6944_v16 = vcombine.high %v6936_v29, %v6936_v29  ;;  %v6744_v19 = vadd.f32 %v9037_v47, %v12954_v24  ;;  %v13047_v41 = vpop.f32.mrb[16].mxu0 }
 0x295   : > { %v7436_v43 = vcombine.low %v7428_v54, %v7435_v51  ;;  %v7469_v10 = vrot.slane %v7455_v21, %v9474_v9  ;;  %v7471_v48 = vcombine.low %v6960_v20, %v6962_v28  ;;  %v6743_v8 = vadd.f32 %v9038_v25, %v12954_v24  ;;  %v13051_v38 = vpop.f32.mrb[17].mxu0 }
 0x296   : > { %7879 = vst.msk [vmem:[%s12980_s9 + $0x30] sm:$0xff] %vm7871_vm9, %v7420_v4  ;;  %v6945_v26 = vcombine.high %v6943_v57, %v6943_v57  ;;  %v7438_v40 = vcombine.low %v6936_v29, %v6944_v16  ;;  %v6980_v37 = vcombine.high %v6744_v19, %v6744_v19  ;;  %v6987_v61 = vrot.slane %v6744_v19, %v9474_v9  ;;  %v13056_v18 = vpop.f32.mrb[20].mxu1 }
 0x297   : > { %7880 = vst.msk [vmem:[%s12980_s9 + $0x38] sm:$0x3f] %vm7875_vm10, %v7436_v43  ;;  %v7479_v1 = vrot.slane %v7471_v48, %v9474_v9  ;;  %v6963_v35 = vcombine.high %v6743_v8, %v6743_v8  ;;  %v6970_v52 = vrot.slane %v6743_v8, %v9474_v9  ;;  %v9039_v13 = vadd.f32 %v9000_v3, %v12942_v27  ;;  %v13063_v63 = vpop.f32.mrb[21].mxu1 }
 0x298   : > { %v7452_v45 = vrot.slane %v7438_v40, %v9474_v9  ;;  %v7454_v2 = vcombine.low %v6943_v57, %v6945_v26  ;;  %v6994_v39 = vrot.slane %v6980_v37, %v9474_v9  ;;  %v6995_v51 = vcombine.high %v6987_v61, %v6987_v61  ;;  %v13067_v5 = vpop.f32.mrb[18].mxu0 }
 0x299   : > { %v7502_v60 = vrot.slane %v6987_v61, %v9474_v9  ;;  %v6977_v46 = vrot.slane %v6963_v35, %v9474_v9  ;;  %v6978_v42 = vcombine.high %v6970_v52, %v6970_v52  ;;  %v6746_v11 = vadd.f32 %v9039_v13, %v12954_v24  ;;  %v13072_v62 = vpop.f32.mrb[19].mxu0 }
 0x29a   : > { %v7453_v27 = vcombine.low %v7445_v55, %v7452_v45  ;;  %v7462_v3 = vrot.slane %v7454_v2, %v9474_v9  ;;  %v7504_v23 = vcombine.low %v6995_v51, %v6994_v39  ;;  %v9040_v49 = vadd.f32 %v13016_v34, %v12944_v15  ;;  %v13077_v44 = vpop.f32.mrb[22].mxu1 }
 0x29b   : > { %v6979_v17 = vcombine.high %v6977_v46, %v6977_v46  ;;  %v7472_v59 = vcombine.low %v6970_v52, %v6978_v42  ;;  %v7014_v53 = vcombine.high %v6746_v11, %v6746_v11  ;;  %v7021_v14 = vrot.slane %v6746_v11, %v9474_v9  ;;  %v13080_v7 = vpop.f32.mrb[23].mxu1 }
 0x29c   : > { %v7470_v50 = vcombine.low %v7462_v3, %v7469_v10  ;;  %7881 = vst.msk [vmem:[%s12980_s9 + $0x40] sm:$0xff] %vm7871_vm9, %v7453_v27  ;;  %v7512_v55 = vrot.slane %v7504_v23, %v9474_v9  ;;  %v6745_v20 = vadd.f32 %v9040_v49, %v12954_v24  ;;  %v6996_v12 = vcombine.high %v6994_v39, %v6994_v39  ;;  %v13086_v31 = vpop.f32.mrb[20].mxu0 }
 0x29d   : > { %v7486_v15 = vrot.slane %v7472_v59, %v9474_v9  ;;  %v7488_v34 = vcombine.low %v6977_v46, %v6979_v17  ;;  %v7028_v56 = vrot.slane %v7014_v53, %v9474_v9  ;;  %v7029_v29 = vcombine.high %v7021_v14, %v7021_v14  ;;  %v13090_v47 = vpop.f32.mrb[21].mxu0 }
 0x29e   : > { %7882 = vst.msk [vmem:[%s12980_s9 + $0x48] sm:$0xff] %vm7871_vm9, %v7470_v50  ;;  %v6997_v54 = vcombine.high %v6745_v20, %v6745_v20  ;;  %v7004_v28 = vrot.slane %v6745_v20, %v9474_v9  ;;  %v9041_v21 = vadd.f32 %v13028_v32, %v12946_v0  ;;  %v9042_v25 = vadd.f32 %v13032_v22, %v12949_v6  ;;  %v13099_v4 = vpop.f32.mrb[24].mxu1 }
 0x29f   : > { %v7487_v57 = vcombine.low %v7479_v1, %v7486_v15  ;;  %v7495_v16 = vrot.slane %v7488_v34, %v9474_v9  ;;  %v7538_v19 = vcombine.low %v7029_v29, %v7028_v56  ;;  %v7030_v43 = vcombine.high %v7028_v56, %v7028_v56  ;;  %v13102_v10 = vpop.f32.mrb[25].mxu1 }
 0x2a0   : > { %v7011_v48 = vrot.slane %v6997_v54, %v9474_v9  ;;  %v7012_v8 = vcombine.high %v7004_v28, %v7004_v28  ;;  %v7505_v26 = vcombine.low %v6996_v12, %v7004_v28  ;;  %v6748_v40 = vadd.f32 %v9041_v21, %v12954_v24  ;;  %v13106_v0 = vpop.f32.mrb[22].mxu0 }
 0x2a1   : > { %v7503_v32 = vcombine.low %v7495_v16, %v7502_v60  ;;  %7883 = vst.msk [vmem:[%s12980_s9 + $0x50] sm:$0xff] %vm7871_vm9, %v7487_v57  ;;  %v7546_v6 = vrot.slane %v7538_v19, %v9474_v9  ;;  %v6747_v22 = vadd.f32 %v9042_v25, %v12954_v24  ;;  %v9043_v37 = vadd.f32 %v13047_v41, %v13019_v36  ;;  %v13114_v61 = vpop.f32.mrb[23].mxu0 }
 0x2a2   : > { %v7013_v1 = vcombine.high %v7011_v48, %v7011_v48  ;;  %v7519_v35 = vrot.slane %v7505_v26, %v9474_v9  ;;  %v7521_v52 = vcombine.low %v7012_v8, %v7011_v48  ;;  %v7048_v13 = vcombine.high %v6748_v40, %v6748_v40  ;;  %v13117_v45 = vpop.f32.mrb[26].mxu1 }
 0x2a3   : > { %7884 = vst.msk [vmem:[%s12980_s9 + $0x58] sm:$0x3f] %vm7875_vm10, %v7503_v32  ;;  %v7055_v2 = vrot.slane %v6748_v40, %v9474_v9  ;;  %v7031_v39 = vcombine.high %v6747_v22, %v6747_v22  ;;  %v7038_v51 = vrot.slane %v6747_v22, %v9474_v9  ;;  %v6750_v60 = vadd.f32 %v9043_v37, %v12954_v24  ;;  %v13124_v36 = vpop.f32.mrb[27].mxu1 }
 0x2a4   : > { %v7520_v41 = vcombine.low %v7512_v55, %v7519_v35  ;;  %v7522_v46 = vcombine.low %v7013_v1, %v7021_v14  ;;  %v7529_v42 = vrot.slane %v7521_v52, %v9474_v9  ;;  %v7062_v11 = vrot.slane %v7048_v13, %v9474_v9  ;;  %v13128_v27 = vpop.f32.mrb[24].mxu0 }
 0x2a5   : > { %v7063_v3 = vcombine.high %v7055_v2, %v7055_v2  ;;  %v7045_v23 = vrot.slane %v7031_v39, %v9474_v9  ;;  %v7046_v49 = vcombine.high %v7038_v51, %v7038_v51  ;;  %v7539_v17 = vcombine.low %v7030_v43, %v7038_v51  ;;  %v13131_v59 = vpop.f32.mrb[25].mxu0 }
 0x2a6   : > { %v7536_v53 = vrot.slane %v7522_v46, %v9474_v9  ;;  %7885 = vst.msk [vmem:[%s12980_s9 + $0x60] sm:$0xff] %vm7871_vm9, %v7520_v41  ;;  %v7064_v50 = vcombine.high %v7062_v11, %v7062_v11  ;;  %v7082_v55 = vcombine.high %v6750_v60, %v6750_v60  ;;  %v7089_v14 = vrot.slane %v6750_v60, %v9474_v9  ;;  %v13137_v20 = vpop.f32.mrb[28].mxu1 }
 0x2a7   : > { %v7571_v12 = vcombine.low %v7055_v2, %v7063_v3  ;;  %v7047_v15 = vcombine.high %v7045_v23, %v7045_v23  ;;  %v7553_v34 = vrot.slane %v7539_v17, %v9474_v9  ;;  %v7555_v56 = vcombine.low %v7046_v49, %v7045_v23  ;;  %v13140_v29 = vpop.f32.mrb[29].mxu1 }
 0x2a8   : > { %v7537_v54 = vcombine.low %v7529_v42, %v7536_v53  ;;  %v7572_v28 = vcombine.low %v7062_v11, %v7064_v50  ;;  %v7096_v21 = vrot.slane %v7082_v55, %v9474_v9  ;;  %v7097_v25 = vcombine.high %v7089_v14, %v7089_v14  ;;  %v13143_v57 = vpop.f32.mrb[26].mxu0 }
 0x2a9   : > { %v7579_v16 = vrot.slane %v7571_v12, %v9474_v9  ;;  %v7554_v19 = vcombine.low %v7546_v6, %v7553_v34  ;;  %v7562_v43 = vrot.slane %v7555_v56, %v9474_v9  ;;  %v7569_v48 = vrot.slane %v7047_v15, %v9474_v9  ;;  %v13148_v8 = vpop.f32.mrb[27].mxu0 }
 0x2aa   : > { %7886 = vst.msk [vmem:[%s12980_s9 + $0x68] sm:$0xff] %vm7871_vm9, %v7537_v54  ;;  %v7586_v26 = vrot.slane %v7572_v28, %v9474_v9  ;;  %v7098_v40 = vcombine.high %v7096_v21, %v7096_v21  ;;  %v7605_v32 = vcombine.low %v7089_v14, %v7097_v25  ;;  %v9044_v22 = vadd.f32 %v13051_v38, %v13022_v30 }
 0x2ab   : > { %v7570_v37 = vcombine.low %v7562_v43, %v7569_v48  ;;  %7887 = vst.msk [vmem:[%s12980_s9 + $0x70] sm:$0xff] %vm7871_vm9, %v7554_v19  ;;  %v9045_v6 = vadd.f32 %v13067_v5, %v13039_v58  ;;  %v9046_v1 = vadd.f32 %v13072_v62, %v13043_v33  ;;  %v9047_v35 = vadd.f32 %v13086_v31, %v13056_v18 }
 0x2ac   : > { %v7587_v52 = vcombine.low %v7579_v16, %v7586_v26  ;;  %v7606_v13 = vcombine.low %v7096_v21, %v7098_v40  ;;  %v7613_v2 = vrot.slane %v7605_v32, %v9474_v9  ;;  %v6749_v39 = vadd.f32 %v9044_v22, %v12954_v24  ;;  %v13165_v30 = vpop.f32.mrb[28].mxu0 }
 0x2ad   : > { %7888 = vst.msk [vmem:[%s12980_s9 + $0x78] sm:$0x3f] %vm7875_vm10, %v7570_v37  ;;  %v6752_v38 = vadd.f32 %v9045_v6, %v12954_v24  ;;  %v6751_v58 = vadd.f32 %v9046_v1, %v12954_v24  ;;  %v6754_v5 = vadd.f32 %v9047_v35, %v12954_v24  ;;  %v9048_v33 = vadd.f32 %v13090_v47, %v13063_v63  ;;  %v13174_v18 = vpop.f32.mrb[29].mxu0 }
 0x2ae   : > { %7889 = vst.msk [vmem:[%s12980_s9 + $0x80] sm:$0xff] %vm7871_vm9, %v7587_v52  ;;  %v7620_v62 = vrot.slane %v7606_v13, %v9474_v9  ;;  %v7065_v31 = vcombine.high %v6749_v39, %v6749_v39  ;;  %v7072_v51 = vrot.slane %v6749_v39, %v9474_v9  ;;  %v9049_v60 = vadd.f32 %v13106_v0, %v13077_v44 }
 0x2af   : > { %v7116_v41 = vcombine.high %v6752_v38, %v6752_v38  ;;  %v7123_v46 = vrot.slane %v6752_v38, %v9474_v9  ;;  %v7099_v42 = vcombine.high %v6751_v58, %v6751_v58  ;;  %v7106_v11 = vrot.slane %v6751_v58, %v9474_v9 }
 0x2b0   : > { %v7621_v63 = vcombine.low %v7613_v2, %v7620_v62  ;;  %v7079_v47 = vrot.slane %v7065_v31, %v9474_v9  ;;  %v7080_v3 = vcombine.high %v7072_v51, %v7072_v51  ;;  %v7150_v23 = vcombine.high %v6754_v5, %v6754_v5 }
 0x2b1   : > { %v7130_v49 = vrot.slane %v7116_v41, %v9474_v9  ;;  %v7131_v17 = vcombine.high %v7123_v46, %v7123_v46  ;;  %v7113_v53 = vrot.slane %v7099_v42, %v9474_v9  ;;  %v7114_v50 = vcombine.high %v7106_v11, %v7106_v11 }
 0x2b2   : > { %7891 = vst.msk [vmem:[%s12980_s9 + $0x90] sm:$0xff] %vm7871_vm9, %v7621_v63  ;;  %v7081_v44 = vcombine.high %v7079_v47, %v7079_v47  ;;  %v7588_v0 = vcombine.low %v7072_v51, %v7080_v3  ;;  %v7157_v55 = vrot.slane %v6754_v5, %v9474_v9  ;;  %v7164_v14 = vrot.slane %v7150_v23, %v9474_v9 }
 0x2b3   : > { %v7639_v12 = vcombine.low %v7131_v17, %v7130_v49  ;;  %v7115_v15 = vcombine.high %v7113_v53, %v7113_v53  ;;  %v7622_v34 = vcombine.low %v7106_v11, %v7114_v50  ;;  %v7636_v56 = vrot.slane %v7113_v53, %v9474_v9 }
 0x2b4   : > { %v7589_v54 = vcombine.low %v7079_v47, %v7081_v44  ;;  %v7596_v28 = vrot.slane %v7588_v0, %v9474_v9  ;;  %v7165_v21 = vcombine.high %v7157_v55, %v7157_v55  ;;  %v6753_v25 = vadd.f32 %v9048_v33, %v12954_v24 }
 0x2b5   : > { %v7653_v16 = vrot.slane %v7639_v12, %v9474_v9  ;;  %v7629_v19 = vrot.slane %v7622_v34, %v9474_v9  ;;  %v7638_v43 = vcombine.low %v7115_v15, %v7123_v46  ;;  %v7132_v48 = vcombine.high %v7130_v49, %v7130_v49 }
 0x2b6   : > { %v7603_v26 = vrot.slane %v7589_v54, %v9474_v9  ;;  %v7673_v40 = vcombine.low %v7165_v21, %v7164_v14  ;;  %v7133_v32 = vcombine.high %v6753_v25, %v6753_v25  ;;  %v7140_v22 = vrot.slane %v6753_v25, %v9474_v9 }
 0x2b7   : > { %v7637_v37 = vcombine.low %v7629_v19, %v7636_v56  ;;  %v7646_v6 = vrot.slane %v7638_v43, %v9474_v9  ;;  %v6756_v1 = vadd.f32 %v9049_v60, %v12954_v24  ;;  %v9050_v35 = vadd.f32 %v13114_v61, %v13080_v7 }
 0x2b8   : > { %v7604_v52 = vcombine.low %v7596_v28, %v7603_v26  ;;  %v7687_v13 = vrot.slane %v7673_v40, %v9474_v9  ;;  %v7147_v2 = vrot.slane %v7133_v32, %v9474_v9  ;;  %v7148_v39 = vcombine.high %v7140_v22, %v7140_v22 }
 0x2b9   : > { %v7654_v38 = vcombine.low %v7646_v6, %v7653_v16  ;;  %7892 = vst.msk [vmem:[%s12980_s9 + $0x98] sm:$0x3f] %vm7875_vm10, %v7637_v37  ;;  %v7655_v58 = vcombine.low %v7132_v48, %v7140_v22  ;;  %v7184_v5 = vcombine.high %v6756_v1, %v6756_v1  ;;  %v7191_v33 = vrot.slane %v6756_v1, %v9474_v9 }
 0x2ba   : > { %7890 = vst.msk [vmem:[%s12980_s9 + $0x88] sm:$0xff] %vm7871_vm9, %v7604_v52  ;;  %v7149_v62 = vcombine.high %v7147_v2, %v7147_v2  ;;  %v7656_v31 = vcombine.low %v7148_v39, %v7147_v2  ;;  %v6755_v51 = vadd.f32 %v9050_v35, %v12954_v24  ;;  %v7166_v7 = vcombine.high %v7164_v14, %v7164_v14 }
 0x2bb   : > { %7893 = vst.msk [vmem:[%s12980_s9 + $0xa0] sm:$0xff] %vm7871_vm9, %v7654_v38  ;;  %v7663_v61 = vrot.slane %v7655_v58, %v9474_v9  ;;  %v7198_v60 = vrot.slane %v7184_v5, %v9474_v9  ;;  %v7199_v41 = vcombine.high %v7191_v33, %v7191_v33  ;;  %v9051_v46 = vadd.f32 %v13128_v27, %v13099_v4 }
 0x2bc   : > { %v7670_v42 = vrot.slane %v7656_v31, %v9474_v9  ;;  %v7672_v11 = vcombine.low %v7149_v62, %v7157_v55  ;;  %v7167_v63 = vcombine.high %v6755_v51, %v6755_v51  ;;  %v7174_v47 = vrot.slane %v6755_v51, %v9474_v9 }
 0x2bd   : > { %v7200_v3 = vcombine.high %v7198_v60, %v7198_v60  ;;  %v7706_v23 = vcombine.low %v7191_v33, %v7199_v41  ;;  %v6758_v49 = vadd.f32 %v9051_v46, %v12954_v24  ;;  %v9052_v17 = vadd.f32 %v13131_v59, %v13102_v10 }
 0x2be   : > { %v7671_v53 = vcombine.low %v7663_v61, %v7670_v42  ;;  %v7680_v50 = vrot.slane %v7672_v11, %v9474_v9  ;;  %v7181_v4 = vrot.slane %v7167_v63, %v9474_v9  ;;  %v7182_v27 = vcombine.high %v7174_v47, %v7174_v47 }
 0x2bf   : > { %v7720_v44 = vrot.slane %v7706_v23, %v9474_v9  ;;  %v7689_v0 = vcombine.low %v7166_v7, %v7174_v47  ;;  %v7218_v55 = vcombine.high %v6758_v49, %v6758_v49  ;;  %v7225_v34 = vrot.slane %v6758_v49, %v9474_v9 }
 0x2c0   : > { %v7688_v14 = vcombine.low %v7680_v50, %v7687_v13  ;;  %7894 = vst.msk [vmem:[%s12980_s9 + $0xa8] sm:$0xff] %vm7871_vm9, %v7671_v53  ;;  %v7183_v12 = vcombine.high %v7181_v4, %v7181_v4  ;;  %v7703_v15 = vrot.slane %v7182_v27, %v9474_v9  ;;  %v7722_v10 = vcombine.low %v7198_v60, %v7200_v3 }
 0x2c1   : > { %v7696_v59 = vrot.slane %v7689_v0, %v9474_v9  ;;  %v7232_v56 = vrot.slane %v7218_v55, %v9474_v9  ;;  %v6757_v54 = vadd.f32 %v9052_v17, %v12954_v24  ;;  %v7233_v21 = vcombine.high %v7225_v34, %v7225_v34 }
 0x2c2   : > { %7895 = vst.msk [vmem:[%s12980_s9 + $0xb0] sm:$0xff] %vm7871_vm9, %v7688_v14  ;;  %v7705_v28 = vcombine.low %v7181_v4, %v7183_v12  ;;  %v9053_v25 = vadd.f32 %v13143_v57, %v13117_v45  ;;  %v9054_v16 = vadd.f32 %v13148_v8, %v13124_v36  ;;  %v9055_v36 = vadd.f32 %v13165_v30, %v13137_v20 }
 0x2c3   : > { %v7704_v19 = vcombine.low %v7696_v59, %v7703_v15  ;;  %v7234_v43 = vcombine.high %v7232_v56, %v7232_v56  ;;  %v7201_v48 = vcombine.high %v6757_v54, %v6757_v54  ;;  %v7208_v26 = vrot.slane %v6757_v54, %v9474_v9 }
 0x2c4   : > { %v7713_v40 = vrot.slane %v7705_v28, %v9474_v9  ;;  %v7740_v32 = vcombine.low %v7225_v34, %v7233_v21  ;;  %v6760_v22 = vadd.f32 %v9053_v25, %v12954_v24  ;;  %v6759_v37 = vadd.f32 %v9054_v16, %v12954_v24 }
 0x2c5   : > { %7896 = vst.msk [vmem:[%s12980_s9 + $0xb8] sm:$0x3f] %vm7875_vm10, %v7704_v19  ;;  %v7756_v6 = vcombine.low %v7232_v56, %v7234_v43  ;;  %v7215_v45 = vrot.slane %v7201_v48, %v9474_v9  ;;  %v7216_v57 = vcombine.high %v7208_v26, %v7208_v26  ;;  %v7730_v8 = vrot.slane %v7722_v10, %v9474_v9 }
 0x2c6   : > { %v7721_v1 = vcombine.low %v7713_v40, %v7720_v44  ;;  %v7252_v35 = vcombine.high %v6760_v22, %v6760_v22  ;;  %v7235_v2 = vcombine.high %v6759_v37, %v6759_v37  ;;  %v7242_v39 = vrot.slane %v6759_v37, %v9474_v9 }
 0x2c7   : > { %v7217_v52 = vcombine.high %v7215_v45, %v7215_v45  ;;  %v7723_v13 = vcombine.low %v7208_v26, %v7216_v57  ;;  %v7754_v38 = vrot.slane %v7740_v32, %v9474_v9  ;;  %v7259_v58 = vrot.slane %v6760_v22, %v9474_v9 }
 0x2c8   : > { %7897 = vst.msk [vmem:[%s12980_s9 + $0xc0] sm:$0xff] %vm7871_vm9, %v7721_v1  ;;  %v7763_v5 = vrot.slane %v7756_v6, %v9474_v9  ;;  %v6762_v33 = vadd.f32 %v9055_v36, %v12954_v24  ;;  %v7249_v62 = vrot.slane %v7235_v2, %v9474_v9  ;;  %v7250_v31 = vcombine.high %v7242_v39, %v7242_v39 }
 0x2c9   : > { %v7737_v20 = vrot.slane %v7723_v13, %v9474_v9  ;;  %v7739_v30 = vcombine.low %v7215_v45, %v7217_v52  ;;  %v7266_v51 = vrot.slane %v7252_v35, %v9474_v9  ;;  %v7770_v7 = vrot.slane %v7242_v39, %v9474_v9 }
 0x2ca   : > { %v7286_v61 = vcombine.high %v6762_v33, %v6762_v33  ;;  %v7293_v60 = vrot.slane %v6762_v33, %v9474_v9  ;;  %v7251_v42 = vcombine.high %v7249_v62, %v7249_v62  ;;  %v7772_v11 = vcombine.low %v7250_v31, %v7249_v62 }
 0x2cb   : > { %v7738_v41 = vcombine.low %v7730_v8, %v7737_v20  ;;  %v7747_v46 = vrot.slane %v7739_v30, %v9474_v9  ;;  %v7771_v63 = vcombine.low %v7763_v5, %v7770_v7  ;;  %v7267_v49 = vcombine.high %v7259_v58, %v7259_v58 }
 0x2cc   : > { %v7300_v47 = vrot.slane %v7286_v61, %v9474_v9  ;;  %v7301_v3 = vcombine.high %v7293_v60, %v7293_v60  ;;  %v7773_v17 = vcombine.low %v7251_v42, %v7259_v58  ;;  %v9056_v53 = vadd.f32 %v13174_v18, %v13140_v29 }
 0x2cd   : > { %v7755_v23 = vcombine.low %v7747_v46, %v7754_v38  ;;  %7898 = vst.msk [vmem:[%s12980_s9 + $0xc8] sm:$0xff] %vm7871_vm9, %v7738_v41  ;;  %v7780_v27 = vrot.slane %v7772_v11, %v9474_v9  ;;  %v7268_v55 = vcombine.high %v7266_v51, %v7266_v51  ;;  %v7789_v29 = vcombine.low %v7267_v49, %v7266_v51 }
 0x2ce   : > { %7900 = vst.msk [vmem:[%s12980_s9 + $0xd8] sm:$0x3f] %vm7875_vm10, %v7771_v63  ;;  %v7302_v50 = vcombine.high %v7300_v47, %v7300_v47  ;;  %v7823_v4 = vcombine.low %v7301_v3, %v7300_v47  ;;  %v7787_v44 = vrot.slane %v7773_v17, %v9474_v9  ;;  %v6761_v0 = vadd.f32 %v9056_v53, %v12954_v24 }
 0x2cf   : > { %7899 = vst.msk [vmem:[%s12980_s9 + $0xd0] sm:$0xff] %vm7871_vm9, %v7755_v23  ;;  %v7797_v24 = vrot.slane %v7789_v29, %v9474_v9 }
 0x2d0   : > { %v7830_v14 = vrot.slane %v7823_v4, %v9474_v9  ;;  %v7837_v12 = vrot.slane %v7302_v50, %v9474_v9  ;;  %v7788_v18 = vcombine.low %v7780_v27, %v7787_v44  ;;  %v7269_v15 = vcombine.high %v6761_v0, %v6761_v0 }
 0x2d1   : > { %v7276_v34 = vrot.slane %v6761_v0, %v9474_v9 }
 0x2d2   : > { %v7838_v10 = vcombine.low %v7830_v14, %v7837_v12  ;;  %7901 = vst.msk [vmem:[%s12980_s9 + $0xe0] sm:$0xff] %vm7871_vm9, %v7788_v18  ;;  %v7283_v59 = vrot.slane %v7269_v15, %v9474_v9 }
 0x2d3   : > { %v7284_v56 = vcombine.high %v7276_v34, %v7276_v34  ;;  %v7790_v54 = vcombine.low %v7268_v55, %v7276_v34 }
 0x2d4   : > { %7904 = vst.msk [vmem:[%s12980_s9 + $0xf8] sm:$0x3f] %vm7875_vm10, %v7838_v10  ;;  %v7285_v28 = vcombine.high %v7283_v59, %v7283_v59 }
 0x2d5   : > { %v7804_v21 = vrot.slane %v7790_v54, %v9474_v9  ;;  %v7806_v25 = vcombine.low %v7284_v56, %v7283_v59 }
 0x2d6   : > { %v7807_v19 = vcombine.low %v7285_v28, %v7293_v60 }
 0x2d7   : > { %v7805_v16 = vcombine.low %v7797_v24, %v7804_v21  ;;  %v7814_v43 = vrot.slane %v7806_v25, %v9474_v9 }
 0x2d8   : > { %v7821_v48 = vrot.slane %v7807_v19, %v9474_v9 }
 0x2d9   : > { %7902 = vst.msk [vmem:[%s12980_s9 + $0xe8] sm:$0xff] %vm7871_vm9, %v7805_v16 }
 0x2da   : > { %v7822_v26 = vcombine.low %v7814_v43, %v7821_v48 }
 0x2dc   : > { %7903 = vst.msk [vmem:[%s12980_s9 + $0xf0] sm:$0xff] %vm7871_vm9, %v7822_v26 }
 0x2dd PF: > { %s13_s16 = sadd.s32 1, %s9390_s16   ;;  %s14547_s12 = smov %s9382_s14 }
 0x2de   : > { %p10_p8 = scmp.ge.s32.totalorder %s13_s16, 10   ;;  %s14548_s13 = smov %s9386_s15 }
 0x2df   : > { %s14549_s14 = smov %s14552_s17  ;;  %s14550_s15 = smov %s14556_s18 }
 0x2e0   :  { %12 = sbr.rel (!%p10_p8) target bundleno = 3 (0x3), region = 70 }

</bundles_post_ra>
